<compile_context>
chip_gen: v7x
topology: tpu7x:2x2x1
jax: 0.10.0
libtpu: 0.0.40
codegen_flags: <defaults>
</compile_context>

<pallas_src>
import functools
import math

import jax
import jax.numpy as jnp
from jax import lax
from jax.experimental import pallas as pl
from jax.experimental.pallas import tpu as pltpu


def _pick_chunk(total, target):
    """Largest divisor of `total` that is <= target, preferring multiples of 8."""
    if total <= target:
        return total
    divs = [d for d in range(1, target + 1) if total % d == 0]
    mult8 = [d for d in divs if d % 8 == 0]
    return max(mult8) if mult8 else max(divs)


def _vmem_limit(nbytes):
    # >= default scoped limit on every generation, <= v7x physical VMEM.
    return int(min(max(3 * nbytes // 2, 32 * 1024 * 1024), 64 * 1024 * 1024))


# ----------------------------------------------------------------------------
# Kernel 1: fused conv stack  (Conv1d 'same' + BatchNorm1d(eval) + ReLU) x L.
# One grid step = one batch element; activations stay in padded VMEM buffers.
#   refs: x[1,T,Cin] f32, w_0..w_{L-1} [K_l*Cin_l, F] bf16 (BN scale folded),
#         shifts[L,F] f32, out[1,T,F] bf16,
#         scratch buf0[T+2*p0,Cin] bf16, buf_a/buf_b[T+2*max_pad,F] bf16
# ----------------------------------------------------------------------------
def conv_stack_kernel(*refs, ksizes, t_chunk):
    n_layers = len(ksizes)
    x_ref = refs[0]
    w_refs = refs[1:1 + n_layers]
    shifts_ref = refs[1 + n_layers]
    out_ref = refs[2 + n_layers]
    buf0 = refs[3 + n_layers]
    buf_a = refs[4 + n_layers]
    buf_b = refs[5 + n_layers]

    T = out_ref.shape[1]
    F = out_ref.shape[2]
    Cin = x_ref.shape[2]
    k0 = ksizes[0]
    p0 = k0 // 2
    max_pad = max(k // 2 for k in ksizes)
    n_chunks = T // t_chunk

    # Zero only the halo rows; the interior is always fully overwritten per layer.
    if p0 > 0:
        zin = jnp.zeros((p0, Cin), jnp.bfloat16)
        buf0[0:p0, :] = zin
        buf0[p0 + T:p0 + T + p0, :] = zin
    zpad = jnp.zeros((max_pad, F), jnp.bfloat16)
    buf_a[0:max_pad, :] = zpad
    buf_a[max_pad + T:, :] = zpad
    buf_b[0:max_pad, :] = zpad
    buf_b[max_pad + T:, :] = zpad

    buf0[p0:p0 + T, :] = x_ref[0].astype(jnp.bfloat16)

    def layer(src_ref, dst_ref, w_ref, li, K, cin, base, is_last):
        shift = shifts_ref[li:li + 1, :]                       # [1, F] f32
        for c in range(n_chunks):                              # static T-chunk loop
            c0 = c * t_chunk
            acc = jnp.zeros((t_chunk, F), jnp.float32)
            for k in range(K):                                 # per-tap MXU matmuls
                lhs = src_ref[base + k + c0: base + k + c0 + t_chunk, :]
                acc = acc + jnp.dot(lhs, w_ref[k * cin:(k + 1) * cin, :],
                                    preferred_element_type=jnp.float32)
            y = jnp.maximum(acc + shift, 0.0)                  # BN shift + ReLU (f32)
            if is_last:
                out_ref[0, c0:c0 + t_chunk, :] = y.astype(out_ref.dtype)
            else:
                dst_ref[max_pad + c0: max_pad + c0 + t_chunk, :] = y.astype(jnp.bfloat16)

    # layer 0 reads the (p0-padded) raw-input buffer.
    layer(buf0, buf_a, w_refs[0], 0, k0, Cin, 0, n_layers == 1)
    src_ref, dst_ref = buf_a, buf_b
    for li in range(1, n_layers):
        K = ksizes[li]
        layer(src_ref, dst_ref, w_refs[li], li, K, F, max_pad - K // 2,
              li == n_layers - 1)
        src_ref, dst_ref = dst_ref, src_ref


def conv_stack(x, conv_ws, shifts):
    B, T, Cin = x.shape
    F = shifts.shape[-1]
    ksizes = tuple([conv_ws[0].shape[0] // Cin] + [w.shape[0] // F for w in conv_ws[1:]])
    p0 = ksizes[0] // 2
    max_pad = max(k // 2 for k in ksizes)
    t_chunk = _pick_chunk(T, 128)
    kernel = functools.partial(conv_stack_kernel, ksizes=ksizes, t_chunk=t_chunk)
    w_specs = [pl.BlockSpec(w.shape, lambda b: (0, 0)) for w in conv_ws]
    est = (2 * T * Cin * 4 + 2 * T * F * 2
           + sum(int(w.size) * 2 for w in conv_ws)
           + (T + 2 * p0) * Cin * 2 + 2 * (T + 2 * max_pad) * F * 2)
    return pl.pallas_call(
        kernel,
        out_shape=jax.ShapeDtypeStruct((B, T, F), jnp.bfloat16),
        grid=(B,),
        in_specs=[pl.BlockSpec((1, T, Cin), lambda b: (b, 0, 0))] + w_specs +
                 [pl.BlockSpec(shifts.shape, lambda b: (0, 0))],
        out_specs=pl.BlockSpec((1, T, F), lambda b: (b, 0, 0)),
        scratch_shapes=[pltpu.VMEM((T + 2 * p0, Cin), jnp.bfloat16),
                        pltpu.VMEM((T + 2 * max_pad, F), jnp.bfloat16),
                        pltpu.VMEM((T + 2 * max_pad, F), jnp.bfloat16)],
        compiler_params=pltpu.CompilerParams(
            dimension_semantics=("parallel",),
            vmem_limit_bytes=_vmem_limit(est)),
    )(x, *conv_ws, shifts)


# ----------------------------------------------------------------------------
# Kernel 2: fused bidirectional LSTM layer (PyTorch gate order i, f, g, o).
#   x_ref  : [T, b_blk, Din]   time-major input block (bf16)
#   wih    : [Din, 8H]         [W_ih_fwd^T | W_ih_bwd^T]          (bf16)
#   whh    : [2H, 8H]          block-diag [W_hh_fwd^T ; W_hh_bwd^T] (bf16)
#   bias   : [1, 8H]           (b_ih + b_hh) per direction        (f32)
#   out    : [T, b_blk, 2H]    lanes 0:H forward, H:2H backward   (bf16)
#   scratch: gx_f / gx_b [T, b_blk, 4H] bf16  (hoisted input gates)
# ----------------------------------------------------------------------------
def bilstm_kernel(x_ref, wih_ref, whh_ref, b_ref, out_ref, gx_f, gx_b, *, t_chunk):
    T, b_blk, Din = x_ref.shape
    H = whh_ref.shape[0] // 2
    n_chunks = T // t_chunk

    wih = wih_ref[...]
    bias = b_ref[...]

    # ---- hoisted, T-chunked input projection for BOTH directions (bias folded) ----
    for c in range(n_chunks):
        c0 = c * t_chunk
        xc = x_ref[c0:c0 + t_chunk, :, :].astype(jnp.bfloat16)
        g = jnp.dot(xc.reshape(t_chunk * b_blk, Din), wih,
                    preferred_element_type=jnp.float32) + bias        # [tc*b, 8H]
        g = g.astype(jnp.bfloat16).reshape(t_chunk, b_blk, 8 * H)
        gx_f[c0:c0 + t_chunk, :, :] = g[:, :, 0:4 * H]
        gx_b[c0:c0 + t_chunk, :, :] = g[:, :, 4 * H:8 * H]

    whh = whh_ref[...]                                                 # loop invariant

    def step(it, carry):
        h_cat, c_f, c_b = carry
        tb = T - 1 - it
        # single fused recurrent matmul for both directions (block-diagonal weight)
        rec = jnp.dot(h_cat.astype(jnp.bfloat16), whh,
                      preferred_element_type=jnp.float32)              # [b, 8H]
        gf = gx_f[it].astype(jnp.float32) + rec[:, 0:4 * H]
        gb = gx_b[tb].astype(jnp.float32) + rec[:, 4 * H:8 * H]
        sf = jax.nn.sigmoid(gf)
        sb = jax.nn.sigmoid(gb)
        c_f_new = sf[:, H:2 * H] * c_f + sf[:, 0:H] * jnp.tanh(gf[:, 2 * H:3 * H])
        c_b_new = sb[:, H:2 * H] * c_b + sb[:, 0:H] * jnp.tanh(gb[:, 2 * H:3 * H])
        h_f = sf[:, 3 * H:4 * H] * jnp.tanh(c_f_new)
        h_b = sb[:, 3 * H:4 * H] * jnp.tanh(c_b_new)
        # store per-step hidden states directly into the output block
        out_ref[it, :, 0:H] = h_f.astype(out_ref.dtype)
        out_ref[tb, :, H:2 * H] = h_b.astype(out_ref.dtype)
        return (jnp.concatenate([h_f, h_b], axis=1), c_f_new, c_b_new)

    h0 = jnp.zeros((b_blk, 2 * H), jnp.float32)
    c0s = jnp.zeros((b_blk, H), jnp.float32)
    lax.fori_loop(0, T, step, (h0, c0s, c0s))


def bilstm_fused(x_tm, layer):
    T, B, Din = x_tm.shape
    H = layer["whh"].shape[0] // 2
    # split the batch across TensorCores when the halves stay >= 8 sublanes (v7x)
    b_blk = B // 2 if (B % 2 == 0 and (B // 2) % 8 == 0) else B
    n_blocks = B // b_blk
    t_chunk = _pick_chunk(T, 256)
    kernel = functools.partial(bilstm_kernel, t_chunk=t_chunk)
    est = (2 * T * b_blk * Din * x_tm.dtype.itemsize          # input block (dbl-buf)
           + 2 * T * b_blk * 2 * H * 2                        # output block (dbl-buf)
           + 2 * T * b_blk * 4 * H * 2                        # gx_f + gx_b (bf16)
           + (Din * 8 * H + 2 * H * 8 * H) * 2 + 8 * H * 4)
    return pl.pallas_call(
        kernel,
        out_shape=jax.ShapeDtypeStruct((T, B, 2 * H), jnp.bfloat16),
        grid=(n_blocks,),
        in_specs=[pl.BlockSpec((T, b_blk, Din), lambda nb: (0, nb, 0)),
                  pl.BlockSpec(layer["wih"].shape, lambda nb: (0, 0)),
                  pl.BlockSpec(layer["whh"].shape, lambda nb: (0, 0)),
                  pl.BlockSpec(layer["bias"].shape, lambda nb: (0, 0))],
        out_specs=pl.BlockSpec((T, b_blk, 2 * H), lambda nb: (0, nb, 0)),
        scratch_shapes=[pltpu.VMEM((T, b_blk, 4 * H), jnp.bfloat16),
                        pltpu.VMEM((T, b_blk, 4 * H), jnp.bfloat16)],
        compiler_params=pltpu.CompilerParams(
            dimension_semantics=("parallel",),
            vmem_limit_bytes=_vmem_limit(est)),
    )(x_tm, layer["wih"], layer["whh"], layer["bias"])


# ----------------------------------------------------------------------------
# Kernel 3: final_projection (Linear) + LayerNorm (embd_method='last'), fused.
# Reads a time-major block [t_blk, B, D] and writes the batch-major output block
# [B, t_blk, D] directly (per-batch-row stores), removing the host transpose.
# ----------------------------------------------------------------------------
def proj_ln_kernel(x_ref, w_ref, b_ref, g_ref, beta_ref, out_ref):
    t_blk, B, D = x_ref.shape
    w = w_ref[...]
    bias = b_ref[...]
    gamma = g_ref[...]
    beta = beta_ref[...]
    for b in range(B):                                       # static, small batch loop
        xb = x_ref[:, b:b + 1, :].reshape(t_blk, D).astype(jnp.bfloat16)
        y = jnp.dot(xb, w, preferred_element_type=jnp.float32) + bias
        mu = jnp.mean(y, axis=-1, keepdims=True)
        var = jnp.mean(jnp.square(y - mu), axis=-1, keepdims=True)
        yn = (y - mu) * lax.rsqrt(var + 1e-5)
        out_ref[b] = (yn * gamma + beta).astype(out_ref.dtype)


def proj_layernorm(x_tm, proj_w, proj_b, ln_g, ln_b):
    T, B, D = x_tm.shape
    t_blk = _pick_chunk(T, 256)
    if t_blk % 8 != 0 and t_blk != T:    # output block needs t_blk % 8 == 0 or == T
        t_blk = T
    est = (2 * t_blk * B * D * x_tm.dtype.itemsize + 2 * B * t_blk * D * 4
           + D * D * 2 + 4 * D * 4)
    return pl.pallas_call(
        proj_ln_kernel,
        out_shape=jax.ShapeDtypeStruct((B, T, D), jnp.float32),
        grid=(T // t_blk,),
        in_specs=[pl.BlockSpec((t_blk, B, D), lambda i: (i, 0, 0)),
                  pl.BlockSpec(proj_w.shape, lambda i: (0, 0)),
                  pl.BlockSpec(proj_b.shape, lambda i: (0, 0)),
                  pl.BlockSpec(ln_g.shape, lambda i: (0, 0)),
                  pl.BlockSpec(ln_b.shape, lambda i: (0, 0))],
        out_specs=pl.BlockSpec((B, t_blk, D), lambda i: (0, i, 0)),
        compiler_params=pltpu.CompilerParams(
            dimension_semantics=("parallel",),
            vmem_limit_bytes=_vmem_limit(est)),
    )(x_tm, proj_w, proj_b, ln_g, ln_b)


# ----------------------------------------------------------------------------
# Parameters: torch-like deterministic init, pre-transposed / pre-fused once:
# BN scale folded into im2col conv weights (f32, then bf16), [W_ih_f|W_ih_b]^T,
# block-diagonal [W_hh_f^T ; W_hh_b^T], summed biases, transposed projection.
# ----------------------------------------------------------------------------
def init_params(key, input_size, hidden_size, num_filters=128,
                kernel_sizes=(3, 5, 7), num_layers=5):
    keys = iter(jax.random.split(key, 64))
    H = hidden_size
    params = {}

    ks_list = [kernel_sizes[0]] + [kernel_sizes[i % len(kernel_sizes)]
                                   for i in range(1, num_layers - 1)]
    conv_ws, shifts = [], []
    in_ch = input_size
    for ksize in ks_list:
        bound = 1.0 / math.sqrt(in_ch * ksize)
        w = jax.random.uniform(next(keys), (num_filters, in_ch, ksize),
                               minval=-bound, maxval=bound)            # torch layout
        b_conv = jax.random.uniform(next(keys), (num_filters,),
                                    minval=-bound, maxval=bound)
        gamma = jax.random.uniform(next(keys), (num_filters,), minval=0.5, maxval=1.5)
        beta = 0.1 * jax.random.normal(next(keys), (num_filters,))
        run_mean = 0.1 * jax.random.normal(next(keys), (num_filters,))
        run_var = jax.random.uniform(next(keys), (num_filters,), minval=0.5, maxval=1.5)
        scale = gamma / jnp.sqrt(run_var + 1e-5)
        shift = beta - run_mean * scale + b_conv * scale
        # fold BN scale into the conv weights (f32) and flatten to im2col layout:
        # W_flat[k*Cin + c, o] = w[o, c, k] * scale[o]
        w_fold = w * scale[:, None, None]
        w_flat = jnp.transpose(w_fold, (2, 1, 0)).reshape(ksize * in_ch, num_filters)
        conv_ws.append(w_flat.astype(jnp.bfloat16))
        shifts.append(shift.astype(jnp.float32))
        in_ch = num_filters
    params["conv_w"] = conv_ws
    params["conv_shift"] = jnp.stack(shifts)                           # [L, F]

    # BiLSTM: 2 layers, bidirectional (gate order i, f, g, o).
    stdv = 1.0 / math.sqrt(H)
    lstm_layers = []
    lstm_in = num_filters
    for _ in range(2):
        wih_parts, whh_parts, bias_parts = [], [], []
        for _d in range(2):
            w_ih = jax.random.uniform(next(keys), (4 * H, lstm_in),
                                      minval=-stdv, maxval=stdv)
            w_hh = jax.random.uniform(next(keys), (4 * H, H),
                                      minval=-stdv, maxval=stdv)
            b_ih = jax.random.uniform(next(keys), (4 * H,), minval=-stdv, maxval=stdv)
            b_hh = jax.random.uniform(next(keys), (4 * H,), minval=-stdv, maxval=stdv)
            wih_parts.append(jnp.transpose(w_ih))                      # [Din, 4H]
            whh_parts.append(jnp.transpose(w_hh))                      # [H, 4H]
            bias_parts.append(b_ih + b_hh)
        wih = jnp.concatenate(wih_parts, axis=1)                       # [Din, 8H]
        whh = jnp.zeros((2 * H, 8 * H), jnp.float32)                   # block-diagonal
        whh = whh.at[0:H, 0:4 * H].set(whh_parts[0])
        whh = whh.at[H:2 * H, 4 * H:8 * H].set(whh_parts[1])
        lstm_layers.append({
            "wih": wih.astype(jnp.bfloat16),
            "whh": whh.astype(jnp.bfloat16),
            "bias": jnp.concatenate(bias_parts).reshape(1, 8 * H).astype(jnp.float32),
        })
        lstm_in = 2 * H
    params["lstm"] = lstm_layers

    # final_projection + LayerNorm
    D = 2 * H
    bound = 1.0 / math.sqrt(D)
    pw = jax.random.uniform(next(keys), (D, D), minval=-bound, maxval=bound)  # [out,in]
    pb = jax.random.uniform(next(keys), (D,), minval=-bound, maxval=bound)
    params["proj_w"] = jnp.transpose(pw).astype(jnp.bfloat16)
    params["proj_b"] = pb.reshape(1, D).astype(jnp.float32)
    params["ln_g"] = jnp.ones((1, D), jnp.float32)
    params["ln_b"] = jnp.zeros((1, D), jnp.float32)
    return params


def cnn_encoder_forward(x, params):
    # x: [B, T, input_size]  ->  [B, T, 2H]   (embd_method='last')
    h = conv_stack(x.astype(jnp.float32), params["conv_w"], params["conv_shift"])
    # TODO(synk): the batch->time-major relayout between conv and LSTM stays as one
    # host transpose; expressing it via BlockSpec needs sub-8 sublane output blocks.
    h = jnp.transpose(h, (1, 0, 2))                                    # [T, B, 128]
    for layer in params["lstm"]:
        h = bilstm_fused(h, layer)                                     # [T, B, 2H]
    return proj_layernorm(h, params["proj_w"], params["proj_b"],
                          params["ln_g"], params["ln_b"])              # [B, T, 2H]


if __name__ == "__main__":
    key = jax.random.PRNGKey(0)
    k_param, k_x = jax.random.split(key)

    B, T = 2, 8
    input_size, hidden_size = 16, 32   # num_filters fixed at 128 by the module

    params = init_params(k_param, input_size, hidden_size)
    x = jax.random.normal(k_x, (B, T, input_size), dtype=jnp.float32)

    fwd = jax.jit(cnn_encoder_forward)
    out = jax.block_until_ready(fwd(x, params))

    assert out.shape == (B, T, 2 * hidden_size), out.shape
    assert bool(jnp.all(jnp.isfinite(out)))
    print("KERNEL_OK")
</pallas_src>

<mosaic_0001>
module attributes {stable_mosaic.version = 11 : i64} {
  func.func @bilstm_kernel(%arg0: i32, %arg1: memref<8x2x128xbf16, #tpu.memory_space<vmem>>, %arg2: memref<128x256xbf16, #tpu.memory_space<vmem>>, %arg3: memref<64x256xbf16, #tpu.memory_space<vmem>>, %arg4: memref<1x256xf32, #tpu.memory_space<vmem>>, %arg5: memref<8x2x64xbf16, #tpu.memory_space<vmem>>, %arg6: memref<8x2x128xbf16, #tpu.memory_space<vmem>>, %arg7: memref<8x2x128xbf16, #tpu.memory_space<vmem>>) attributes {dimension_semantics = [#tpu.dimension_semantics<parallel>], iteration_bounds = array<i64: 1>, scalar_prefetch = 0 : i64, scratch_operands = 2 : i64, tpu.core_type = #tpu.core_type<tc>, window_params = [{transform_indices = @transform_0, window_bounds = array<i64: 8, 2, 128>}, {pipeline_mode = #tpu.pipeline_mode<synchronous>, transform_indices = @transform_1, window_bounds = array<i64: 128, 256>}, {pipeline_mode = #tpu.pipeline_mode<synchronous>, transform_indices = @transform_2, window_bounds = array<i64: 64, 256>}, {pipeline_mode = #tpu.pipeline_mode<synchronous>, transform_indices = @transform_3, window_bounds = array<i64: 1, 256>}, {transform_indices = @transform_4, window_bounds = array<i64: 8, 2, 64>}]} {
    %c0 = arith.constant 0 : index
    %c0_0 = arith.constant 0 : index
    %0 = vector.load %arg2[%c0, %c0_0] : memref<128x256xbf16, #tpu.memory_space<vmem>>, vector<128x256xbf16>
    %c0_1 = arith.constant 0 : index
    %c0_2 = arith.constant 0 : index
    %1 = vector.load %arg4[%c0_1, %c0_2] : memref<1x256xf32, #tpu.memory_space<vmem>>, vector<1x256xf32>
    %c0_3 = arith.constant 0 : index
    %c0_4 = arith.constant 0 : index
    %c0_5 = arith.constant 0 : index
    %2 = vector.load %arg1[%c0_3, %c0_4, %c0_5] : memref<8x2x128xbf16, #tpu.memory_space<vmem>>, vector<8x2x128xbf16>
    %3 = vector.shape_cast %2 : vector<8x2x128xbf16> to vector<16x128xbf16>
    %cst = arith.constant dense<0.000000e+00> : vector<16x256xf32>
    %4 = tpu.matmul %3, %0, %cst {dimension_numbers = #tpu.dot_dimension_numbers<[1], [0], [0], [1], [0, 0, 1, 1], [], []>} : vector<16x128xbf16>, vector<128x256xbf16>, vector<16x256xf32> -> vector<16x256xf32>
    %5 = vector.broadcast %1 : vector<1x256xf32> to vector<16x256xf32>
    %6 = arith.addf %4, %5 : vector<16x256xf32>
    %7 = arith.truncf %6 : vector<16x256xf32> to vector<16x256xbf16>
    %8 = vector.shape_cast %7 : vector<16x256xbf16> to vector<8x2x256xbf16>
    %9 = vector.extract_strided_slice %8 {offsets = [0, 0, 0], sizes = [8, 2, 128], strides = [1, 1, 1]} : vector<8x2x256xbf16> to vector<8x2x128xbf16>
    %c0_6 = arith.constant 0 : index
    %c0_7 = arith.constant 0 : index
    %c0_8 = arith.constant 0 : index
    %10 = vector.load %arg6[%c0_6, %c0_7, %c0_8] : memref<8x2x128xbf16, #tpu.memory_space<vmem>>, vector<8x2x128xbf16>
    tpu.vector_store %arg6[%c0_6, %c0_7, %c0_8], %9 {strides = array<i32>} : memref<8x2x128xbf16, #tpu.memory_space<vmem>>, vector<8x2x128xbf16>,
    %11 = vector.extract_strided_slice %8 {offsets = [0, 0, 128], sizes = [8, 2, 128], strides = [1, 1, 1]} : vector<8x2x256xbf16> to vector<8x2x128xbf16>
    %c0_9 = arith.constant 0 : index
    %c0_10 = arith.constant 0 : index
    %c0_11 = arith.constant 0 : index
    %12 = vector.load %arg7[%c0_9, %c0_10, %c0_11] : memref<8x2x128xbf16, #tpu.memory_space<vmem>>, vector<8x2x128xbf16>
    tpu.vector_store %arg7[%c0_9, %c0_10, %c0_11], %11 {strides = array<i32>} : memref<8x2x128xbf16, #tpu.memory_space<vmem>>, vector<8x2x128xbf16>,
    %c0_12 = arith.constant 0 : index
    %c0_13 = arith.constant 0 : index
    %13 = vector.load %arg3[%c0_12, %c0_13] : memref<64x256xbf16, #tpu.memory_space<vmem>>, vector<64x256xbf16>
    %cst_14 = arith.constant 0.000000e+00 : f32
    %14 = vector.broadcast %cst_14 : f32 to vector<2x64xf32>
    %cst_15 = arith.constant 0.000000e+00 : f32
    %15 = vector.broadcast %cst_15 : f32 to vector<2x32xf32>
    %c0_i32 = arith.constant 0 : i32
    %c8_i32 = arith.constant 8 : i32
    %16 = arith.addi %c0_i32, %c8_i32 : i32
    %c1_i32 = arith.constant 1 : i32
    %17:3 = scf.for %arg8 = %c0_i32 to %16 step %c1_i32 iter_args(%arg9 = %14, %arg10 = %15, %arg11 = %15) -> (vector<2x64xf32>, vector<2x32xf32>, vector<2x32xf32>)  : i32 {
      %c7_i32 = arith.constant 7 : i32
      %18 = arith.subi %c7_i32, %arg8 : i32
      %19 = arith.truncf %arg9 : vector<2x64xf32> to vector<2x64xbf16>
      %cst_17 = arith.constant dense<0.000000e+00> : vector<2x256xf32>
      %20 = tpu.matmul %19, %13, %cst_17 {dimension_numbers = #tpu.dot_dimension_numbers<[1], [0], [0], [1], [0, 0, 1, 1], [], []>} : vector<2x64xbf16>, vector<64x256xbf16>, vector<2x256xf32> -> vector<2x256xf32>
      %21 = arith.index_cast %arg8 : i32 to index
      %c0_18 = arith.constant 0 : index
      %c0_19 = arith.constant 0 : index
      %22 = vector.load %arg6[%21, %c0_18, %c0_19] : memref<8x2x128xbf16, #tpu.memory_space<vmem>>, vector<1x2x128xbf16>
      %23 = vector.shape_cast %22 : vector<1x2x128xbf16> to vector<2x128xbf16>
      %24 = arith.extf %23 : vector<2x128xbf16> to vector<2x128xf32>
      %25 = vector.extract_strided_slice %20 {offsets = [0, 0], sizes = [2, 128], strides = [1, 1]} : vector<2x256xf32> to vector<2x128xf32>
      %26 = arith.addf %24, %25 : vector<2x128xf32>
      %27 = arith.index_cast %18 : i32 to index
      %c0_20 = arith.constant 0 : index
      %c0_21 = arith.constant 0 : index
      %28 = vector.load %arg7[%27, %c0_20, %c0_21] : memref<8x2x128xbf16, #tpu.memory_space<vmem>>, vector<1x2x128xbf16>
      %29 = vector.shape_cast %28 : vector<1x2x128xbf16> to vector<2x128xbf16>
      %30 = arith.extf %29 : vector<2x128xbf16> to vector<2x128xf32>
      %31 = vector.extract_strided_slice %20 {offsets = [0, 128], sizes = [2, 128], strides = [1, 1]} : vector<2x256xf32> to vector<2x128xf32>
      %32 = arith.addf %30, %31 : vector<2x128xf32>
      %33 = arith.negf %26 : vector<2x128xf32>
      %34 = math.exp %33 : vector<2x128xf32>
      %cst_22 = arith.constant 1.000000e+00 : f32
      %35 = vector.broadcast %cst_22 : f32 to vector<2x128xf32>
      %36 = arith.addf %35, %34 : vector<2x128xf32>
      %37 = arith.divf %35, %36 : vector<2x128xf32>
      %38 = arith.negf %32 : vector<2x128xf32>
      %39 = math.exp %38 : vector<2x128xf32>
      %cst_23 = arith.constant 1.000000e+00 : f32
      %40 = vector.broadcast %cst_23 : f32 to vector<2x128xf32>
      %41 = arith.addf %40, %39 : vector<2x128xf32>
      %42 = arith.divf %40, %41 : vector<2x128xf32>
      %43 = vector.extract_strided_slice %37 {offsets = [0, 32], sizes = [2, 32], strides = [1, 1]} : vector<2x128xf32> to vector<2x32xf32>
      %44 = arith.mulf %43, %arg10 : vector<2x32xf32>
      %45 = vector.extract_strided_slice %37 {offsets = [0, 0], sizes = [2, 32], strides = [1, 1]} : vector<2x128xf32> to vector<2x32xf32>
      %46 = vector.extract_strided_slice %26 {offsets = [0, 64], sizes = [2, 32], strides = [1, 1]} : vector<2x128xf32> to vector<2x32xf32>
      %47 = math.tanh %46 : vector<2x32xf32>
      %48 = arith.mulf %45, %47 : vector<2x32xf32>
      %49 = arith.addf %44, %48 : vector<2x32xf32>
      %50 = vector.extract_strided_slice %42 {offsets = [0, 32], sizes = [2, 32], strides = [1, 1]} : vector<2x128xf32> to vector<2x32xf32>
      %51 = arith.mulf %50, %arg11 : vector<2x32xf32>
      %52 = vector.extract_strided_slice %42 {offsets = [0, 0], sizes = [2, 32], strides = [1, 1]} : vector<2x128xf32> to vector<2x32xf32>
      %53 = vector.extract_strided_slice %32 {offsets = [0, 64], sizes = [2, 32], strides = [1, 1]} : vector<2x128xf32> to vector<2x32xf32>
      %54 = math.tanh %53 : vector<2x32xf32>
      %55 = arith.mulf %52, %54 : vector<2x32xf32>
      %56 = arith.addf %51, %55 : vector<2x32xf32>
      %57 = vector.extract_strided_slice %37 {offsets = [0, 96], sizes = [2, 32], strides = [1, 1]} : vector<2x128xf32> to vector<2x32xf32>
      %58 = math.tanh %49 : vector<2x32xf32>
      %59 = arith.mulf %57, %58 : vector<2x32xf32>
      %60 = vector.extract_strided_slice %42 {offsets = [0, 96], sizes = [2, 32], strides = [1, 1]} : vector<2x128xf32> to vector<2x32xf32>
      %61 = math.tanh %56 : vector<2x32xf32>
      %62 = arith.mulf %60, %61 : vector<2x32xf32>
      %63 = arith.truncf %59 : vector<2x32xf32> to vector<2x32xbf16>
      %64 = arith.index_cast %arg8 : i32 to index
      %c0_24 = arith.constant 0 : index
      %c0_25 = arith.constant 0 : index
      %65 = vector.load %arg5[%64, %c0_24, %c0_25] : memref<8x2x64xbf16, #tpu.memory_space<vmem>>, vector<1x2x32xbf16>
      %66 = vector.shape_cast %65 : vector<1x2x32xbf16> to vector<2x32xbf16>
      %67 = vector.shape_cast %63 : vector<2x32xbf16> to vector<1x2x32xbf16>
      tpu.vector_store %arg5[%64, %c0_24, %c0_25], %67 {strides = array<i32>} : memref<8x2x64xbf16, #tpu.memory_space<vmem>>, vector<1x2x32xbf16>,
      %68 = arith.truncf %62 : vector<2x32xf32> to vector<2x32xbf16>
      %69 = arith.index_cast %18 : i32 to index
      %c0_26 = arith.constant 0 : index
      %c32 = arith.constant 32 : index
      %70 = vector.load %arg5[%69, %c0_26, %c32] : memref<8x2x64xbf16, #tpu.memory_space<vmem>>, vector<1x2x32xbf16>
      %71 = vector.shape_cast %70 : vector<1x2x32xbf16> to vector<2x32xbf16>
      %72 = vector.shape_cast %68 : vector<2x32xbf16> to vector<1x2x32xbf16>
      tpu.vector_store %arg5[%69, %c0_26, %c32], %72 {strides = array<i32>} : memref<8x2x64xbf16, #tpu.memory_space<vmem>>, vector<1x2x32xbf16>,
      %73 = tpu.concatenate %59, %62 in 1 : vector<2x32xf32>, vector<2x32xf32> -> vector<2x64xf32>
      scf.yield %73, %49, %56 : vector<2x64xf32>, vector<2x32xf32>, vector<2x32xf32>
    }
    %c8_i32_16 = arith.constant 8 : i32
    return
  }
  func.func @transform_0(%arg0: i32) -> (i32, i32, i32) {
    %c0_i32 = arith.constant 0 : i32
    %c0_i32_0 = arith.constant 0 : i32
    %c0_i32_1 = arith.constant 0 : i32
    return %c0_i32, %arg0, %c0_i32_0 : i32, i32, i32
  }
  func.func @transform_1(%arg0: i32) -> (i32, i32) {
    %c0_i32 = arith.constant 0 : i32
    %c0_i32_0 = arith.constant 0 : i32
    %c0_i32_1 = arith.constant 0 : i32
    return %c0_i32, %c0_i32_0 : i32, i32
  }
  func.func @transform_2(%arg0: i32) -> (i32, i32) {
    %c0_i32 = arith.constant 0 : i32
    %c0_i32_0 = arith.constant 0 : i32
    %c0_i32_1 = arith.constant 0 : i32
    return %c0_i32, %c0_i32_0 : i32, i32
  }
  func.func @transform_3(%arg0: i32) -> (i32, i32) {
    %c0_i32 = arith.constant 0 : i32
    %c0_i32_0 = arith.constant 0 : i32
    %c0_i32_1 = arith.constant 0 : i32
    return %c0_i32, %c0_i32_0 : i32, i32
  }
  func.func @transform_4(%arg0: i32) -> (i32, i32, i32) {
    %c0_i32 = arith.constant 0 : i32
    %c0_i32_0 = arith.constant 0 : i32
    %c0_i32_1 = arith.constant 0 : i32
    return %c0_i32, %arg0, %c0_i32_0 : i32, i32, i32
  }
}

module attributes {stable_mosaic.version = 11 : i64} {
  func.func @bilstm_kernel(%arg0: i32, %arg1: memref<8x2x64xbf16, #tpu.memory_space<vmem>>, %arg2: memref<64x256xbf16, #tpu.memory_space<vmem>>, %arg3: memref<64x256xbf16, #tpu.memory_space<vmem>>, %arg4: memref<1x256xf32, #tpu.memory_space<vmem>>, %arg5: memref<8x2x64xbf16, #tpu.memory_space<vmem>>, %arg6: memref<8x2x128xbf16, #tpu.memory_space<vmem>>, %arg7: memref<8x2x128xbf16, #tpu.memory_space<vmem>>) attributes {dimension_semantics = [#tpu.dimension_semantics<parallel>], iteration_bounds = array<i64: 1>, scalar_prefetch = 0 : i64, scratch_operands = 2 : i64, tpu.core_type = #tpu.core_type<tc>, window_params = [{transform_indices = @transform_0, window_bounds = array<i64: 8, 2, 64>}, {pipeline_mode = #tpu.pipeline_mode<synchronous>, transform_indices = @transform_1, window_bounds = array<i64: 64, 256>}, {pipeline_mode = #tpu.pipeline_mode<synchronous>, transform_indices = @transform_2, window_bounds = array<i64: 64, 256>}, {pipeline_mode = #tpu.pipeline_mode<synchronous>, transform_indices = @transform_3, window_bounds = array<i64: 1, 256>}, {transform_indices = @transform_4, window_bounds = array<i64: 8, 2, 64>}]} {
    %c0 = arith.constant 0 : index
    %c0_0 = arith.constant 0 : index
    %0 = vector.load %arg2[%c0, %c0_0] : memref<64x256xbf16, #tpu.memory_space<vmem>>, vector<64x256xbf16>
    %c0_1 = arith.constant 0 : index
    %c0_2 = arith.constant 0 : index
    %1 = vector.load %arg4[%c0_1, %c0_2] : memref<1x256xf32, #tpu.memory_space<vmem>>, vector<1x256xf32>
    %c0_3 = arith.constant 0 : index
    %c0_4 = arith.constant 0 : index
    %c0_5 = arith.constant 0 : index
    %2 = vector.load %arg1[%c0_3, %c0_4, %c0_5] : memref<8x2x64xbf16, #tpu.memory_space<vmem>>, vector<8x2x64xbf16>
    %3 = vector.shape_cast %2 : vector<8x2x64xbf16> to vector<16x64xbf16>
    %cst = arith.constant dense<0.000000e+00> : vector<16x256xf32>
    %4 = tpu.matmul %3, %0, %cst {dimension_numbers = #tpu.dot_dimension_numbers<[1], [0], [0], [1], [0, 0, 1, 1], [], []>} : vector<16x64xbf16>, vector<64x256xbf16>, vector<16x256xf32> -> vector<16x256xf32>
    %5 = vector.broadcast %1 : vector<1x256xf32> to vector<16x256xf32>
    %6 = arith.addf %4, %5 : vector<16x256xf32>
    %7 = arith.truncf %6 : vector<16x256xf32> to vector<16x256xbf16>
    %8 = vector.shape_cast %7 : vector<16x256xbf16> to vector<8x2x256xbf16>
    %9 = vector.extract_strided_slice %8 {offsets = [0, 0, 0], sizes = [8, 2, 128], strides = [1, 1, 1]} : vector<8x2x256xbf16> to vector<8x2x128xbf16>
    %c0_6 = arith.constant 0 : index
    %c0_7 = arith.constant 0 : index
    %c0_8 = arith.constant 0 : index
    %10 = vector.load %arg6[%c0_6, %c0_7, %c0_8] : memref<8x2x128xbf16, #tpu.memory_space<vmem>>, vector<8x2x128xbf16>
    tpu.vector_store %arg6[%c0_6, %c0_7, %c0_8], %9 {strides = array<i32>} : memref<8x2x128xbf16, #tpu.memory_space<vmem>>, vector<8x2x128xbf16>,
    %11 = vector.extract_strided_slice %8 {offsets = [0, 0, 128], sizes = [8, 2, 128], strides = [1, 1, 1]} : vector<8x2x256xbf16> to vector<8x2x128xbf16>
    %c0_9 = arith.constant 0 : index
    %c0_10 = arith.constant 0 : index
    %c0_11 = arith.constant 0 : index
    %12 = vector.load %arg7[%c0_9, %c0_10, %c0_11] : memref<8x2x128xbf16, #tpu.memory_space<vmem>>, vector<8x2x128xbf16>
    tpu.vector_store %arg7[%c0_9, %c0_10, %c0_11], %11 {strides = array<i32>} : memref<8x2x128xbf16, #tpu.memory_space<vmem>>, vector<8x2x128xbf16>,
    %c0_12 = arith.constant 0 : index
    %c0_13 = arith.constant 0 : index
    %13 = vector.load %arg3[%c0_12, %c0_13] : memref<64x256xbf16, #tpu.memory_space<vmem>>, vector<64x256xbf16>
    %cst_14 = arith.constant 0.000000e+00 : f32
    %14 = vector.broadcast %cst_14 : f32 to vector<2x64xf32>
    %cst_15 = arith.constant 0.000000e+00 : f32
    %15 = vector.broadcast %cst_15 : f32 to vector<2x32xf32>
    %c0_i32 = arith.constant 0 : i32
    %c8_i32 = arith.constant 8 : i32
    %16 = arith.addi %c0_i32, %c8_i32 : i32
    %c1_i32 = arith.constant 1 : i32
    %17:3 = scf.for %arg8 = %c0_i32 to %16 step %c1_i32 iter_args(%arg9 = %14, %arg10 = %15, %arg11 = %15) -> (vector<2x64xf32>, vector<2x32xf32>, vector<2x32xf32>)  : i32 {
      %c7_i32 = arith.constant 7 : i32
      %18 = arith.subi %c7_i32, %arg8 : i32
      %19 = arith.truncf %arg9 : vector<2x64xf32> to vector<2x64xbf16>
      %cst_17 = arith.constant dense<0.000000e+00> : vector<2x256xf32>
      %20 = tpu.matmul %19, %13, %cst_17 {dimension_numbers = #tpu.dot_dimension_numbers<[1], [0], [0], [1], [0, 0, 1, 1], [], []>} : vector<2x64xbf16>, vector<64x256xbf16>, vector<2x256xf32> -> vector<2x256xf32>
      %21 = arith.index_cast %arg8 : i32 to index
      %c0_18 = arith.constant 0 : index
      %c0_19 = arith.constant 0 : index
      %22 = vector.load %arg6[%21, %c0_18, %c0_19] : memref<8x2x128xbf16, #tpu.memory_space<vmem>>, vector<1x2x128xbf16>
      %23 = vector.shape_cast %22 : vector<1x2x128xbf16> to vector<2x128xbf16>
      %24 = arith.extf %23 : vector<2x128xbf16> to vector<2x128xf32>
      %25 = vector.extract_strided_slice %20 {offsets = [0, 0], sizes = [2, 128], strides = [1, 1]} : vector<2x256xf32> to vector<2x128xf32>
      %26 = arith.addf %24, %25 : vector<2x128xf32>
      %27 = arith.index_cast %18 : i32 to index
      %c0_20 = arith.constant 0 : index
      %c0_21 = arith.constant 0 : index
      %28 = vector.load %arg7[%27, %c0_20, %c0_21] : memref<8x2x128xbf16, #tpu.memory_space<vmem>>, vector<1x2x128xbf16>
      %29 = vector.shape_cast %28 : vector<1x2x128xbf16> to vector<2x128xbf16>
      %30 = arith.extf %29 : vector<2x128xbf16> to vector<2x128xf32>
      %31 = vector.extract_strided_slice %20 {offsets = [0, 128], sizes = [2, 128], strides = [1, 1]} : vector<2x256xf32> to vector<2x128xf32>
      %32 = arith.addf %30, %31 : vector<2x128xf32>
      %33 = arith.negf %26 : vector<2x128xf32>
      %34 = math.exp %33 : vector<2x128xf32>
      %cst_22 = arith.constant 1.000000e+00 : f32
      %35 = vector.broadcast %cst_22 : f32 to vector<2x128xf32>
      %36 = arith.addf %35, %34 : vector<2x128xf32>
      %37 = arith.divf %35, %36 : vector<2x128xf32>
      %38 = arith.negf %32 : vector<2x128xf32>
      %39 = math.exp %38 : vector<2x128xf32>
      %cst_23 = arith.constant 1.000000e+00 : f32
      %40 = vector.broadcast %cst_23 : f32 to vector<2x128xf32>
      %41 = arith.addf %40, %39 : vector<2x128xf32>
      %42 = arith.divf %40, %41 : vector<2x128xf32>
      %43 = vector.extract_strided_slice %37 {offsets = [0, 32], sizes = [2, 32], strides = [1, 1]} : vector<2x128xf32> to vector<2x32xf32>
      %44 = arith.mulf %43, %arg10 : vector<2x32xf32>
      %45 = vector.extract_strided_slice %37 {offsets = [0, 0], sizes = [2, 32], strides = [1, 1]} : vector<2x128xf32> to vector<2x32xf32>
      %46 = vector.extract_strided_slice %26 {offsets = [0, 64], sizes = [2, 32], strides = [1, 1]} : vector<2x128xf32> to vector<2x32xf32>
      %47 = math.tanh %46 : vector<2x32xf32>
      %48 = arith.mulf %45, %47 : vector<2x32xf32>
      %49 = arith.addf %44, %48 : vector<2x32xf32>
      %50 = vector.extract_strided_slice %42 {offsets = [0, 32], sizes = [2, 32], strides = [1, 1]} : vector<2x128xf32> to vector<2x32xf32>
      %51 = arith.mulf %50, %arg11 : vector<2x32xf32>
      %52 = vector.extract_strided_slice %42 {offsets = [0, 0], sizes = [2, 32], strides = [1, 1]} : vector<2x128xf32> to vector<2x32xf32>
      %53 = vector.extract_strided_slice %32 {offsets = [0, 64], sizes = [2, 32], strides = [1, 1]} : vector<2x128xf32> to vector<2x32xf32>
      %54 = math.tanh %53 : vector<2x32xf32>
      %55 = arith.mulf %52, %54 : vector<2x32xf32>
      %56 = arith.addf %51, %55 : vector<2x32xf32>
      %57 = vector.extract_strided_slice %37 {offsets = [0, 96], sizes = [2, 32], strides = [1, 1]} : vector<2x128xf32> to vector<2x32xf32>
      %58 = math.tanh %49 : vector<2x32xf32>
      %59 = arith.mulf %57, %58 : vector<2x32xf32>
      %60 = vector.extract_strided_slice %42 {offsets = [0, 96], sizes = [2, 32], strides = [1, 1]} : vector<2x128xf32> to vector<2x32xf32>
      %61 = math.tanh %56 : vector<2x32xf32>
      %62 = arith.mulf %60, %61 : vector<2x32xf32>
      %63 = arith.truncf %59 : vector<2x32xf32> to vector<2x32xbf16>
      %64 = arith.index_cast %arg8 : i32 to index
      %c0_24 = arith.constant 0 : index
      %c0_25 = arith.constant 0 : index
      %65 = vector.load %arg5[%64, %c0_24, %c0_25] : memref<8x2x64xbf16, #tpu.memory_space<vmem>>, vector<1x2x32xbf16>
      %66 = vector.shape_cast %65 : vector<1x2x32xbf16> to vector<2x32xbf16>
      %67 = vector.shape_cast %63 : vector<2x32xbf16> to vector<1x2x32xbf16>
      tpu.vector_store %arg5[%64, %c0_24, %c0_25], %67 {strides = array<i32>} : memref<8x2x64xbf16, #tpu.memory_space<vmem>>, vector<1x2x32xbf16>,
      %68 = arith.truncf %62 : vector<2x32xf32> to vector<2x32xbf16>
      %69 = arith.index_cast %18 : i32 to index
      %c0_26 = arith.constant 0 : index
      %c32 = arith.constant 32 : index
      %70 = vector.load %arg5[%69, %c0_26, %c32] : memref<8x2x64xbf16, #tpu.memory_space<vmem>>, vector<1x2x32xbf16>
      %71 = vector.shape_cast %70 : vector<1x2x32xbf16> to vector<2x32xbf16>
      %72 = vector.shape_cast %68 : vector<2x32xbf16> to vector<1x2x32xbf16>
      tpu.vector_store %arg5[%69, %c0_26, %c32], %72 {strides = array<i32>} : memref<8x2x64xbf16, #tpu.memory_space<vmem>>, vector<1x2x32xbf16>,
      %73 = tpu.concatenate %59, %62 in 1 : vector<2x32xf32>, vector<2x32xf32> -> vector<2x64xf32>
      scf.yield %73, %49, %56 : vector<2x64xf32>, vector<2x32xf32>, vector<2x32xf32>
    }
    %c8_i32_16 = arith.constant 8 : i32
    return
  }
  func.func @transform_0(%arg0: i32) -> (i32, i32, i32) {
    %c0_i32 = arith.constant 0 : i32
    %c0_i32_0 = arith.constant 0 : i32
    %c0_i32_1 = arith.constant 0 : i32
    return %c0_i32, %arg0, %c0_i32_0 : i32, i32, i32
  }
  func.func @transform_1(%arg0: i32) -> (i32, i32) {
    %c0_i32 = arith.constant 0 : i32
    %c0_i32_0 = arith.constant 0 : i32
    %c0_i32_1 = arith.constant 0 : i32
    return %c0_i32, %c0_i32_0 : i32, i32
  }
  func.func @transform_2(%arg0: i32) -> (i32, i32) {
    %c0_i32 = arith.constant 0 : i32
    %c0_i32_0 = arith.constant 0 : i32
    %c0_i32_1 = arith.constant 0 : i32
    return %c0_i32, %c0_i32_0 : i32, i32
  }
  func.func @transform_3(%arg0: i32) -> (i32, i32) {
    %c0_i32 = arith.constant 0 : i32
    %c0_i32_0 = arith.constant 0 : i32
    %c0_i32_1 = arith.constant 0 : i32
    return %c0_i32, %c0_i32_0 : i32, i32
  }
  func.func @transform_4(%arg0: i32) -> (i32, i32, i32) {
    %c0_i32 = arith.constant 0 : i32
    %c0_i32_0 = arith.constant 0 : i32
    %c0_i32_1 = arith.constant 0 : i32
    return %c0_i32, %arg0, %c0_i32_0 : i32, i32, i32
  }
}

module attributes {stable_mosaic.version = 11 : i64} {
  func.func @conv_stack_kernel(%arg0: i32, %arg1: memref<1x8x16xf32, #tpu.memory_space<vmem>>, %arg2: memref<48x128xbf16, #tpu.memory_space<vmem>>, %arg3: memref<640x128xbf16, #tpu.memory_space<vmem>>, %arg4: memref<896x128xbf16, #tpu.memory_space<vmem>>, %arg5: memref<384x128xbf16, #tpu.memory_space<vmem>>, %arg6: memref<4x128xf32, #tpu.memory_space<vmem>>, %arg7: memref<1x8x128xbf16, #tpu.memory_space<vmem>>, %arg8: memref<10x16xbf16, #tpu.memory_space<vmem>>, %arg9: memref<14x128xbf16, #tpu.memory_space<vmem>>, %arg10: memref<14x128xbf16, #tpu.memory_space<vmem>>) attributes {dimension_semantics = [#tpu.dimension_semantics<parallel>], iteration_bounds = array<i64: 2>, scalar_prefetch = 0 : i64, scratch_operands = 3 : i64, tpu.core_type = #tpu.core_type<tc>, window_params = [{transform_indices = @transform_0, window_bounds = array<i64: 1, 8, 16>}, {pipeline_mode = #tpu.pipeline_mode<synchronous>, transform_indices = @transform_1, window_bounds = array<i64: 48, 128>}, {pipeline_mode = #tpu.pipeline_mode<synchronous>, transform_indices = @transform_2, window_bounds = array<i64: 640, 128>}, {pipeline_mode = #tpu.pipeline_mode<synchronous>, transform_indices = @transform_3, window_bounds = array<i64: 896, 128>}, {pipeline_mode = #tpu.pipeline_mode<synchronous>, transform_indices = @transform_4, window_bounds = array<i64: 384, 128>}, {pipeline_mode = #tpu.pipeline_mode<synchronous>, transform_indices = @transform_5, window_bounds = array<i64: 4, 128>}, {transform_indices = @transform_6, window_bounds = array<i64: 1, 8, 128>}]} {
    %cst = arith.constant 0.000000e+00 : bf16
    %0 = vector.broadcast %cst : bf16 to vector<1x16xbf16>
    %c0 = arith.constant 0 : index
    %c0_0 = arith.constant 0 : index
    %1 = vector.load %arg8[%c0, %c0_0] : memref<10x16xbf16, #tpu.memory_space<vmem>>, vector<1x16xbf16>
    tpu.vector_store %arg8[%c0, %c0_0], %0 {strides = array<i32>} : memref<10x16xbf16, #tpu.memory_space<vmem>>, vector<1x16xbf16>,
    %c9 = arith.constant 9 : index
    %c0_1 = arith.constant 0 : index
    %2 = vector.load %arg8[%c9, %c0_1] : memref<10x16xbf16, #tpu.memory_space<vmem>>, vector<1x16xbf16>
    tpu.vector_store %arg8[%c9, %c0_1], %0 {strides = array<i32>} : memref<10x16xbf16, #tpu.memory_space<vmem>>, vector<1x16xbf16>,
    %cst_2 = arith.constant 0.000000e+00 : bf16
    %3 = vector.broadcast %cst_2 : bf16 to vector<3x128xbf16>
    %c0_3 = arith.constant 0 : index
    %c0_4 = arith.constant 0 : index
    %4 = vector.load %arg9[%c0_3, %c0_4] : memref<14x128xbf16, #tpu.memory_space<vmem>>, vector<3x128xbf16>
    tpu.vector_store %arg9[%c0_3, %c0_4], %3 {strides = array<i32>} : memref<14x128xbf16, #tpu.memory_space<vmem>>, vector<3x128xbf16>,
    %c11 = arith.constant 11 : index
    %c0_5 = arith.constant 0 : index
    %5 = vector.load %arg9[%c11, %c0_5] : memref<14x128xbf16, #tpu.memory_space<vmem>>, vector<3x128xbf16>
    tpu.vector_store %arg9[%c11, %c0_5], %3 {strides = array<i32>} : memref<14x128xbf16, #tpu.memory_space<vmem>>, vector<3x128xbf16>,
    %c0_6 = arith.constant 0 : index
    %c0_7 = arith.constant 0 : index
    %6 = vector.load %arg10[%c0_6, %c0_7] : memref<14x128xbf16, #tpu.memory_space<vmem>>, vector<3x128xbf16>
    tpu.vector_store %arg10[%c0_6, %c0_7], %3 {strides = array<i32>} : memref<14x128xbf16, #tpu.memory_space<vmem>>, vector<3x128xbf16>,
    %c11_8 = arith.constant 11 : index
    %c0_9 = arith.constant 0 : index
    %7 = vector.load %arg10[%c11_8, %c0_9] : memref<14x128xbf16, #tpu.memory_space<vmem>>, vector<3x128xbf16>
    tpu.vector_store %arg10[%c11_8, %c0_9], %3 {strides = array<i32>} : memref<14x128xbf16, #tpu.memory_space<vmem>>, vector<3x128xbf16>,
    %c0_10 = arith.constant 0 : index
    %c0_11 = arith.constant 0 : index
    %c0_12 = arith.constant 0 : index
    %8 = vector.load %arg1[%c0_10, %c0_11, %c0_12] : memref<1x8x16xf32, #tpu.memory_space<vmem>>, vector<1x8x16xf32>
    %9 = vector.shape_cast %8 : vector<1x8x16xf32> to vector<8x16xf32>
    %10 = arith.truncf %9 : vector<8x16xf32> to vector<8x16xbf16>
    %c1 = arith.constant 1 : index
    %c0_13 = arith.constant 0 : index
    %11 = vector.load %arg8[%c1, %c0_13] : memref<10x16xbf16, #tpu.memory_space<vmem>>, vector<8x16xbf16>
    tpu.vector_store %arg8[%c1, %c0_13], %10 {strides = array<i32>} : memref<10x16xbf16, #tpu.memory_space<vmem>>, vector<8x16xbf16>,
    %c0_14 = arith.constant 0 : index
    %c0_15 = arith.constant 0 : index
    %12 = vector.load %arg6[%c0_14, %c0_15] : memref<4x128xf32, #tpu.memory_space<vmem>>, vector<1x128xf32>
    %cst_16 = arith.constant 0.000000e+00 : f32
    %13 = vector.broadcast %cst_16 : f32 to vector<8x128xf32>
    %c0_17 = arith.constant 0 : index
    %c0_18 = arith.constant 0 : index
    %14 = vector.load %arg8[%c0_17, %c0_18] : memref<10x16xbf16, #tpu.memory_space<vmem>>, vector<8x16xbf16>
    %c0_19 = arith.constant 0 : index
    %c0_20 = arith.constant 0 : index
    %15 = vector.load %arg2[%c0_19, %c0_20] : memref<48x128xbf16, #tpu.memory_space<vmem>>, vector<16x128xbf16>
    %cst_21 = arith.constant dense<0.000000e+00> : vector<8x128xf32>
    %16 = tpu.matmul %14, %15, %cst_21 {dimension_numbers = #tpu.dot_dimension_numbers<[1], [0], [0], [1], [0, 0, 1, 1], [], []>} : vector<8x16xbf16>, vector<16x128xbf16>, vector<8x128xf32> -> vector<8x128xf32>
    %17 = arith.addf %13, %16 : vector<8x128xf32>
    %c1_22 = arith.constant 1 : index
    %c0_23 = arith.constant 0 : index
    %18 = vector.load %arg8[%c1_22, %c0_23] : memref<10x16xbf16, #tpu.memory_space<vmem>>, vector<8x16xbf16>
    %c16 = arith.constant 16 : index
    %c0_24 = arith.constant 0 : index
    %19 = vector.load %arg2[%c16, %c0_24] : memref<48x128xbf16, #tpu.memory_space<vmem>>, vector<16x128xbf16>
    %cst_25 = arith.constant dense<0.000000e+00> : vector<8x128xf32>
    %20 = tpu.matmul %18, %19, %cst_25 {dimension_numbers = #tpu.dot_dimension_numbers<[1], [0], [0], [1], [0, 0, 1, 1], [], []>} : vector<8x16xbf16>, vector<16x128xbf16>, vector<8x128xf32> -> vector<8x128xf32>
    %21 = arith.addf %17, %20 : vector<8x128xf32>
    %c2 = arith.constant 2 : index
    %c0_26 = arith.constant 0 : index
    %22 = vector.load %arg8[%c2, %c0_26] : memref<10x16xbf16, #tpu.memory_space<vmem>>, vector<8x16xbf16>
    %c32 = arith.constant 32 : index
    %c0_27 = arith.constant 0 : index
    %23 = vector.load %arg2[%c32, %c0_27] : memref<48x128xbf16, #tpu.memory_space<vmem>>, vector<16x128xbf16>
    %cst_28 = arith.constant dense<0.000000e+00> : vector<8x128xf32>
    %24 = tpu.matmul %22, %23, %cst_28 {dimension_numbers = #tpu.dot_dimension_numbers<[1], [0], [0], [1], [0, 0, 1, 1], [], []>} : vector<8x16xbf16>, vector<16x128xbf16>, vector<8x128xf32> -> vector<8x128xf32>
    %25 = arith.addf %21, %24 : vector<8x128xf32>
    %26 = vector.broadcast %12 : vector<1x128xf32> to vector<8x128xf32>
    %27 = arith.addf %25, %26 : vector<8x128xf32>
    %cst_29 = arith.constant 0.000000e+00 : f32
    %28 = vector.broadcast %cst_29 : f32 to vector<8x128xf32>
    %29 = arith.maximumf %27, %28 : vector<8x128xf32>
    %30 = arith.truncf %29 : vector<8x128xf32> to vector<8x128xbf16>
    %c3 = arith.constant 3 : index
    %c0_30 = arith.constant 0 : index
    %31 = vector.load %arg9[%c3, %c0_30] : memref<14x128xbf16, #tpu.memory_space<vmem>>, vector<8x128xbf16>
    tpu.vector_store %arg9[%c3, %c0_30], %30 {strides = array<i32>} : memref<14x128xbf16, #tpu.memory_space<vmem>>, vector<8x128xbf16>,
    %c1_31 = arith.constant 1 : index
    %c0_32 = arith.constant 0 : index
    %32 = vector.load %arg6[%c1_31, %c0_32] : memref<4x128xf32, #tpu.memory_space<vmem>>, vector<1x128xf32>
    %cst_33 = arith.constant 0.000000e+00 : f32
    %33 = vector.broadcast %cst_33 : f32 to vector<8x128xf32>
    %c1_34 = arith.constant 1 : index
    %c0_35 = arith.constant 0 : index
    %34 = vector.load %arg9[%c1_34, %c0_35] : memref<14x128xbf16, #tpu.memory_space<vmem>>, vector<8x128xbf16>
    %c0_36 = arith.constant 0 : index
    %c0_37 = arith.constant 0 : index
    %35 = vector.load %arg3[%c0_36, %c0_37] : memref<640x128xbf16, #tpu.memory_space<vmem>>, vector<128x128xbf16>
    %cst_38 = arith.constant dense<0.000000e+00> : vector<8x128xf32>
    %36 = tpu.matmul %34, %35, %cst_38 {dimension_numbers = #tpu.dot_dimension_numbers<[1], [0], [0], [1], [0, 0, 1, 1], [], []>} : vector<8x128xbf16>, vector<128x128xbf16>, vector<8x128xf32> -> vector<8x128xf32>
    %37 = arith.addf %33, %36 : vector<8x128xf32>
    %c2_39 = arith.constant 2 : index
    %c0_40 = arith.constant 0 : index
    %38 = vector.load %arg9[%c2_39, %c0_40] : memref<14x128xbf16, #tpu.memory_space<vmem>>, vector<8x128xbf16>
    %c128 = arith.constant 128 : index
    %c0_41 = arith.constant 0 : index
    %39 = vector.load %arg3[%c128, %c0_41] : memref<640x128xbf16, #tpu.memory_space<vmem>>, vector<128x128xbf16>
    %cst_42 = arith.constant dense<0.000000e+00> : vector<8x128xf32>
    %40 = tpu.matmul %38, %39, %cst_42 {dimension_numbers = #tpu.dot_dimension_numbers<[1], [0], [0], [1], [0, 0, 1, 1], [], []>} : vector<8x128xbf16>, vector<128x128xbf16>, vector<8x128xf32> -> vector<8x128xf32>
    %41 = arith.addf %37, %40 : vector<8x128xf32>
    %c3_43 = arith.constant 3 : index
    %c0_44 = arith.constant 0 : index
    %42 = vector.load %arg9[%c3_43, %c0_44] : memref<14x128xbf16, #tpu.memory_space<vmem>>, vector<8x128xbf16>
    %c256 = arith.constant 256 : index
    %c0_45 = arith.constant 0 : index
    %43 = vector.load %arg3[%c256, %c0_45] : memref<640x128xbf16, #tpu.memory_space<vmem>>, vector<128x128xbf16>
    %cst_46 = arith.constant dense<0.000000e+00> : vector<8x128xf32>
    %44 = tpu.matmul %42, %43, %cst_46 {dimension_numbers = #tpu.dot_dimension_numbers<[1], [0], [0], [1], [0, 0, 1, 1], [], []>} : vector<8x128xbf16>, vector<128x128xbf16>, vector<8x128xf32> -> vector<8x128xf32>
    %45 = arith.addf %41, %44 : vector<8x128xf32>
    %c4 = arith.constant 4 : index
    %c0_47 = arith.constant 0 : index
    %46 = vector.load %arg9[%c4, %c0_47] : memref<14x128xbf16, #tpu.memory_space<vmem>>, vector<8x128xbf16>
    %c384 = arith.constant 384 : index
    %c0_48 = arith.constant 0 : index
    %47 = vector.load %arg3[%c384, %c0_48] : memref<640x128xbf16, #tpu.memory_space<vmem>>, vector<128x128xbf16>
    %cst_49 = arith.constant dense<0.000000e+00> : vector<8x128xf32>
    %48 = tpu.matmul %46, %47, %cst_49 {dimension_numbers = #tpu.dot_dimension_numbers<[1], [0], [0], [1], [0, 0, 1, 1], [], []>} : vector<8x128xbf16>, vector<128x128xbf16>, vector<8x128xf32> -> vector<8x128xf32>
    %49 = arith.addf %45, %48 : vector<8x128xf32>
    %c5 = arith.constant 5 : index
    %c0_50 = arith.constant 0 : index
    %50 = vector.load %arg9[%c5, %c0_50] : memref<14x128xbf16, #tpu.memory_space<vmem>>, vector<8x128xbf16>
    %c512 = arith.constant 512 : index
    %c0_51 = arith.constant 0 : index
    %51 = vector.load %arg3[%c512, %c0_51] : memref<640x128xbf16, #tpu.memory_space<vmem>>, vector<128x128xbf16>
    %cst_52 = arith.constant dense<0.000000e+00> : vector<8x128xf32>
    %52 = tpu.matmul %50, %51, %cst_52 {dimension_numbers = #tpu.dot_dimension_numbers<[1], [0], [0], [1], [0, 0, 1, 1], [], []>} : vector<8x128xbf16>, vector<128x128xbf16>, vector<8x128xf32> -> vector<8x128xf32>
    %53 = arith.addf %49, %52 : vector<8x128xf32>
    %54 = vector.broadcast %32 : vector<1x128xf32> to vector<8x128xf32>
    %55 = arith.addf %53, %54 : vector<8x128xf32>
    %cst_53 = arith.constant 0.000000e+00 : f32
    %56 = vector.broadcast %cst_53 : f32 to vector<8x128xf32>
    %57 = arith.maximumf %55, %56 : vector<8x128xf32>
    %58 = arith.truncf %57 : vector<8x128xf32> to vector<8x128xbf16>
    %c3_54 = arith.constant 3 : index
    %c0_55 = arith.constant 0 : index
    %59 = vector.load %arg10[%c3_54, %c0_55] : memref<14x128xbf16, #tpu.memory_space<vmem>>, vector<8x128xbf16>
    tpu.vector_store %arg10[%c3_54, %c0_55], %58 {strides = array<i32>} : memref<14x128xbf16, #tpu.memory_space<vmem>>, vector<8x128xbf16>,
    %c2_56 = arith.constant 2 : index
    %c0_57 = arith.constant 0 : index
    %60 = vector.load %arg6[%c2_56, %c0_57] : memref<4x128xf32, #tpu.memory_space<vmem>>, vector<1x128xf32>
    %cst_58 = arith.constant 0.000000e+00 : f32
    %61 = vector.broadcast %cst_58 : f32 to vector<8x128xf32>
    %c0_59 = arith.constant 0 : index
    %c0_60 = arith.constant 0 : index
    %62 = vector.load %arg10[%c0_59, %c0_60] : memref<14x128xbf16, #tpu.memory_space<vmem>>, vector<8x128xbf16>
    %c0_61 = arith.constant 0 : index
    %c0_62 = arith.constant 0 : index
    %63 = vector.load %arg4[%c0_61, %c0_62] : memref<896x128xbf16, #tpu.memory_space<vmem>>, vector<128x128xbf16>
    %cst_63 = arith.constant dense<0.000000e+00> : vector<8x128xf32>
    %64 = tpu.matmul %62, %63, %cst_63 {dimension_numbers = #tpu.dot_dimension_numbers<[1], [0], [0], [1], [0, 0, 1, 1], [], []>} : vector<8x128xbf16>, vector<128x128xbf16>, vector<8x128xf32> -> vector<8x128xf32>
    %65 = arith.addf %61, %64 : vector<8x128xf32>
    %c1_64 = arith.constant 1 : index
    %c0_65 = arith.constant 0 : index
    %66 = vector.load %arg10[%c1_64, %c0_65] : memref<14x128xbf16, #tpu.memory_space<vmem>>, vector<8x128xbf16>
    %c128_66 = arith.constant 128 : index
    %c0_67 = arith.constant 0 : index
    %67 = vector.load %arg4[%c128_66, %c0_67] : memref<896x128xbf16, #tpu.memory_space<vmem>>, vector<128x128xbf16>
    %cst_68 = arith.constant dense<0.000000e+00> : vector<8x128xf32>
    %68 = tpu.matmul %66, %67, %cst_68 {dimension_numbers = #tpu.dot_dimension_numbers<[1], [0], [0], [1], [0, 0, 1, 1], [], []>} : vector<8x128xbf16>, vector<128x128xbf16>, vector<8x128xf32> -> vector<8x128xf32>
    %69 = arith.addf %65, %68 : vector<8x128xf32>
    %c2_69 = arith.constant 2 : index
    %c0_70 = arith.constant 0 : index
    %70 = vector.load %arg10[%c2_69, %c0_70] : memref<14x128xbf16, #tpu.memory_space<vmem>>, vector<8x128xbf16>
    %c256_71 = arith.constant 256 : index
    %c0_72 = arith.constant 0 : index
    %71 = vector.load %arg4[%c256_71, %c0_72] : memref<896x128xbf16, #tpu.memory_space<vmem>>, vector<128x128xbf16>
    %cst_73 = arith.constant dense<0.000000e+00> : vector<8x128xf32>
    %72 = tpu.matmul %70, %71, %cst_73 {dimension_numbers = #tpu.dot_dimension_numbers<[1], [0], [0], [1], [0, 0, 1, 1], [], []>} : vector<8x128xbf16>, vector<128x128xbf16>, vector<8x128xf32> -> vector<8x128xf32>
    %73 = arith.addf %69, %72 : vector<8x128xf32>
    %c3_74 = arith.constant 3 : index
    %c0_75 = arith.constant 0 : index
    %74 = vector.load %arg10[%c3_74, %c0_75] : memref<14x128xbf16, #tpu.memory_space<vmem>>, vector<8x128xbf16>
    %c384_76 = arith.constant 384 : index
    %c0_77 = arith.constant 0 : index
    %75 = vector.load %arg4[%c384_76, %c0_77] : memref<896x128xbf16, #tpu.memory_space<vmem>>, vector<128x128xbf16>
    %cst_78 = arith.constant dense<0.000000e+00> : vector<8x128xf32>
    %76 = tpu.matmul %74, %75, %cst_78 {dimension_numbers = #tpu.dot_dimension_numbers<[1], [0], [0], [1], [0, 0, 1, 1], [], []>} : vector<8x128xbf16>, vector<128x128xbf16>, vector<8x128xf32> -> vector<8x128xf32>
    %77 = arith.addf %73, %76 : vector<8x128xf32>
    %c4_79 = arith.constant 4 : index
    %c0_80 = arith.constant 0 : index
    %78 = vector.load %arg10[%c4_79, %c0_80] : memref<14x128xbf16, #tpu.memory_space<vmem>>, vector<8x128xbf16>
    %c512_81 = arith.constant 512 : index
    %c0_82 = arith.constant 0 : index
    %79 = vector.load %arg4[%c512_81, %c0_82] : memref<896x128xbf16, #tpu.memory_space<vmem>>, vector<128x128xbf16>
    %cst_83 = arith.constant dense<0.000000e+00> : vector<8x128xf32>
    %80 = tpu.matmul %78, %79, %cst_83 {dimension_numbers = #tpu.dot_dimension_numbers<[1], [0], [0], [1], [0, 0, 1, 1], [], []>} : vector<8x128xbf16>, vector<128x128xbf16>, vector<8x128xf32> -> vector<8x128xf32>
    %81 = arith.addf %77, %80 : vector<8x128xf32>
    %c5_84 = arith.constant 5 : index
    %c0_85 = arith.constant 0 : index
    %82 = vector.load %arg10[%c5_84, %c0_85] : memref<14x128xbf16, #tpu.memory_space<vmem>>, vector<8x128xbf16>
    %c640 = arith.constant 640 : index
    %c0_86 = arith.constant 0 : index
    %83 = vector.load %arg4[%c640, %c0_86] : memref<896x128xbf16, #tpu.memory_space<vmem>>, vector<128x128xbf16>
    %cst_87 = arith.constant dense<0.000000e+00> : vector<8x128xf32>
    %84 = tpu.matmul %82, %83, %cst_87 {dimension_numbers = #tpu.dot_dimension_numbers<[1], [0], [0], [1], [0, 0, 1, 1], [], []>} : vector<8x128xbf16>, vector<128x128xbf16>, vector<8x128xf32> -> vector<8x128xf32>
    %85 = arith.addf %81, %84 : vector<8x128xf32>
    %c6 = arith.constant 6 : index
    %c0_88 = arith.constant 0 : index
    %86 = vector.load %arg10[%c6, %c0_88] : memref<14x128xbf16, #tpu.memory_space<vmem>>, vector<8x128xbf16>
    %c768 = arith.constant 768 : index
    %c0_89 = arith.constant 0 : index
    %87 = vector.load %arg4[%c768, %c0_89] : memref<896x128xbf16, #tpu.memory_space<vmem>>, vector<128x128xbf16>
    %cst_90 = arith.constant dense<0.000000e+00> : vector<8x128xf32>
    %88 = tpu.matmul %86, %87, %cst_90 {dimension_numbers = #tpu.dot_dimension_numbers<[1], [0], [0], [1], [0, 0, 1, 1], [], []>} : vector<8x128xbf16>, vector<128x128xbf16>, vector<8x128xf32> -> vector<8x128xf32>
    %89 = arith.addf %85, %88 : vector<8x128xf32>
    %90 = vector.broadcast %60 : vector<1x128xf32> to vector<8x128xf32>
    %91 = arith.addf %89, %90 : vector<8x128xf32>
    %cst_91 = arith.constant 0.000000e+00 : f32
    %92 = vector.broadcast %cst_91 : f32 to vector<8x128xf32>
    %93 = arith.maximumf %91, %92 : vector<8x128xf32>
    %94 = arith.truncf %93 : vector<8x128xf32> to vector<8x128xbf16>
    %c3_92 = arith.constant 3 : index
    %c0_93 = arith.constant 0 : index
    %95 = vector.load %arg9[%c3_92, %c0_93] : memref<14x128xbf16, #tpu.memory_space<vmem>>, vector<8x128xbf16>
    tpu.vector_store %arg9[%c3_92, %c0_93], %94 {strides = array<i32>} : memref<14x128xbf16, #tpu.memory_space<vmem>>, vector<8x128xbf16>,
    %c3_94 = arith.constant 3 : index
    %c0_95 = arith.constant 0 : index
    %96 = vector.load %arg6[%c3_94, %c0_95] : memref<4x128xf32, #tpu.memory_space<vmem>>, vector<1x128xf32>
    %cst_96 = arith.constant 0.000000e+00 : f32
    %97 = vector.broadcast %cst_96 : f32 to vector<8x128xf32>
    %c2_97 = arith.constant 2 : index
    %c0_98 = arith.constant 0 : index
    %98 = vector.load %arg9[%c2_97, %c0_98] : memref<14x128xbf16, #tpu.memory_space<vmem>>, vector<8x128xbf16>
    %c0_99 = arith.constant 0 : index
    %c0_100 = arith.constant 0 : index
    %99 = vector.load %arg5[%c0_99, %c0_100] : memref<384x128xbf16, #tpu.memory_space<vmem>>, vector<128x128xbf16>
    %cst_101 = arith.constant dense<0.000000e+00> : vector<8x128xf32>
    %100 = tpu.matmul %98, %99, %cst_101 {dimension_numbers = #tpu.dot_dimension_numbers<[1], [0], [0], [1], [0, 0, 1, 1], [], []>} : vector<8x128xbf16>, vector<128x128xbf16>, vector<8x128xf32> -> vector<8x128xf32>
    %101 = arith.addf %97, %100 : vector<8x128xf32>
    %c3_102 = arith.constant 3 : index
    %c0_103 = arith.constant 0 : index
    %102 = vector.load %arg9[%c3_102, %c0_103] : memref<14x128xbf16, #tpu.memory_space<vmem>>, vector<8x128xbf16>
    %c128_104 = arith.constant 128 : index
    %c0_105 = arith.constant 0 : index
    %103 = vector.load %arg5[%c128_104, %c0_105] : memref<384x128xbf16, #tpu.memory_space<vmem>>, vector<128x128xbf16>
    %cst_106 = arith.constant dense<0.000000e+00> : vector<8x128xf32>
    %104 = tpu.matmul %102, %103, %cst_106 {dimension_numbers = #tpu.dot_dimension_numbers<[1], [0], [0], [1], [0, 0, 1, 1], [], []>} : vector<8x128xbf16>, vector<128x128xbf16>, vector<8x128xf32> -> vector<8x128xf32>
    %105 = arith.addf %101, %104 : vector<8x128xf32>
    %c4_107 = arith.constant 4 : index
    %c0_108 = arith.constant 0 : index
    %106 = vector.load %arg9[%c4_107, %c0_108] : memref<14x128xbf16, #tpu.memory_space<vmem>>, vector<8x128xbf16>
    %c256_109 = arith.constant 256 : index
    %c0_110 = arith.constant 0 : index
    %107 = vector.load %arg5[%c256_109, %c0_110] : memref<384x128xbf16, #tpu.memory_space<vmem>>, vector<128x128xbf16>
    %cst_111 = arith.constant dense<0.000000e+00> : vector<8x128xf32>
    %108 = tpu.matmul %106, %107, %cst_111 {dimension_numbers = #tpu.dot_dimension_numbers<[1], [0], [0], [1], [0, 0, 1, 1], [], []>} : vector<8x128xbf16>, vector<128x128xbf16>, vector<8x128xf32> -> vector<8x128xf32>
    %109 = arith.addf %105, %108 : vector<8x128xf32>
    %110 = vector.broadcast %96 : vector<1x128xf32> to vector<8x128xf32>
    %111 = arith.addf %109, %110 : vector<8x128xf32>
    %cst_112 = arith.constant 0.000000e+00 : f32
    %112 = vector.broadcast %cst_112 : f32 to vector<8x128xf32>
    %113 = arith.maximumf %111, %112 : vector<8x128xf32>
    %114 = arith.truncf %113 : vector<8x128xf32> to vector<8x128xbf16>
    %c0_113 = arith.constant 0 : index
    %c0_114 = arith.constant 0 : index
    %c0_115 = arith.constant 0 : index
    %115 = vector.load %arg7[%c0_113, %c0_114, %c0_115] : memref<1x8x128xbf16, #tpu.memory_space<vmem>>, vector<1x8x128xbf16>
    %116 = vector.shape_cast %115 : vector<1x8x128xbf16> to vector<8x128xbf16>
    %117 = vector.shape_cast %114 : vector<8x128xbf16> to vector<1x8x128xbf16>
    tpu.vector_store %arg7[%c0_113, %c0_114, %c0_115], %117 {strides = array<i32>} : memref<1x8x128xbf16, #tpu.memory_space<vmem>>, vector<1x8x128xbf16>,
    return
  }
  func.func @transform_0(%arg0: i32) -> (i32, i32, i32) {
    %c0_i32 = arith.constant 0 : i32
    %c0_i32_0 = arith.constant 0 : i32
    %c0_i32_1 = arith.constant 0 : i32
    return %arg0, %c0_i32, %c0_i32_0 : i32, i32, i32
  }
  func.func @transform_1(%arg0: i32) -> (i32, i32) {
    %c0_i32 = arith.constant 0 : i32
    %c0_i32_0 = arith.constant 0 : i32
    %c0_i32_1 = arith.constant 0 : i32
    return %c0_i32, %c0_i32_0 : i32, i32
  }
  func.func @transform_2(%arg0: i32) -> (i32, i32) {
    %c0_i32 = arith.constant 0 : i32
    %c0_i32_0 = arith.constant 0 : i32
    %c0_i32_1 = arith.constant 0 : i32
    return %c0_i32, %c0_i32_0 : i32, i32
  }
  func.func @transform_3(%arg0: i32) -> (i32, i32) {
    %c0_i32 = arith.constant 0 : i32
    %c0_i32_0 = arith.constant 0 : i32
    %c0_i32_1 = arith.constant 0 : i32
    return %c0_i32, %c0_i32_0 : i32, i32
  }
  func.func @transform_4(%arg0: i32) -> (i32, i32) {
    %c0_i32 = arith.constant 0 : i32
    %c0_i32_0 = arith.constant 0 : i32
    %c0_i32_1 = arith.constant 0 : i32
    return %c0_i32, %c0_i32_0 : i32, i32
  }
  func.func @transform_5(%arg0: i32) -> (i32, i32) {
    %c0_i32 = arith.constant 0 : i32
    %c0_i32_0 = arith.constant 0 : i32
    %c0_i32_1 = arith.constant 0 : i32
    return %c0_i32, %c0_i32_0 : i32, i32
  }
  func.func @transform_6(%arg0: i32) -> (i32, i32, i32) {
    %c0_i32 = arith.constant 0 : i32
    %c0_i32_0 = arith.constant 0 : i32
    %c0_i32_1 = arith.constant 0 : i32
    return %arg0, %c0_i32, %c0_i32_0 : i32, i32, i32
  }
}

module attributes {stable_mosaic.version = 11 : i64} {
  func.func @proj_ln_kernel(%arg0: i32, %arg1: memref<8x2x64xbf16, #tpu.memory_space<vmem>>, %arg2: memref<64x64xbf16, #tpu.memory_space<vmem>>, %arg3: memref<1x64xf32, #tpu.memory_space<vmem>>, %arg4: memref<1x64xf32, #tpu.memory_space<vmem>>, %arg5: memref<1x64xf32, #tpu.memory_space<vmem>>, %arg6: memref<2x8x64xf32, #tpu.memory_space<vmem>>) attributes {dimension_semantics = [#tpu.dimension_semantics<parallel>], iteration_bounds = array<i64: 1>, scalar_prefetch = 0 : i64, scratch_operands = 0 : i64, tpu.core_type = #tpu.core_type<tc>, window_params = [{transform_indices = @transform_0, window_bounds = array<i64: 8, 2, 64>}, {pipeline_mode = #tpu.pipeline_mode<synchronous>, transform_indices = @transform_1, window_bounds = array<i64: 64, 64>}, {pipeline_mode = #tpu.pipeline_mode<synchronous>, transform_indices = @transform_2, window_bounds = array<i64: 1, 64>}, {pipeline_mode = #tpu.pipeline_mode<synchronous>, transform_indices = @transform_3, window_bounds = array<i64: 1, 64>}, {pipeline_mode = #tpu.pipeline_mode<synchronous>, transform_indices = @transform_4, window_bounds = array<i64: 1, 64>}, {transform_indices = @transform_5, window_bounds = array<i64: 2, 8, 64>}]} {
    %c0 = arith.constant 0 : index
    %c0_0 = arith.constant 0 : index
    %0 = vector.load %arg2[%c0, %c0_0] : memref<64x64xbf16, #tpu.memory_space<vmem>>, vector<64x64xbf16>
    %c0_1 = arith.constant 0 : index
    %c0_2 = arith.constant 0 : index
    %1 = vector.load %arg3[%c0_1, %c0_2] : memref<1x64xf32, #tpu.memory_space<vmem>>, vector<1x64xf32>
    %c0_3 = arith.constant 0 : index
    %c0_4 = arith.constant 0 : index
    %2 = vector.load %arg4[%c0_3, %c0_4] : memref<1x64xf32, #tpu.memory_space<vmem>>, vector<1x64xf32>
    %c0_5 = arith.constant 0 : index
    %c0_6 = arith.constant 0 : index
    %3 = vector.load %arg5[%c0_5, %c0_6] : memref<1x64xf32, #tpu.memory_space<vmem>>, vector<1x64xf32>
    %c0_7 = arith.constant 0 : index
    %c0_8 = arith.constant 0 : index
    %c0_9 = arith.constant 0 : index
    %4 = vector.load %arg1[%c0_7, %c0_8, %c0_9] : memref<8x2x64xbf16, #tpu.memory_space<vmem>>, vector<8x1x64xbf16>
    %5 = vector.shape_cast %4 : vector<8x1x64xbf16> to vector<8x64xbf16>
    %cst = arith.constant dense<0.000000e+00> : vector<8x64xf32>
    %6 = tpu.matmul %5, %0, %cst {dimension_numbers = #tpu.dot_dimension_numbers<[1], [0], [0], [1], [0, 0, 1, 1], [], []>} : vector<8x64xbf16>, vector<64x64xbf16>, vector<8x64xf32> -> vector<8x64xf32>
    %7 = vector.broadcast %1 : vector<1x64xf32> to vector<8x64xf32>
    %8 = arith.addf %6, %7 : vector<8x64xf32>
    %cst_10 = arith.constant dense<0.000000e+00> : vector<8xf32>
    %9 = vector.multi_reduction <add>, %8, %cst_10 [1] : vector<8x64xf32> to vector<8xf32>
    %10 = vector.shape_cast %9 : vector<8xf32> to vector<8x1xf32>
    %cst_11 = arith.constant 6.400000e+01 : f32
    %11 = vector.broadcast %cst_11 : f32 to vector<8x1xf32>
    %12 = arith.divf %10, %11 : vector<8x1xf32>
    %13 = vector.broadcast %12 : vector<8x1xf32> to vector<8x64xf32>
    %14 = arith.subf %8, %13 : vector<8x64xf32>
    %15 = arith.mulf %14, %14 : vector<8x64xf32>
    %cst_12 = arith.constant dense<0.000000e+00> : vector<8xf32>
    %16 = vector.multi_reduction <add>, %15, %cst_12 [1] : vector<8x64xf32> to vector<8xf32>
    %17 = vector.shape_cast %16 : vector<8xf32> to vector<8x1xf32>
    %cst_13 = arith.constant 6.400000e+01 : f32
    %18 = vector.broadcast %cst_13 : f32 to vector<8x1xf32>
    %19 = arith.divf %17, %18 : vector<8x1xf32>
    %20 = vector.broadcast %12 : vector<8x1xf32> to vector<8x64xf32>
    %21 = arith.subf %8, %20 : vector<8x64xf32>
    %cst_14 = arith.constant 9.99999974E-6 : f32
    %22 = vector.broadcast %cst_14 : f32 to vector<8x1xf32>
    %23 = arith.addf %19, %22 : vector<8x1xf32>
    %24 = math.rsqrt %23 : vector<8x1xf32>
    %25 = vector.broadcast %24 : vector<8x1xf32> to vector<8x64xf32>
    %26 = arith.mulf %21, %25 : vector<8x64xf32>
    %27 = vector.broadcast %2 : vector<1x64xf32> to vector<8x64xf32>
    %28 = arith.mulf %26, %27 : vector<8x64xf32>
    %29 = vector.broadcast %3 : vector<1x64xf32> to vector<8x64xf32>
    %30 = arith.addf %28, %29 : vector<8x64xf32>
    %c0_15 = arith.constant 0 : index
    %c0_16 = arith.constant 0 : index
    %c0_17 = arith.constant 0 : index
    %31 = vector.load %arg6[%c0_15, %c0_16, %c0_17] : memref<2x8x64xf32, #tpu.memory_space<vmem>>, vector<1x8x64xf32>
    %32 = vector.shape_cast %31 : vector<1x8x64xf32> to vector<8x64xf32>
    %33 = vector.shape_cast %30 : vector<8x64xf32> to vector<1x8x64xf32>
    tpu.vector_store %arg6[%c0_15, %c0_16, %c0_17], %33 {strides = array<i32>} : memref<2x8x64xf32, #tpu.memory_space<vmem>>, vector<1x8x64xf32>,
    %c0_18 = arith.constant 0 : index
    %c1 = arith.constant 1 : index
    %c0_19 = arith.constant 0 : index
    %34 = vector.load %arg1[%c0_18, %c1, %c0_19] : memref<8x2x64xbf16, #tpu.memory_space<vmem>>, vector<8x1x64xbf16>
    %35 = vector.shape_cast %34 : vector<8x1x64xbf16> to vector<8x64xbf16>
    %cst_20 = arith.constant dense<0.000000e+00> : vector<8x64xf32>
    %36 = tpu.matmul %35, %0, %cst_20 {dimension_numbers = #tpu.dot_dimension_numbers<[1], [0], [0], [1], [0, 0, 1, 1], [], []>} : vector<8x64xbf16>, vector<64x64xbf16>, vector<8x64xf32> -> vector<8x64xf32>
    %37 = vector.broadcast %1 : vector<1x64xf32> to vector<8x64xf32>
    %38 = arith.addf %36, %37 : vector<8x64xf32>
    %cst_21 = arith.constant dense<0.000000e+00> : vector<8xf32>
    %39 = vector.multi_reduction <add>, %38, %cst_21 [1] : vector<8x64xf32> to vector<8xf32>
    %40 = vector.shape_cast %39 : vector<8xf32> to vector<8x1xf32>
    %cst_22 = arith.constant 6.400000e+01 : f32
    %41 = vector.broadcast %cst_22 : f32 to vector<8x1xf32>
    %42 = arith.divf %40, %41 : vector<8x1xf32>
    %43 = vector.broadcast %42 : vector<8x1xf32> to vector<8x64xf32>
    %44 = arith.subf %38, %43 : vector<8x64xf32>
    %45 = arith.mulf %44, %44 : vector<8x64xf32>
    %cst_23 = arith.constant dense<0.000000e+00> : vector<8xf32>
    %46 = vector.multi_reduction <add>, %45, %cst_23 [1] : vector<8x64xf32> to vector<8xf32>
    %47 = vector.shape_cast %46 : vector<8xf32> to vector<8x1xf32>
    %cst_24 = arith.constant 6.400000e+01 : f32
    %48 = vector.broadcast %cst_24 : f32 to vector<8x1xf32>
    %49 = arith.divf %47, %48 : vector<8x1xf32>
    %50 = vector.broadcast %42 : vector<8x1xf32> to vector<8x64xf32>
    %51 = arith.subf %38, %50 : vector<8x64xf32>
    %cst_25 = arith.constant 9.99999974E-6 : f32
    %52 = vector.broadcast %cst_25 : f32 to vector<8x1xf32>
    %53 = arith.addf %49, %52 : vector<8x1xf32>
    %54 = math.rsqrt %53 : vector<8x1xf32>
    %55 = vector.broadcast %54 : vector<8x1xf32> to vector<8x64xf32>
    %56 = arith.mulf %51, %55 : vector<8x64xf32>
    %57 = vector.broadcast %2 : vector<1x64xf32> to vector<8x64xf32>
    %58 = arith.mulf %56, %57 : vector<8x64xf32>
    %59 = vector.broadcast %3 : vector<1x64xf32> to vector<8x64xf32>
    %60 = arith.addf %58, %59 : vector<8x64xf32>
    %c1_26 = arith.constant 1 : index
    %c0_27 = arith.constant 0 : index
    %c0_28 = arith.constant 0 : index
    %61 = vector.load %arg6[%c1_26, %c0_27, %c0_28] : memref<2x8x64xf32, #tpu.memory_space<vmem>>, vector<1x8x64xf32>
    %62 = vector.shape_cast %61 : vector<1x8x64xf32> to vector<8x64xf32>
    %63 = vector.shape_cast %60 : vector<8x64xf32> to vector<1x8x64xf32>
    tpu.vector_store %arg6[%c1_26, %c0_27, %c0_28], %63 {strides = array<i32>} : memref<2x8x64xf32, #tpu.memory_space<vmem>>, vector<1x8x64xf32>,
    return
  }
  func.func @transform_0(%arg0: i32) -> (i32, i32, i32) {
    %c0_i32 = arith.constant 0 : i32
    %c0_i32_0 = arith.constant 0 : i32
    %c0_i32_1 = arith.constant 0 : i32
    return %arg0, %c0_i32, %c0_i32_0 : i32, i32, i32
  }
  func.func @transform_1(%arg0: i32) -> (i32, i32) {
    %c0_i32 = arith.constant 0 : i32
    %c0_i32_0 = arith.constant 0 : i32
    %c0_i32_1 = arith.constant 0 : i32
    return %c0_i32, %c0_i32_0 : i32, i32
  }
  func.func @transform_2(%arg0: i32) -> (i32, i32) {
    %c0_i32 = arith.constant 0 : i32
    %c0_i32_0 = arith.constant 0 : i32
    %c0_i32_1 = arith.constant 0 : i32
    return %c0_i32, %c0_i32_0 : i32, i32
  }
  func.func @transform_3(%arg0: i32) -> (i32, i32) {
    %c0_i32 = arith.constant 0 : i32
    %c0_i32_0 = arith.constant 0 : i32
    %c0_i32_1 = arith.constant 0 : i32
    return %c0_i32, %c0_i32_0 : i32, i32
  }
  func.func @transform_4(%arg0: i32) -> (i32, i32) {
    %c0_i32 = arith.constant 0 : i32
    %c0_i32_0 = arith.constant 0 : i32
    %c0_i32_1 = arith.constant 0 : i32
    return %c0_i32, %c0_i32_0 : i32, i32
  }
  func.func @transform_5(%arg0: i32) -> (i32, i32, i32) {
    %c0_i32 = arith.constant 0 : i32
    %c0_i32_0 = arith.constant 0 : i32
    %c0_i32_1 = arith.constant 0 : i32
    return %c0_i32, %arg0, %c0_i32_0 : i32, i32, i32
  }
}

</mosaic_0001>

<bundles_post_ra>
// kernel: cnn_encoder_forward.5
= control target key start
LH: loop header
LB: loop body
LE: loop exit
PB: predicated region body
PF: predicated region fallthrough
CT: control target
= control target key end

     0   :  { %v722_v1 = vmov 0   ;;  %v44_v6 = vlaneseq  ;;  %v723_v7 = vmov 1966171168   ;;  %s960_s1 = inlined_call_operand.vmem [shape: bf16[128,256], index: 1, kind: input, shape index: {}]   ;;  %s961_s4 = inlined_call_operand.vmem [shape: bf16[8,2,64], index: 4, kind: output, shape index: {}]   ;;  %s962_s0 = inlined_call_operand.vmem [shape: bf16[8,2,128], index: 0, kind: input, shape index: {}]   ;;  %s963_s2 = inlined_call_operand.vmem [shape: bf16[64,256], index: 2, kind: input, shape index: {}]   ;;  %s964_s3 = inlined_call_operand.vmem [shape: f32[1,256], index: 3, kind: input, shape index: {}]  }
   0x1   :  { %v650_v0 = vld [vmem:[%s960_s1 + $0x4] ss:$8 sps:$4 sm:$0xff]   ;;  %224 = vmatprep.mubr.bf16.mxu0 %v722_v1  ;;  %v652_v2 = vld [vmem:[%s960_s1] ss:$8 sps:$4 sm:$0xff]   ;;  %v653_v3 = vld [vmem:[%s960_s1 + $0x14] ss:$8 sps:$4 sm:$0xff]   ;;  %v67_v8 = vunpack.c.l.s4 %v723_v7 }
   0x2   :  { %192 = vmatprep.subr.bf16.mxu0 %v650_v0  ;;  %v655_v4 = vld [vmem:[%s960_s1 + $0x10] ss:$8 sps:$4 sm:$0xff]   ;;  %v656_v5 = vld [vmem:[%s960_s1 + $0x24] ss:$8 sps:$4 sm:$0xff]   ;;  %v658_v9 = vld [vmem:[%s960_s1 + $0x20] ss:$8 sps:$4 sm:$0xff]  }
   0x3   :  { %193 = vmatpush1.bf16.msra.mxu0 %v652_v2  ;;  %v659_v10 = vld [vmem:[%s960_s1 + $0x34] ss:$8 sps:$4 sm:$0xff]   ;;  %v774_v11 = vshrl.u32 %v44_v6, 7  ;;  %v68_v12 = vunpack.c.0.s8 %v67_v8  ;;  %v661_v13 = vld [vmem:[%s960_s1 + $0x30] ss:$8 sps:$4 sm:$0xff]   ;;  %v839_v44 = vld [vmem:[%s963_s2] sm:$0xff] }
   0x4   :  { %194 = vmatprep.subr.bf16.mxu0 %v653_v3  ;;  %v662_v14 = vld [vmem:[%s960_s1 + $0x44] ss:$8 sps:$4 sm:$0xff]   ;;  %v35_v15 = vld [vmem:[%s962_s0] sm:$0x1]  ;;  %v36_v16 = vld [vmem:[%s962_s0 + $0x1] sm:$0x1] }
   0x5   :  { %v37_v17 = vld [vmem:[%s962_s0 + $0x2] sm:$0x1]  ;;  %v38_v18 = vld [vmem:[%s962_s0 + $0x3] sm:$0x1]  ;;  %v39_v19 = vld [vmem:[%s962_s0 + $0x4] sm:$0x1]  ;;  %v807_v23 = vsub.s32 %v68_v12, %v774_v11  ;;  %v62_v24 = vcombine.low %v35_v15, %v36_v16 }
   0x6   :  { %v40_v20 = vld [vmem:[%s962_s0 + $0x5] sm:$0x1]  ;;  %v41_v21 = vld [vmem:[%s962_s0 + $0x6] sm:$0x1]  ;;  %v42_v22 = vld [vmem:[%s962_s0 + $0x7] sm:$0x1]  ;;  %v63_v25 = vcombine.low %v37_v17, %v38_v18 }
   0x7   :  { %195 = vmatpush1.bf16.msra.mxu0 %v655_v4  ;;  %v64_v26 = vcombine.low %v39_v19, %v40_v20  ;;  %v65_v27 = vcombine.low %v41_v21, %v42_v22  ;;  %v664_v28 = vld [vmem:[%s960_s1 + $0x40] ss:$8 sps:$4 sm:$0xff]   ;;  %v665_v29 = vld [vmem:[%s960_s1 + $0x54] ss:$8 sps:$4 sm:$0xff]   ;;  %v72_v30 = vrot.slane %v62_v24, %v807_v23  ;;  %v667_v34 = vld [vmem:[%s960_s1 + $0x50] ss:$8 sps:$4 sm:$0xff]  }
   0x8   :  { %196 = vmatprep.subr.bf16.mxu0 %v656_v5  ;;  %v79_v31 = vrot.slane %v63_v25, %v807_v23  ;;  %v668_v35 = vld [vmem:[%s960_s1 + $0x64] ss:$8 sps:$4 sm:$0xff]   ;;  %v670_v38 = vld [vmem:[%s960_s1 + $0x60] ss:$8 sps:$4 sm:$0xff]   ;;  %v671_v39 = vld [vmem:[%s960_s1 + $0x74] ss:$8 sps:$4 sm:$0xff]  }
   0x9   :  { %v86_v32 = vrot.slane %v64_v26, %v807_v23  ;;  %v93_v33 = vrot.slane %v65_v27, %v807_v23  ;;  %v673_v42 = vld [vmem:[%s960_s1 + $0x70] ss:$8 sps:$4 sm:$0xff]   ;;  %v844_v45 = vld [vmem:[%s963_s2 + $0x8] sm:$0xff]  ;;  %v859_v48 = vld [vmem:[%s963_s2 + $0x20] sm:$0xff]  ;;  %v46_v52 = vsub.s32 0, %v774_v11  ;;  %v50_v54 = vsub.s32 1, %v774_v11 }
   0xa   :  { %v94_v36 = vcombine.low %v72_v30, %v79_v31  ;;  %v849_v46 = vld [vmem:[%s963_s2 + $0x10] sm:$0xff]  ;;  %v854_v47 = vld [vmem:[%s963_s2 + $0x18] sm:$0xff]  ;;  %v864_v49 = vld [vmem:[%s963_s2 + $0x28] sm:$0xff]  ;;  %v887_v25 = vmov 0.0   ;;  %v889_v26 = vmov 0.0   ;;  %v891_v27 = vmov 0.0  }
   0xb   :  { %197 = vmatpush1.bf16.msra.mxu0 %v658_v9  ;;  %v95_v37 = vcombine.low %v86_v32, %v93_v33  ;;  %v869_v50 = vld [vmem:[%s963_s2 + $0x30] sm:$0xff]  ;;  %v874_v51 = vld [vmem:[%s963_s2 + $0x38] sm:$0xff]  ;;  %v34_v53 = vld [vmem:[%s964_s3] sm:$0x3]  ;;  %s893_s2 = smov 0  }
   0xc   :  { %198 = vmatprep.subr.bf16.mxu0 %v659_v10  ;;  %v102_v40 = vrot.slane %v94_v36, %v807_v23  ;;  %v47_v55 = vrot.slane %v34_v53, %v46_v52  ;;  %v51_v56 = vrot.slane %v34_v53, %v50_v54 }
   0xd   :  { %v109_v41 = vrot.slane %v95_v37, %v807_v23 }
   0xf   :  { %199 = vmatpush1.bf16.msra.mxu0 %v661_v13  ;;  %v110_v43 = vcombine.low %v102_v40, %v109_v41 }
  0x10   :  { %200 = vmatprep.subr.bf16.mxu0 %v662_v14 }
  0x13   :  { %201 = vmatpush1.bf16.msra.mxu0 %v664_v28 }
  0x14   :  { %202 = vmatprep.subr.bf16.mxu0 %v665_v29 }
  0x17   :  { %203 = vmatpush1.bf16.msra.mxu0 %v667_v34 }
  0x18   :  { %204 = vmatprep.subr.bf16.mxu0 %v668_v35 }
  0x1b   :  { %205 = vmatpush1.bf16.msra.mxu0 %v670_v38 }
  0x1c   :  { %206 = vmatprep.subr.bf16.mxu0 %v671_v39 }
  0x1f   :  { %207 = vmatpush1.bf16.msra.mxu0 %v673_v42 }
  0x22   :  { %225 = vmatmul.mubr.bf16.vlgmr.msra.gmra.mrb[0].mxu0 %v110_v43 }
  0xf5   :  { %v226_v57 = vpop.f32.mrb[0].mxu0 }
  0xf6   :  { %v227_v58 = vadd.f32 %v226_v57, %v47_v55  ;;  %v228_v59 = vpop.f32.mrb[1].mxu0 }
  0xf7   :  { %v229_v60 = vadd.f32 %v228_v59, %v51_v56  ;;  %v230_v61 = vpop.f32.mrb[2].mxu0 }
  0xf8   :  { %v231_v62 = vadd.f32 %v230_v61, %v47_v55  ;;  %v232_v63 = vpop.f32.mrb[3].mxu0 }
  0xf9   :  { %v595_v0 = vpack.c.bf16 %v229_v60, %v227_v58  ;;  %v233_v1 = vadd.f32 %v232_v63, %v51_v56 }
  0xfb   :  { %v247_v2 = vrot.slane %v595_v0, %v807_v23  ;;  %v596_v3 = vpack.c.bf16 %v233_v1, %v231_v62 }
  0xfd   :  { %v255_v4 = vcombine.high %v247_v2, %v247_v2  ;;  %v263_v5 = vrot.slane %v247_v2, %v807_v23  ;;  %597 = vst.sshfl [vmem:[#allocation2] sm:$0x1 pattern:$0x73625140] %v247_v2  ;;  %v254_v6 = vrot.slane %v596_v3, %v807_v23 }
  0xff   :  { %v277_v7 = vrot.slane %v255_v4, %v807_v23  ;;  %v285_v8 = vcombine.high %v263_v5, %v263_v5  ;;  %598 = vst.sshfl [vmem:[#allocation2 + $0x1] sm:$0x1 pattern:$0x73625140] %v255_v4  ;;  %v305_v9 = vrot.slane %v263_v5, 1  ;;  %v256_v10 = vcombine.high %v254_v6, %v254_v6 }
 0x100   :  { %599 = vst.sshfl [vmem:[#allocation2 + $0x4] sm:$0x1 pattern:$0x73625140] %v254_v6  ;;  %v270_v12 = vrot.slane %v254_v6, %v807_v23 }
 0x101   :  { %v287_v13 = vcombine.high %v277_v7, %v277_v7  ;;  %299 = vst [vmem:[#allocation2 + $0x2] sm:$0x1] %v285_v8  ;;  %v306_v14 = vrot.slane %v277_v7, 1  ;;  %v307_v15 = vrot.slane %v285_v8, 1  ;;  %321 = vst [vmem:[#allocation3] sm:$0x1] %v305_v9  ;;  %v284_v16 = vrot.slane %v256_v10, %v807_v23 }
 0x102   :  { %600 = vst.sshfl [vmem:[#allocation2 + $0x5] sm:$0x1 pattern:$0x73625140] %v256_v10  ;;  %v286_v17 = vcombine.high %v270_v12, %v270_v12  ;;  %v309_v18 = vrot.slane %v270_v12, 1 }
 0x103   :  { %300 = vst [vmem:[#allocation2 + $0x3] sm:$0x1] %v287_v13  ;;  %v308_v19 = vrot.slane %v287_v13, 1  ;;  %322 = vst [vmem:[#allocation3 + $0x1] sm:$0x1] %v306_v14  ;;  %v288_v20 = vcombine.high %v284_v16, %v284_v16  ;;  %v310_v21 = vrot.slane %v284_v16, 1 }
 0x104   :  { %323 = vst [vmem:[#allocation3 + $0x2] sm:$0x1] %v307_v15  ;;  %303 = vst [vmem:[#allocation2 + $0x6] sm:$0x1] %v286_v17  ;;  %v311_v22 = vrot.slane %v286_v17, 1 }
 0x105   :  { %325 = vst [vmem:[#allocation3 + $0x4] sm:$0x1] %v309_v18  ;;  %324 = vst [vmem:[#allocation3 + $0x3] sm:$0x1] %v308_v19  ;;  %v312_v24 = vrot.slane %v288_v20, 1 }
 0x106   :  { %304 = vst [vmem:[#allocation2 + $0x7] sm:$0x1] %v288_v20  ;;  %326 = vst [vmem:[#allocation3 + $0x5] sm:$0x1] %v310_v21 }
 0x107   :  { %327 = vst [vmem:[#allocation3 + $0x6] sm:$0x1] %v311_v22  ;;  %328 = vst [vmem:[#allocation3 + $0x7] sm:$0x1] %v312_v24 }
 0x108 LB: > { %v602_v28 = vcombine.high %v839_v44, %v844_v45  ;;  %v601_v29 = vcombine.low %v839_v44, %v844_v45  ;;  %v604_v30 = vcombine.high %v849_v46, %v854_v47  ;;  %v603_v31 = vcombine.low %v849_v46, %v854_v47  ;;  %s346_s3 = ssub.s32 7, %s720_s2  ;;  %s433_s0 = scalar_lea.vmem [#allocation2], %s720_s2  ;;  %s720_s2 = sphi %s893_s2, %s342_s2   ;;  %v716_v27 = vphi %v891_v27, %v556_v27   ;;  %v712_v26 = vphi %v889_v26, %v464_v26   ;;  %v708_v25 = vphi %v887_v25, %v476_v25  }
 0x109   : > { %v724_v32 = vmov 0   ;;  %v606_v33 = vcombine.high %v859_v48, %v864_v49  ;;  %v605_v34 = vcombine.low %v859_v48, %v864_v49  ;;  %v608_v35 = vcombine.high %v869_v50, %v874_v51  ;;  %s437_s27 = scalar_lea.vmem [#allocation3], %s346_s3  ;;  %s725_s28 = smov 64  }
 0x10a   : > { %392 = vmatprep.subr.bf16.mxu0 %v602_v28  ;;  %424 = vmatprep.mubr.bf16.mxu0 %v724_v32  ;;  %v607_v36 = vcombine.low %v869_v50, %v874_v51  ;;  %v347_v37 = vpack.c.bf16 %v716_v27, %v716_v27  ;;  %vm388_vm0 = vcmask 523264   ;;  %s726_s29 = smov 32   ;;  %v727_v13 = vmov 1983009808   ;;  %s508_s6 = scalar_lea.vmem %s961_s4, %s720_s2 }
 0x10b   : > { %393 = vmatpush1.bf16.msra.mxu0 %v601_v29  ;;  %v535_v14 = vunpack.c.l.s4 %v727_v13  ;;  %vm509_vm1 = vcmask 253952   ;;  %s530_s9 = scalar_lea.vmem %s961_s4, %s346_s3  ;;  %vm531_vm2 = vcmask 516352   ;;  %vm555_vm3 = vcmask 261120   ;;  %s342_s2 = sadd.s32 1, %s720_s2  }
 0x10c   : > { %394 = vmatprep.subr.bf16.mxu0 %v604_v30  ;;  %p339_p0 = scmp.ge.s32.totalorder %s342_s2, 8  }
 0x10d   : > { %v434_v38 = vld [vmem:[%s433_s0] sm:$0x1]  ;;  %v536_v17 = vunpack.c.0.s8 %v535_v14 }
 0x10e   : > { %v438_v39 = vld [vmem:[%s437_s27] sm:$0x1]  ;;  %v435_v40 = vunpack.c.l.bf16 %v434_v38 }
 0x10f   : > { %395 = vmatpush1.bf16.msra.mxu0 %v603_v31  ;;  %v439_v41 = vunpack.c.l.bf16 %v438_v39  ;;  %v539_v22 = vsub.s32 %v536_v17, %v774_v11 }
 0x110   : > { %396 = vmatprep.subr.bf16.mxu0 %v606_v33 }
 0x113   : > { %397 = vmatpush1.bf16.msra.mxu0 %v605_v34 }
 0x114   : > { %398 = vmatprep.subr.bf16.mxu0 %v608_v35 }
 0x117   : > { %399 = vmatpush1.bf16.msra.mxu0 %v607_v36 }
 0x11a   : > { %609 = vmatmul.mubr.msk.bf16.vlgmr.msra.gmra.mrb[0].mxu0 %vm388_vm0, %v347_v37 }
 0x1ed   : > { %v426_v42 = vpop.f32.mrb[0].mxu0 }
 0x1ee   : > { %v436_v43 = vadd.f32 %v435_v40, %v426_v42  ;;  %v428_v52 = vpop.f32.mrb[1].mxu0 }
 0x1ef   : > { %v430_v53 = vpop.f32.mrb[2].mxu0  ;;  %v440_v54 = vadd.f32 %v439_v41, %v428_v52 }
 0x1f0   : > { %674 = vtanh.f32 %v436_v43  ;;  %v431_v55 = vpop.f32.mrb[3].mxu0  ;;  %v610_v58 = vmul.f32 -1.442695, %v436_v43 }
 0x1f1   : > { %676 = vtanh.f32 %v440_v54  ;;  %v611_v59 = vmul.f32 -1.442695, %v440_v54 }
 0x1f2   : > { %678 = vpow2.f32 %v610_v58 }
 0x1f3   : > { %680 = vpow2.f32 %v611_v59 }
 0x1fa   : > { %v675_v56 = vpop.eup %674 }
 0x1fb   : > { %456 = vrot.lane.b32.xlu0 %v675_v56, %s725_s28  ;;  %v677_v57 = vpop.eup %676 }
 0x1fc   : > { %v679_v60 = vpop.eup %678 }
 0x1fd   : > { %v444_v61 = vadd.f32 1.0, %v679_v60  ;;  %v681_v62 = vpop.eup %680 }
 0x1fe   : > { %v450_v63 = vadd.f32 1.0, %v681_v62 }
 0x1ff   : > { %468 = vrot.lane.b32.xlu0 %v677_v57, %s725_s28  ;;  %682 = vrcp.f32 %v444_v61 }
 0x200   : > { %684 = vrcp.f32 %v450_v63 }
 0x209   : > { %v683_v0 = vpop.eup %682 }
 0x20a   : > { %v685_v3 = vpop.eup %684  ;;  %v453_v6 = vmul.f32 %v712_v26, %v683_v0 }
 0x20b   : > { %v465_v8 = vmul.f32 %v708_v25, %v685_v3 }
 0x26d   : > { %v457_v1 = vpop.permute.xlu0 %456 }
 0x26e   : > { %v459_v2 = vmul.f32 %v683_v0, %v457_v1 }
 0x270   : > { %461 = vrot.lane.b32.xlu1 %v459_v2, %s726_s29 }
 0x271   : > { %v469_v4 = vpop.permute.xlu0 %468 }
 0x272   : > { %v471_v5 = vmul.f32 %v685_v3, %v469_v4 }
 0x274   : > { %473 = vrot.lane.b32.xlu1 %v471_v5, %s726_s29 }
 0x2e2   : > { %v462_v7 = vpop.permute.xlu1 %461 }
 0x2e3   : > { %v464_v26 = vadd.f32 %v462_v7, %v453_v6  }
 0x2e5   : > { %686 = vtanh.f32 %v464_v26 }
 0x2e6   : > { %v474_v9 = vpop.permute.xlu1 %473 }
 0x2e7   : > { %v476_v25 = vadd.f32 %v474_v9, %v465_v8  }
 0x2e9   : > { %688 = vtanh.f32 %v476_v25 }
 0x2ef   : > { %v687_v10 = vpop.eup %686 }
 0x2f0   : > { %479 = vrot.lane.b32.xlu0 %v687_v10, %s725_s28 }
 0x2f3   : > { %v689_v12 = vpop.eup %688 }
 0x2f4   : > { %485 = vrot.lane.b32.xlu1 %v689_v12, %s725_s28 }
 0x362   : > { %v480_v15 = vpop.permute.xlu0 %479 }
 0x363   : > { %v482_v16 = vmul.f32 %v683_v0, %v480_v15 }
 0x365   : > { %v489_v18 = vpack.c.bf16 %v482_v16, %v482_v16  ;;  %v540_v29 = vrot.slane %v482_v16, %v539_v22 }
 0x366   : > { %v486_v19 = vpop.permute.xlu1 %485 }
 0x367   : > { %v497_v20 = vrot.slane %v489_v18, %v807_v23  ;;  %v488_v21 = vmul.f32 %v685_v3, %v486_v19 }
 0x369   : > { %v504_v24 = vrot.slane %v497_v20, %v807_v23  ;;  %v511_v27 = vpack.c.bf16 %v488_v21, %v488_v21  ;;  %v551_v31 = vrot.slane %v488_v21, %v539_v22 }
 0x36b   : > { %v519_v28 = vrot.slane %v511_v27, %v807_v23  ;;  %505 = vrot.lane.b32.xlu0 %v504_v24, %s726_s29 }
 0x36d   : > { %v526_v30 = vrot.slane %v519_v28, %v807_v23 }
 0x36f   : > { %541 = vrot.lane.b32.xlu0 %v540_v29, %s726_s29  ;;  %527 = vrot.lane.b32.xlu1 %v526_v30, %s725_s28 }
 0x373   : > { %552 = vrot.lane.b32.xlu1 %v551_v31, %s725_s28 }
 0x3dd   : > { %v506_v32 = vpop.permute.xlu0 %505 }
 0x3de   : > { %510 = vst.msk [vmem:[%s508_s6] sm:$0x1] %vm509_vm1, %v506_v32 }
 0x3e0   :  { %341 = sbr.rel (!%p339_p0) target bundleno = 264 (0x108), region = 47 }
 0x3e1   : > { %v528_v33 = vpop.permute.xlu1 %527  ;;  %v542_v34 = vpop.permute.xlu0 %541 }
 0x3e2   : > { %532 = vst.msk [vmem:[%s530_s9] sm:$0x1] %vm531_vm2, %v528_v33 }
 0x3e5   : > { %v553_v35 = vpop.permute.xlu1 %552 }
 0x3e6   : > { %v556_v27 = vsel %vm555_vm3, %v542_v34, %v553_v35  }

// kernel: cnn_encoder_forward.6
= control target key start
LH: loop header
LB: loop body
LE: loop exit
PB: predicated region body
PF: predicated region fallthrough
CT: control target
= control target key end

     0   :  { %v36_v0 = vlaneseq  ;;  %v657_v2 = vmov 0   ;;  %v658_v3 = vmov 1966171168   ;;  %vm143_vm0 = vcmask 523264   ;;  %s870_s1 = inlined_call_operand.vmem [shape: bf16[64,256], index: 1, kind: input, shape index: {}]   ;;  %s871_s4 = inlined_call_operand.vmem [shape: bf16[8,2,64], index: 4, kind: output, shape index: {}]   ;;  %s872_s0 = inlined_call_operand.vmem [shape: bf16[8,2,64], index: 0, kind: input, shape index: {}]   ;;  %s873_s2 = inlined_call_operand.vmem [shape: bf16[64,256], index: 2, kind: input, shape index: {}]   ;;  %s874_s3 = inlined_call_operand.vmem [shape: f32[1,256], index: 3, kind: input, shape index: {}]  }
   0x1   :  { %v597_v1 = vld [vmem:[%s870_s1 + $0x4] ss:$8 sps:$4 sm:$0xff]   ;;  %179 = vmatprep.mubr.bf16.mxu0 %v657_v2  ;;  %v59_v4 = vunpack.c.l.s4 %v658_v3  ;;  %v599_v5 = vld [vmem:[%s870_s1] ss:$8 sps:$4 sm:$0xff]   ;;  %v600_v7 = vld [vmem:[%s870_s1 + $0x14] ss:$8 sps:$4 sm:$0xff]  }
   0x2   :  { %v694_v6 = vshrl.u32 %v36_v0, 7  ;;  %147 = vmatprep.subr.bf16.mxu0 %v597_v1  ;;  %v602_v9 = vld [vmem:[%s870_s1 + $0x10] ss:$8 sps:$4 sm:$0xff]   ;;  %v603_v10 = vld [vmem:[%s870_s1 + $0x24] ss:$8 sps:$4 sm:$0xff]  }
   0x3   :  { %v60_v8 = vunpack.c.0.s8 %v59_v4  ;;  %148 = vmatpush1.bf16.msra.mxu0 %v599_v5  ;;  %v605_v12 = vld [vmem:[%s870_s1 + $0x20] ss:$8 sps:$4 sm:$0xff]   ;;  %v31_v17 = vld [vmem:[%s872_s0 + $0x4] sm:$0x1]  ;;  %v32_v19 = vld [vmem:[%s872_s0 + $0x5] sm:$0x1] }
   0x4   :  { %149 = vmatprep.subr.bf16.mxu0 %v600_v7  ;;  %v27_v13 = vld [vmem:[%s872_s0] sm:$0x1]  ;;  %v28_v14 = vld [vmem:[%s872_s0 + $0x1] sm:$0x1]  ;;  %v29_v15 = vld [vmem:[%s872_s0 + $0x2] sm:$0x1]  ;;  %v56_v24 = vcombine.low %v31_v17, %v32_v19 }
   0x5   :  { %v706_v11 = vsub.s32 %v60_v8, %v694_v6  ;;  %v30_v16 = vld [vmem:[%s872_s0 + $0x3] sm:$0x1]  ;;  %v54_v18 = vcombine.low %v27_v13, %v28_v14  ;;  %v33_v20 = vld [vmem:[%s872_s0 + $0x6] sm:$0x1]  ;;  %v34_v21 = vld [vmem:[%s872_s0 + $0x7] sm:$0x1] }
   0x6   :  { %v55_v22 = vcombine.low %v29_v15, %v30_v16  ;;  %v606_v23 = vld [vmem:[%s870_s1 + $0x34] ss:$8 sps:$4 sm:$0xff]   ;;  %v57_v25 = vcombine.low %v33_v20, %v34_v21  ;;  %v608_v30 = vld [vmem:[%s870_s1 + $0x30] ss:$8 sps:$4 sm:$0xff]   ;;  %v751_v36 = vld [vmem:[%s873_s2] sm:$0xff]  ;;  %v38_v44 = vsub.s32 0, %v694_v6 }
   0x7   :  { %150 = vmatpush1.bf16.msra.mxu0 %v602_v9  ;;  %v64_v26 = vrot.slane %v54_v18, %v706_v11  ;;  %v78_v28 = vrot.slane %v56_v24, %v706_v11  ;;  %v756_v37 = vld [vmem:[%s873_s2 + $0x8] sm:$0xff]  ;;  %v761_v38 = vld [vmem:[%s873_s2 + $0x10] sm:$0xff]  ;;  %v766_v39 = vld [vmem:[%s873_s2 + $0x18] sm:$0xff]  ;;  %v42_v46 = vsub.s32 1, %v694_v6  ;;  %v799_v17 = vmov 0.0  }
   0x8   :  { %151 = vmatprep.subr.bf16.mxu0 %v603_v10  ;;  %v71_v27 = vrot.slane %v55_v22, %v706_v11  ;;  %v85_v29 = vrot.slane %v57_v25, %v706_v11  ;;  %v771_v40 = vld [vmem:[%s873_s2 + $0x20] sm:$0xff]  ;;  %v776_v41 = vld [vmem:[%s873_s2 + $0x28] sm:$0xff]  ;;  %v781_v42 = vld [vmem:[%s873_s2 + $0x30] sm:$0xff]  ;;  %v801_v18 = vmov 0.0   ;;  %v803_v19 = vmov 0.0  }
   0x9   :  { %v786_v43 = vld [vmem:[%s873_s2 + $0x38] sm:$0xff]  ;;  %v26_v45 = vld [vmem:[%s874_s3] sm:$0x3]  ;;  %s805_s2 = smov 0  }
   0xa   :  { %v86_v31 = vcombine.low %v64_v26, %v71_v27  ;;  %v87_v32 = vcombine.low %v78_v28, %v85_v29  ;;  %v39_v47 = vrot.slane %v26_v45, %v38_v44  ;;  %v43_v48 = vrot.slane %v26_v45, %v42_v46 }
   0xb   :  { %152 = vmatpush1.bf16.msra.mxu0 %v605_v12 }
   0xc   :  { %153 = vmatprep.subr.bf16.mxu0 %v606_v23  ;;  %v94_v33 = vrot.slane %v86_v31, %v706_v11  ;;  %v101_v34 = vrot.slane %v87_v32, %v706_v11 }
   0xe   :  { %v102_v35 = vcombine.low %v94_v33, %v101_v34 }
   0xf   :  { %154 = vmatpush1.bf16.msra.mxu0 %v608_v30 }
  0x12   :  { %541 = vmatmul.mubr.msk.bf16.vlgmr.msra.gmra.mrb[0].mxu0 %vm143_vm0, %v102_v35 }
  0xe5   :  { %v181_v49 = vpop.f32.mrb[0].mxu0 }
  0xe6   :  { %v182_v50 = vadd.f32 %v181_v49, %v39_v47  ;;  %v183_v51 = vpop.f32.mrb[1].mxu0 }
  0xe7   :  { %v184_v52 = vadd.f32 %v183_v51, %v43_v48  ;;  %v185_v53 = vpop.f32.mrb[2].mxu0 }
  0xe8   :  { %v186_v54 = vadd.f32 %v185_v53, %v39_v47  ;;  %v187_v55 = vpop.f32.mrb[3].mxu0 }
  0xe9   :  { %v542_v56 = vpack.c.bf16 %v184_v52, %v182_v50  ;;  %v188_v57 = vadd.f32 %v187_v55, %v43_v48 }
  0xeb   :  { %v202_v58 = vrot.slane %v542_v56, %v706_v11  ;;  %v543_v59 = vpack.c.bf16 %v188_v57, %v186_v54 }
  0xed   :  { %v210_v60 = vcombine.high %v202_v58, %v202_v58  ;;  %v218_v61 = vrot.slane %v202_v58, %v706_v11  ;;  %544 = vst.sshfl [vmem:[#allocation2] sm:$0x1 pattern:$0x73625140] %v202_v58  ;;  %v209_v62 = vrot.slane %v543_v59, %v706_v11 }
  0xef   :  { %v232_v63 = vrot.slane %v210_v60, %v706_v11  ;;  %v240_v0 = vcombine.high %v218_v61, %v218_v61  ;;  %545 = vst.sshfl [vmem:[#allocation2 + $0x1] sm:$0x1 pattern:$0x73625140] %v210_v60  ;;  %v260_v1 = vrot.slane %v218_v61, 1  ;;  %v211_v2 = vcombine.high %v209_v62, %v209_v62 }
  0xf0   :  { %546 = vst.sshfl [vmem:[#allocation2 + $0x4] sm:$0x1 pattern:$0x73625140] %v209_v62  ;;  %v225_v3 = vrot.slane %v209_v62, %v706_v11 }
  0xf1   :  { %v242_v4 = vcombine.high %v232_v63, %v232_v63  ;;  %254 = vst [vmem:[#allocation2 + $0x2] sm:$0x1] %v240_v0  ;;  %v261_v5 = vrot.slane %v232_v63, 1  ;;  %v262_v7 = vrot.slane %v240_v0, 1  ;;  %276 = vst [vmem:[#allocation3] sm:$0x1] %v260_v1  ;;  %v239_v8 = vrot.slane %v211_v2, %v706_v11 }
  0xf2   :  { %547 = vst.sshfl [vmem:[#allocation2 + $0x5] sm:$0x1 pattern:$0x73625140] %v211_v2  ;;  %v241_v9 = vcombine.high %v225_v3, %v225_v3  ;;  %v264_v10 = vrot.slane %v225_v3, 1 }
  0xf3   :  { %255 = vst [vmem:[#allocation2 + $0x3] sm:$0x1] %v242_v4  ;;  %v263_v12 = vrot.slane %v242_v4, 1  ;;  %277 = vst [vmem:[#allocation3 + $0x1] sm:$0x1] %v261_v5  ;;  %v243_v13 = vcombine.high %v239_v8, %v239_v8  ;;  %v265_v14 = vrot.slane %v239_v8, 1 }
  0xf4   :  { %278 = vst [vmem:[#allocation3 + $0x2] sm:$0x1] %v262_v7  ;;  %258 = vst [vmem:[#allocation2 + $0x6] sm:$0x1] %v241_v9  ;;  %v266_v15 = vrot.slane %v241_v9, 1 }
  0xf5   :  { %280 = vst [vmem:[#allocation3 + $0x4] sm:$0x1] %v264_v10  ;;  %279 = vst [vmem:[#allocation3 + $0x3] sm:$0x1] %v263_v12  ;;  %v267_v16 = vrot.slane %v243_v13, 1 }
  0xf6   :  { %259 = vst [vmem:[#allocation2 + $0x7] sm:$0x1] %v243_v13  ;;  %281 = vst [vmem:[#allocation3 + $0x5] sm:$0x1] %v265_v14 }
  0xf7   :  { %282 = vst [vmem:[#allocation3 + $0x6] sm:$0x1] %v266_v15  ;;  %283 = vst [vmem:[#allocation3 + $0x7] sm:$0x1] %v267_v16 }
  0xf8 LB: > { %v549_v20 = vcombine.high %v751_v36, %v756_v37  ;;  %v548_v21 = vcombine.low %v751_v36, %v756_v37  ;;  %v551_v22 = vcombine.high %v761_v38, %v766_v39  ;;  %v550_v23 = vcombine.low %v761_v38, %v766_v39  ;;  %s301_s3 = ssub.s32 7, %s655_s2  ;;  %s387_s11 = scalar_lea.vmem [#allocation2], %s655_s2  ;;  %s655_s2 = sphi %s805_s2, %s297_s2   ;;  %v651_v19 = vphi %v803_v19, %v510_v19   ;;  %v647_v18 = vphi %v801_v18, %v418_v18   ;;  %v643_v17 = vphi %v799_v17, %v430_v17  }
  0xf9   : > { %v659_v24 = vmov 0   ;;  %v553_v25 = vcombine.high %v771_v40, %v776_v41  ;;  %v552_v26 = vcombine.low %v771_v40, %v776_v41  ;;  %v555_v27 = vcombine.high %v781_v42, %v786_v43  ;;  %s391_s12 = scalar_lea.vmem [#allocation3], %s301_s3  ;;  %s660_s13 = smov 64  }
  0xfa   : > { %346 = vmatprep.subr.bf16.mxu0 %v549_v20  ;;  %378 = vmatprep.mubr.bf16.mxu0 %v659_v24  ;;  %v554_v28 = vcombine.low %v781_v42, %v786_v43  ;;  %v302_v29 = vpack.c.bf16 %v651_v19, %v651_v19  ;;  %s661_s14 = smov 32   ;;  %v662_v4 = vmov 1983009808   ;;  %s462_s17 = scalar_lea.vmem %s871_s4, %s655_s2  ;;  %vm463_vm1 = vcmask 253952  }
  0xfb   : > { %347 = vmatpush1.bf16.msra.mxu0 %v548_v21  ;;  %v489_v5 = vunpack.c.l.s4 %v662_v4  ;;  %s484_s20 = scalar_lea.vmem %s871_s4, %s301_s3  ;;  %vm485_vm2 = vcmask 516352   ;;  %vm509_vm3 = vcmask 261120   ;;  %s297_s2 = sadd.s32 1, %s655_s2  }
  0xfc   : > { %348 = vmatprep.subr.bf16.mxu0 %v551_v22  ;;  %p294_p0 = scmp.ge.s32.totalorder %s297_s2, 8  }
  0xfd   : > { %v388_v30 = vld [vmem:[%s387_s11] sm:$0x1]  ;;  %v490_v9 = vunpack.c.0.s8 %v489_v5 }
  0xfe   : > { %v392_v31 = vld [vmem:[%s391_s12] sm:$0x1]  ;;  %v389_v32 = vunpack.c.l.bf16 %v388_v30 }
  0xff   : > { %349 = vmatpush1.bf16.msra.mxu0 %v550_v23  ;;  %v393_v33 = vunpack.c.l.bf16 %v392_v31  ;;  %v493_v15 = vsub.s32 %v490_v9, %v694_v6 }
 0x100   : > { %350 = vmatprep.subr.bf16.mxu0 %v553_v25 }
 0x103   : > { %351 = vmatpush1.bf16.msra.mxu0 %v552_v26 }
 0x104   : > { %352 = vmatprep.subr.bf16.mxu0 %v555_v27 }
 0x107   : > { %353 = vmatpush1.bf16.msra.mxu0 %v554_v28 }
 0x10a   : > { %556 = vmatmul.mubr.msk.bf16.vlgmr.msra.gmra.mrb[0].mxu0 %vm143_vm0, %v302_v29 }
 0x1dd   : > { %v380_v34 = vpop.f32.mrb[0].mxu0 }
 0x1de   : > { %v390_v35 = vadd.f32 %v389_v32, %v380_v34  ;;  %v382_v44 = vpop.f32.mrb[1].mxu0 }
 0x1df   : > { %v384_v45 = vpop.f32.mrb[2].mxu0  ;;  %v394_v46 = vadd.f32 %v393_v33, %v382_v44 }
 0x1e0   : > { %609 = vtanh.f32 %v390_v35  ;;  %v385_v47 = vpop.f32.mrb[3].mxu0  ;;  %v557_v50 = vmul.f32 -1.442695, %v390_v35 }
 0x1e1   : > { %611 = vtanh.f32 %v394_v46  ;;  %v558_v51 = vmul.f32 -1.442695, %v394_v46 }
 0x1e2   : > { %613 = vpow2.f32 %v557_v50 }
 0x1e3   : > { %615 = vpow2.f32 %v558_v51 }
 0x1ea   : > { %v610_v48 = vpop.eup %609 }
 0x1eb   : > { %410 = vrot.lane.b32.xlu0 %v610_v48, %s660_s13  ;;  %v612_v49 = vpop.eup %611 }
 0x1ec   : > { %v614_v52 = vpop.eup %613 }
 0x1ed   : > { %v398_v53 = vadd.f32 1.0, %v614_v52  ;;  %v616_v54 = vpop.eup %615 }
 0x1ee   : > { %v404_v55 = vadd.f32 1.0, %v616_v54 }
 0x1ef   : > { %422 = vrot.lane.b32.xlu0 %v612_v49, %s660_s13  ;;  %617 = vrcp.f32 %v398_v53 }
 0x1f0   : > { %619 = vrcp.f32 %v404_v55 }
 0x1f9   : > { %v618_v56 = vpop.eup %617 }
 0x1fa   : > { %v620_v59 = vpop.eup %619  ;;  %v407_v62 = vmul.f32 %v647_v18, %v618_v56 }
 0x1fb   : > { %v419_v0 = vmul.f32 %v643_v17, %v620_v59 }
 0x25d   : > { %v411_v57 = vpop.permute.xlu0 %410 }
 0x25e   : > { %v413_v58 = vmul.f32 %v618_v56, %v411_v57 }
 0x260   : > { %415 = vrot.lane.b32.xlu1 %v413_v58, %s661_s14 }
 0x261   : > { %v423_v60 = vpop.permute.xlu0 %422 }
 0x262   : > { %v425_v61 = vmul.f32 %v620_v59, %v423_v60 }
 0x264   : > { %427 = vrot.lane.b32.xlu1 %v425_v61, %s661_s14 }
 0x2d2   : > { %v416_v63 = vpop.permute.xlu1 %415 }
 0x2d3   : > { %v418_v18 = vadd.f32 %v416_v63, %v407_v62  }
 0x2d5   : > { %621 = vtanh.f32 %v418_v18 }
 0x2d6   : > { %v428_v1 = vpop.permute.xlu1 %427 }
 0x2d7   : > { %v430_v17 = vadd.f32 %v428_v1, %v419_v0  }
 0x2d9   : > { %623 = vtanh.f32 %v430_v17 }
 0x2df   : > { %v622_v2 = vpop.eup %621 }
 0x2e0   : > { %433 = vrot.lane.b32.xlu0 %v622_v2, %s660_s13 }
 0x2e3   : > { %v624_v3 = vpop.eup %623 }
 0x2e4   : > { %439 = vrot.lane.b32.xlu1 %v624_v3, %s660_s13 }
 0x352   : > { %v434_v7 = vpop.permute.xlu0 %433 }
 0x353   : > { %v436_v8 = vmul.f32 %v618_v56, %v434_v7 }
 0x355   : > { %v443_v10 = vpack.c.bf16 %v436_v8, %v436_v8  ;;  %v494_v21 = vrot.slane %v436_v8, %v493_v15 }
 0x356   : > { %v440_v12 = vpop.permute.xlu1 %439 }
 0x357   : > { %v451_v13 = vrot.slane %v443_v10, %v706_v11  ;;  %v442_v14 = vmul.f32 %v620_v59, %v440_v12 }
 0x359   : > { %v458_v16 = vrot.slane %v451_v13, %v706_v11  ;;  %v465_v19 = vpack.c.bf16 %v442_v14, %v442_v14  ;;  %v505_v23 = vrot.slane %v442_v14, %v493_v15 }
 0x35b   : > { %v473_v20 = vrot.slane %v465_v19, %v706_v11  ;;  %459 = vrot.lane.b32.xlu0 %v458_v16, %s661_s14 }
 0x35d   : > { %v480_v22 = vrot.slane %v473_v20, %v706_v11 }
 0x35f   : > { %495 = vrot.lane.b32.xlu0 %v494_v21, %s661_s14  ;;  %481 = vrot.lane.b32.xlu1 %v480_v22, %s660_s13 }
 0x363   : > { %506 = vrot.lane.b32.xlu1 %v505_v23, %s660_s13 }
 0x3cd   : > { %v460_v24 = vpop.permute.xlu0 %459 }
 0x3ce   : > { %464 = vst.msk [vmem:[%s462_s17] sm:$0x1] %vm463_vm1, %v460_v24 }
 0x3d0   :  { %296 = sbr.rel (!%p294_p0) target bundleno = 248 (0xf8), region = 47 }
 0x3d1   : > { %v482_v25 = vpop.permute.xlu1 %481  ;;  %v496_v26 = vpop.permute.xlu0 %495 }
 0x3d2   : > { %486 = vst.msk [vmem:[%s484_s20] sm:$0x1] %vm485_vm2, %v482_v25 }
 0x3d5   : > { %v507_v27 = vpop.permute.xlu1 %506 }
 0x3d6   : > { %v510_v19 = vsel %vm509_vm3, %v496_v26, %v507_v27  }

// kernel: cnn_encoder_forward.7
= control target key start
LH: loop header
LB: loop body
LE: loop exit
PB: predicated region body
PF: predicated region fallthrough
CT: control target
= control target key end

     0   :  { %v618_v1 = vmov 0.0   ;;  %v65_v2 = vlaneseq  ;;  %vm619_vm0 = vmmov 0   ;;  %v620_v4 = vmov 1966171168   ;;  %s731_s0 = inlined_call_operand.vmem [shape: bf16[8,2,64], index: 0, kind: input, shape index: {}]   ;;  %s732_s1 = inlined_call_operand.vmem [shape: bf16[64,64], index: 1, kind: input, shape index: {}]   ;;  %s733_s2 = inlined_call_operand.vmem [shape: f32[1,64], index: 2, kind: input, shape index: {}]   ;;  %s734_s3 = inlined_call_operand.vmem [shape: f32[1,64], index: 3, kind: input, shape index: {}]   ;;  %s735_s4 = inlined_call_operand.vmem [shape: f32[1,64], index: 4, kind: input, shape index: {}]   ;;  %s736_s5 = inlined_call_operand.hbm [shape: f32[2,8,64], index: 5, kind: output, shape index: {}]  }
   0x1   :  { %v586_v0 = vld [vmem:[%s732_s1] sm:$0xff]   ;;  %556 = vmatprep.subr.bf16.mxu0 %v618_v1  ;;  %568 = vmatprep.subr.bf16.mxu1 %v618_v1  ;;  %v587_v3 = vld [vmem:[%s732_s1 + $0x8] sm:$0xff]   ;;  %v63_v5 = vunpack.c.l.s4 %v620_v4  ;;  %v588_v7 = vld [vmem:[%s732_s1 + $0x10] sm:$0xff]   ;;  %vm176_vm1 = vcmask 1041409   ;;  %vm179_vm2 = vcmask 1042434   ;;  %vm182_vm3 = vcmask 1043459  }
   0x2   :  { %557 = vmatpush3.bf16.msra.mxu0 %v586_v0  ;;  %569 = vmatpush3.bf16.msra.mxu1 %v586_v0  ;;  %v66_v6 = vshrl.u32 %v65_v2, 7  ;;  %v522_v8 = vld.sshfl [vmem:[%s731_s0] sm:$0x1 pattern:$0x75316420]  ;;  %v589_v13 = vld [vmem:[%s732_s1 + $0x18] sm:$0xff]  }
   0x3   :  { %558 = vmatprep.subr.bf16.mxu0 %v618_v1  ;;  %570 = vmatprep.subr.bf16.mxu1 %v618_v1  ;;  %v523_v9 = vld.sshfl [vmem:[%s731_s0 + $0x1] sm:$0x1 pattern:$0x75316420]  ;;  %v64_v12 = vunpack.c.0.s8 %v63_v5  ;;  %vm185_vm4 = vcmask 1044484  }
   0x4   :  { %564 = vmatprep.mubr.msk.bf16.mxu0 %vm619_vm0, %v618_v1  ;;  %576 = vmatprep.mubr.msk.bf16.mxu1 %vm619_vm0, %v618_v1  ;;  %v524_v10 = vld.sshfl [vmem:[%s731_s0 + $0x2] sm:$0x1 pattern:$0x75316420] }
   0x5   :  { %v525_v11 = vld.sshfl [vmem:[%s731_s0 + $0x3] sm:$0x1 pattern:$0x75316420]  ;;  %v67_v16 = vsub.s32 %v64_v12, %v66_v6 }
   0x6   :  { %559 = vmatpush3.bf16.msra.mxu0 %v587_v3  ;;  %571 = vmatpush3.bf16.msra.mxu1 %v587_v3  ;;  %v526_v14 = vld.sshfl [vmem:[%s731_s0 + $0x4] sm:$0x1 pattern:$0x75316420] }
   0x7   :  { %560 = vmatprep.subr.bf16.mxu0 %v618_v1  ;;  %572 = vmatprep.subr.bf16.mxu1 %v618_v1  ;;  %v527_v15 = vld.sshfl [vmem:[%s731_s0 + $0x5] sm:$0x1 pattern:$0x75316420] }
   0x8   :  { %v528_v17 = vld.sshfl [vmem:[%s731_s0 + $0x6] sm:$0x1 pattern:$0x75316420] }
   0xa   :  { %561 = vmatpush3.bf16.msra.mxu0 %v588_v7  ;;  %573 = vmatpush3.bf16.msra.mxu1 %v588_v7 }
   0xb   :  { %10 = vsyncpa [#allocation3], 0  ;;  %562 = vmatprep.subr.bf16.mxu0 %v618_v1  ;;  %574 = vmatprep.subr.bf16.mxu1 %v618_v1  ;;  %v529_v18 = vld.sshfl [vmem:[%s731_s0 + $0x7] sm:$0x1 pattern:$0x75316420]  ;;  %v68_v19 = vrot.slane %v522_v8, %v67_v16  ;;  %v82_v20 = vrot.slane %v523_v9, %v67_v16  ;;  %v96_v21 = vrot.slane %v524_v10, %v67_v16 }
   0xc   :  { %vm188_vm5 = vcmask 1045509   ;;  %v110_v22 = vrot.slane %v525_v11, %v67_v16  ;;  %v124_v23 = vrot.slane %v526_v14, %v67_v16  ;;  %v138_v24 = vrot.slane %v527_v15, %v67_v16  ;;  %v521_v1 = vld [vmem:[%s733_s2] ss:$0 sm:$0xff]  ;;  %s621_s20 = smov [#allocation2]  }
   0xd   :  { %v152_v25 = vrot.slane %v528_v17, %v67_v16  ;;  %v166_v26 = vrot.slane %v529_v18, %v67_v16  ;;  %v167_v27 = vunpack.c.l.b16 %v68_v19  ;;  %v168_v28 = vunpack.c.l.b16 %v82_v20  ;;  %s510_s21 = sshll.u32 %s621_s20, 4  ;;  %s511_s21 = int_to_ptr.vmem [resolvable:$true] %s510_s21 }
   0xe   :  { %v169_v29 = vunpack.c.l.b16 %v96_v21  ;;  %563 = vmatpush3.bf16.msra.mxu0 %v589_v13  ;;  %575 = vmatpush3.bf16.msra.mxu1 %v589_v13  ;;  %v170_v30 = vunpack.c.l.b16 %v110_v22  ;;  %v171_v31 = vunpack.c.l.b16 %v124_v23  ;;  %v172_v32 = vunpack.c.l.b16 %v138_v24  ;;  %s594_s22 = scalar_lea.vmem %s511_s21, 256  ;;  %p599_p1 = scmp.lt.s32.totalorder %s511_s21, %s511_s21 }
   0xf   :  { %v173_v33 = vunpack.c.l.b16 %v152_v25  ;;  %v174_v34 = vunpack.c.l.b16 %v166_v26  ;;  %v175_v35 = vrot.slane %v168_v28, 7  ;;  %v430_v37 = vrot.slane %v167_v27, 1  ;;  %p595_p0 = scmp.ne.s32.totalorder %s511_s21, %s594_s22  ;;  %p600_p2 = scmp.lt.s32.totalorder %s594_s22, %s594_s22 }
  0x10   :  { %v178_v36 = vrot.slane %v169_v29, 6  ;;  %v181_v38 = vrot.slane %v170_v30, 5  ;;  %v184_v39 = vrot.slane %v171_v31, 4  ;;  %v187_v40 = vrot.slane %v172_v32, 3 }
  0x11   :  { %vm191_vm6 = vcmask 1046534   ;;  %v177_v41 = vsel %vm176_vm1, %v175_v35, %v167_v27  ;;  %v190_v42 = vrot.slane %v173_v33, 2  ;;  %v431_v43 = vsel %vm176_vm1, %v168_v28, %v430_v37  ;;  %p601_p3 = por %p600_p2, %p599_p1 }
  0x12   :  { %v432_v44 = vrot.slane %v169_v29, 7  ;;  %v180_v45 = vsel %vm179_vm2, %v178_v36, %v177_v41  ;;  %v434_v46 = vrot.slane %v170_v30, 6  ;;  %v436_v47 = vrot.slane %v171_v31, 5  ;;  %v535_v31 = vld [vmem:[%s734_s3] ss:$0 sm:$0xff] }
  0x13   :  { %v438_v48 = vrot.slane %v172_v32, 4  ;;  %v183_v49 = vsel %vm182_vm3, %v181_v38, %v180_v45  ;;  %v193_v50 = vrot.slane %v174_v34, 1  ;;  %v440_v52 = vrot.slane %v173_v33, 3  ;;  %v536_v33 = vld [vmem:[%s735_s4] ss:$0 sm:$0xff]  ;;  %p602_p4 = pnand %p601_p3, %p595_p0 }
  0x14   :  { %v433_v51 = vsel %vm179_vm2, %v432_v44, %v431_v43  ;;  %v186_v53 = vsel %vm185_vm4, %v184_v39, %v183_v49  ;;  %vm194_vm7 = vcmask 1047559   ;;  %v442_v55 = vrot.slane %v174_v34, 2 }
  0x15   :  { %v435_v54 = vsel %vm182_vm3, %v434_v46, %v433_v51  ;;  %v189_v56 = vsel %vm188_vm5, %v187_v40, %v186_v53  ;;  %vm221_vm8 = vcmask 523264  }
  0x16   :  { %v437_v57 = vsel %vm185_vm4, %v436_v47, %v435_v54  ;;  %v192_v58 = vsel %vm191_vm6, %v190_v42, %v189_v56 }
  0x17   :  { %v439_v59 = vsel %vm188_vm5, %v438_v48, %v437_v57  ;;  %v195_v60 = vsel %vm194_vm7, %v193_v50, %v192_v58 }
  0x18   :  { %v441_v61 = vsel %vm191_vm6, %v440_v52, %v439_v59  ;;  %v196_v62 = vpack.c.b16 %v195_v60, %v195_v60 }
  0x19   :  { %v443_v63 = vsel %vm194_vm7, %v442_v55, %v441_v61 }
  0x1a   :  { %v444_v0 = vpack.c.b16 %v443_v63, %v443_v63  ;;  %565 = vmatmul.mubr.msk.bf16.vlgmr.msra.gmra.mrb[0].mxu0 %vm221_vm8, %v196_v62 }
  0x1c   :  { %577 = vmatmul.mubr.msk.bf16.vlgmr.msra.gmra.mrb[0].mxu1 %vm221_vm8, %v444_v0 }
  0xed   :  { %v259_v2 = vpop.f32.mrb[0].mxu0 }
  0xee   :  { %v260_v3 = vadd.f32 %v521_v1, %v259_v2  ;;  %v566_v4 = vpop.f32.mrb[1].mxu0 }
  0xef   :  { %v482_v5 = vpop.f32.mrb[0].mxu1  ;;  %v262_v7 = vpop.f32.mrb[2].mxu0 }
  0xf0   :  { %v483_v6 = vadd.f32 %v521_v1, %v482_v5  ;;  %v578_v8 = vpop.f32.mrb[1].mxu1  ;;  %v567_v9 = vpop.f32.mrb[3].mxu0  ;;  %v265_v11 = vsel %vm221_vm8, %v260_v3, 0.0 }
  0xf1   :  { %v485_v10 = vpop.f32.mrb[2].mxu1  ;;  %266 = vadd.xlane.f32.xlu0 %v265_v11 }
  0xf2   :  { %v579_v12 = vpop.f32.mrb[3].mxu1  ;;  %v488_v13 = vsel %vm221_vm8, %v483_v6, 0.0 }
  0xf5   :  { %489 = vadd.xlane.f32.xlu0 %v488_v13 }
 0x17e   :  { %v267_v14 = vpop.xlane.xlu0 %266 }
 0x17f   :  { %v269_v15 = vmul.f32 0.015625, %v267_v14 }
 0x181   :  { %v270_v16 = vsub.f32 %v260_v3, %v269_v15 }
 0x182   :  { %v490_v17 = vpop.xlane.xlu0 %489 }
 0x183   :  { %v491_v18 = vmul.f32 0.015625, %v490_v17  ;;  %v271_v19 = vmul.f32 %v270_v16, %v270_v16 }
 0x185   :  { %v492_v20 = vsub.f32 %v483_v6, %v491_v18  ;;  %v272_v21 = vsel %vm221_vm8, %v271_v19, 0.0 }
 0x186   :  { %273 = vadd.xlane.f32.xlu1 %v272_v21 }
 0x187   :  { %v493_v22 = vmul.f32 %v492_v20, %v492_v20 }
 0x189   :  { %v494_v23 = vsel %vm221_vm8, %v493_v22, 0.0 }
 0x18a   :  { %495 = vadd.xlane.f32.xlu1 %v494_v23 }
 0x213   :  { %v274_v24 = vpop.xlane.xlu1 %273 }
 0x214   :  { %v275_v25 = vmul.f32 0.015625, %v274_v24 }
 0x216   :  { %v276_v26 = vadd.f32 1e-05, %v275_v25 }
 0x217   :  { %v496_v27 = vpop.xlane.xlu1 %495 }
 0x218   :  { %590 = vrsqrt.f32 %v276_v26  ;;  %v497_v28 = vmul.f32 0.015625, %v496_v27 }
 0x21a   :  { %v498_v29 = vadd.f32 1e-05, %v497_v28 }
 0x21c   :  { %592 = vrsqrt.f32 %v498_v29 }
 0x222   :  { %v591_v30 = vpop.eup %590 }
 0x223   :  { %v278_v32 = vmul.f32 %v591_v30, %v270_v16 }
 0x225   :  { %v285_v34 = vmul.f32 %v535_v31, %v278_v32 }
 0x226   :  { %v593_v35 = vpop.eup %592 }
 0x227   :  { %v500_v36 = vmul.f32 %v593_v35, %v492_v20  ;;  %v292_v37 = vadd.f32 %v536_v33, %v285_v34 }
 0x229   :  { %293 = vst.msk [vmem:[#allocation2] sm:$0xff] %vm221_vm8, %v292_v37  ;;  %v501_v38 = vmul.f32 %v535_v31, %v500_v36 }
 0x22b   :  { %v502_v39 = vadd.f32 %v536_v33, %v501_v38 }
 0x22d   :  { %504 = vst.msk [vmem:[#allocation2 + $0x8] sm:$0xff] %vm221_vm8, %v502_v39 }
 0x22e   :  { %605 = shalt.err (!%p602_p4)
}
 0x22f   :  { %s606_s23 = scalar_lea.hbm %s736_s5, 256 }
 0x230   :  { %p607_p5 = scmp.ne.s32.totalorder %s736_s5, %s606_s23  ;;  %p610_p6 = scmp.lt.u32.totalorder %s606_s23, %s736_s5 }
 0x232   :  { %p612_p7 = pnand %p610_p6, %p607_p5 }
 0x234   :  { %615 = shalt.err (!%p612_p7)
}
 0x235   :  { %s622_s28 = smov 128   ;;  %s623_s29 = smov 8  }
 0x236   :  { %516 = dma.vmem_to_hbm [thread:$0]  %s511_s21, 256, %s736_s5, [#allocation3], %s622_s28, %s622_s28, %s623_s29  }
 0x237   :  { %616 = dma.done.wait [#allocation3], 256  }
 0x238   :  { %617 = vsyncadd [#allocation3], 4294967040 }
 0x239   :  { %520 = vsyncpa [#allocation3], 1 }

// kernel: cnn_encoder_forward.4
= control target key start
LH: loop header
LB: loop body
LE: loop exit
PB: predicated region body
PF: predicated region fallthrough
CT: control target
= control target key end

     0   :  { %11 = vsyncpa [#allocation6], 0  ;;  %s4081_s0 = inlined_call_operand.hbm [shape: f32[2,8,16], index: 0, kind: input, shape index: {}]   ;;  %s4082_s1 = inlined_call_operand.hbm [shape: bf16[48,128], index: 1, kind: input, shape index: {}]   ;;  %s4083_s2 = inlined_call_operand.hbm [shape: bf16[640,128], index: 2, kind: input, shape index: {}]   ;;  %s4084_s3 = inlined_call_operand.hbm [shape: bf16[896,128], index: 3, kind: input, shape index: {}]   ;;  %s4085_s4 = inlined_call_operand.hbm [shape: bf16[384,128], index: 4, kind: input, shape index: {}]   ;;  %s4086_s5 = inlined_call_operand.hbm [shape: f32[4,128], index: 5, kind: input, shape index: {}]   ;;  %s4087_s6 = inlined_call_operand.vmem [shape: bf16[2,8,128], index: 6, kind: output, shape index: {}]  }
   0x1   :  { %13 = vsyncpa [#allocation6 + $0x1], 0 }
   0x2   :  { %14 = vsyncpa [#allocation8], 0 }
   0x3   :  { %15 = vsyncpa [#allocation11], 0 }
   0x4   :  { %16 = vsyncpa [#allocation14], 0  ;;  %s3611_s21 = smov 0   ;;  %s3613_s22 = smov 0  }
   0x5   :  { %s3615_s23 = smov 0   ;;  %s3617_s24 = smov 0  }
   0x6 LB: > { %s3566_s25 = smov [#allocation7]   ;;  %s3632_s27 = sadd.s32 4294967295, %s3564_s24   ;;  %s3564_s24 = sphi %s3617_s24, %s4112_s24   ;;  %s3560_s23 = sphi %s3615_s23, %s4111_s23   ;;  %s3556_s22 = sphi %s3613_s22, %s4110_s22   ;;  %s3552_s21 = sphi %s3611_s21, %s4109_s21  }
   0x7   : > { %s196_s26 = sshll.u32 %s3566_s25, 4  ;;  %p2483_p0 = scmp.ge.s32.totalorder %s3564_s24, 1  ;;  %s3637_s26 = int_to_ptr.vmem [resolvable:$true] %s196_s26 }
   0x8   : > { %p4088_p1 = scmp.eq.s32.totalorder %s3632_s27, 0  ;;  %p184_p2 = scmp.lt.s32.totalorder %s3564_s24, 3 }
   0x9   : > { %s3567_s29 = smov [#allocation10]   ;;  %s3568_s8 = smov [#allocation9]  }
   0xa   : > { %p3639_p3 = pnand %p2483_p0, %p184_p2  ;;  %s222_s30 = sshll.u32 %s3567_s29, 4  ;;  %s3651_s30 = int_to_ptr.vmem [resolvable:$true] %s222_s30 }
   0xb   : > { %s209_s9 = sshll.u32 %s3568_s8, 4  ;;  %s3348_s12 = scalar_lea.hbm %s4082_s1, 384  ;;  %s3653_s9 = int_to_ptr.vmem [resolvable:$true] %s209_s9 }
   0xc   : > { %s4090_s28 = scalar_select %p3639_p3, 1, 0 }
   0xd   : > { %p3137_p4 = pneg %p3639_p3  ;;  %p3349_p6 = scmp.ne.s32.totalorder %s4082_s1, %s3348_s12 }
   0xe   : > { %p3355_p10 = scmp.lt.u32.totalorder %s3348_s12, %s4082_s1 }
   0xf   : > { %p3647_p5 = pnand %p3137_p4, %p4088_p1 }
  0x11   : > { %p3663_p7 = pneg %p3647_p5 }
  0x13   : > { %p3351_p8 = pnand %p3663_p7, %p3349_p6 }
  0x15   : > { %p3352_p9 = pneg %p3351_p8 }
  0x17   : > { %p3357_p11 = pnand %p3355_p10, %p3352_p9 }
  0x19   : > { %3360 = shalt.err (!%p3357_p11)
}
  0x1a   : > { %s3361_s18 = scalar_lea.vmem %s3637_s26, 384  ;;  %p3369_p2 = scmp.lt.s32.totalorder %s3637_s26, %s3637_s26 }
  0x1b   : > { %p3362_p12 = scmp.ne.s32.totalorder %s3637_s26, %s3361_s18  ;;  %p3370_p4 = scmp.lt.s32.totalorder %s3361_s18, %s3361_s18 }
  0x1d   : > { %p3364_p13 = pnand %p3362_p12, %p3663_p7  ;;  %p3371_p6 = por %p3370_p4, %p3369_p2 }
  0x1f   : > { %p3365_p0 = pneg %p3364_p13 }
  0x21   : > { %p3372_p8 = pnand %p3371_p6, %p3365_p0 }
  0x23   : > { %3375 = shalt.err (!%p3372_p8)
}
  0x24   : > { %s3569_s19 = smov 64   ;;  %s3570_s20 = smov 4  }
  0x25   : > { %3140 = dma.hbm_to_vmem [thread:$0]  (!%p3647_p5), %s4082_s1, 384, %s3637_s26, [#allocation8], %s3569_s19, %s3569_s19, %s3570_s20  }
  0x26   : > { %s3376_s11 = scalar_lea.hbm %s4084_s3, 7168 }
  0x27   : > { %p3377_p9 = scmp.ne.s32.totalorder %s4084_s3, %s3376_s11  ;;  %p3383_p12 = scmp.lt.u32.totalorder %s3376_s11, %s4084_s3 }
  0x29   : > { %p3379_p10 = pnand %p3377_p9, %p3663_p7 }
  0x2b   : > { %p3380_p11 = pneg %p3379_p10 }
  0x2d   : > { %p3385_p13 = pnand %p3383_p12, %p3380_p11 }
  0x2f   : > { %3388 = shalt.err (!%p3385_p13)
}
  0x30   : > { %s3389_s26 = scalar_lea.vmem %s3651_s30, 7168  ;;  %p3397_p6 = scmp.lt.s32.totalorder %s3651_s30, %s3651_s30 }
  0x31   : > { %p3390_p0 = scmp.ne.s32.totalorder %s3651_s30, %s3389_s26  ;;  %p3398_p8 = scmp.lt.s32.totalorder %s3389_s26, %s3389_s26 }
  0x33   : > { %p3392_p2 = pnand %p3390_p0, %p3663_p7  ;;  %p3399_p9 = por %p3398_p8, %p3397_p6 }
  0x35   : > { %p3393_p4 = pneg %p3392_p2 }
  0x37   : > { %p3400_p10 = pnand %p3399_p9, %p3393_p4 }
  0x39   : > { %3403 = shalt.err (!%p3400_p10)
}
  0x3a   : > { %3146 = dma.hbm_to_vmem [thread:$0]  (!%p3647_p5), %s4084_s3, 7168, %s3651_s30, [#allocation11], %s3569_s19, %s3569_s19, %s3570_s20  }
  0x3b   : > { %s3404_s8 = scalar_lea.hbm %s4083_s2, 5120 }
  0x3c   : > { %p3405_p11 = scmp.ne.s32.totalorder %s4083_s2, %s3404_s8  ;;  %p3411_p0 = scmp.lt.u32.totalorder %s3404_s8, %s4083_s2 }
  0x3e   : > { %p3407_p12 = pnand %p3405_p11, %p3663_p7 }
  0x40   : > { %p3408_p13 = pneg %p3407_p12 }
  0x42   : > { %p3413_p2 = pnand %p3411_p0, %p3408_p13 }
  0x44   : > { %3416 = shalt.err (!%p3413_p2)
}
  0x45   : > { %s3417_s30 = scalar_lea.vmem %s3653_s9, 5120  ;;  %p3425_p9 = scmp.lt.s32.totalorder %s3653_s9, %s3653_s9 }
  0x46   : > { %p3418_p4 = scmp.ne.s32.totalorder %s3653_s9, %s3417_s30  ;;  %p3426_p10 = scmp.lt.s32.totalorder %s3417_s30, %s3417_s30 }
  0x48   : > { %p3420_p6 = pnand %p3418_p4, %p3663_p7  ;;  %p3427_p11 = por %p3426_p10, %p3425_p9 }
  0x4a   : > { %p3421_p8 = pneg %p3420_p6 }
  0x4c   : > { %p3428_p12 = pnand %p3427_p11, %p3421_p8 }
  0x4e   : > { %3431 = shalt.err (!%p3428_p12)
}
  0x4f   : > { %3143 = dma.hbm_to_vmem [thread:$0]  (!%p3647_p5), %s4083_s2, 5120, %s3653_s9, [#allocation8], %s3569_s19, %s3569_s19, %s3570_s20  }
  0x50   : > { %s3571_s26 = smov [#allocation12]   ;;  %s3572_s18 = smov [#allocation13]  }
  0x51   : > { %s235_s17 = sshll.u32 %s3571_s26, 4  ;;  %s249_s25 = sshll.u32 %s3572_s18, 4  ;;  %s236_s17 = int_to_ptr.vmem [resolvable:$true] %s235_s17  ;;  %s250_s25 = int_to_ptr.vmem [resolvable:$true] %s249_s25 }
  0x52   : > { %s3432_s10 = scalar_lea.hbm %s4085_s4, 3072 }
  0x53   : > { %p3433_p13 = scmp.ne.s32.totalorder %s4085_s4, %s3432_s10  ;;  %p3439_p4 = scmp.lt.u32.totalorder %s3432_s10, %s4085_s4 }
  0x55   : > { %p3435_p0 = pnand %p3433_p13, %p3663_p7 }
  0x57   : > { %p3436_p2 = pneg %p3435_p0 }
  0x59   : > { %p3441_p6 = pnand %p3439_p4, %p3436_p2 }
  0x5b   : > { %3444 = shalt.err (!%p3441_p6)
}
  0x5c   : > { %s3445_s9 = scalar_lea.vmem %s236_s17, 3072  ;;  %p3453_p11 = scmp.lt.s32.totalorder %s236_s17, %s236_s17 }
  0x5d   : > { %p3446_p8 = scmp.ne.s32.totalorder %s236_s17, %s3445_s9  ;;  %p3454_p12 = scmp.lt.s32.totalorder %s3445_s9, %s3445_s9 }
  0x5f   : > { %p3448_p9 = pnand %p3446_p8, %p3663_p7  ;;  %p3455_p1 = por %p3454_p12, %p3453_p11 }
  0x61   : > { %p3449_p10 = pneg %p3448_p9 }
  0x63   : > { %p3456_p3 = pnand %p3455_p1, %p3449_p10 }
  0x65   : > { %3459 = shalt.err (!%p3456_p3)
}
  0x66   : > { %3149 = dma.hbm_to_vmem [thread:$0]  (!%p3647_p5), %s4085_s4, 3072, %s236_s17, [#allocation11], %s3569_s19, %s3569_s19, %s3570_s20  }
  0x67   : > { %s3460_s29 = scalar_lea.hbm %s4086_s5, 64 }
  0x68   : > { %p3461_p1 = scmp.ne.s32.totalorder %s4086_s5, %s3460_s29  ;;  %p3467_p0 = scmp.lt.u32.totalorder %s3460_s29, %s4086_s5 }
  0x6a   : > { %p3463_p3 = pnand %p3461_p1, %p3663_p7 }
  0x6c   : > { %p3464_p13 = pneg %p3463_p3 }
  0x6e   : > { %p3469_p2 = pnand %p3467_p0, %p3464_p13 }
  0x70   : > { %3472 = shalt.err (!%p3469_p2)
}
  0x71   : > { %s3473_s13 = scalar_lea.vmem %s250_s25, 64  ;;  %p3481_p9 = scmp.lt.s32.totalorder %s250_s25, %s250_s25 }
  0x72   : > { %p3474_p4 = scmp.ne.s32.totalorder %s250_s25, %s3473_s13  ;;  %p3482_p10 = scmp.lt.s32.totalorder %s3473_s13, %s3473_s13 }
  0x74   : > { %p3476_p6 = pnand %p3474_p4, %p3663_p7  ;;  %p3483_p11 = por %p3482_p10, %p3481_p9 }
  0x76   : > { %p3477_p8 = pneg %p3476_p6 }
  0x78   : > { %p3484_p12 = pnand %p3483_p11, %p3477_p8 }
  0x7a   : > { %3487 = shalt.err (!%p3484_p12)
}
  0x7b   : > { %3152 = dma.hbm_to_vmem [thread:$0]  (!%p3647_p5), %s4086_s5, 64, %s250_s25, [#allocation14]  }
  0x7c   : > { %s3779_s15 = sadd.s32 1, %s3564_s24   ;;  %s29_s17 = sadd.s32 1, %s3560_s23 }
  0x7d   : > { %s26_s7 = ssub.s32 %s3564_s24, %s3779_s15  ;;  %p36_p1 = scmp.ne.s32.totalorder %s3560_s23, %s3556_s22 }
  0x7e   : > { %p27_p7 = scmp.eq.s32.totalorder %s26_s7, 0  ;;  %p37_p3 = scmp.eq.s32.totalorder %s3564_s24, 0 }
  0x7f   : > { %p42_p13 = scmp.ne.s32.totalorder %s3556_s22, %s3552_s21  ;;  %p4093_p2 = scmp.eq.s32.totalorder %s3632_s27, 0 }
  0x80   : > { %s3790_s30 = scalar_select %p27_p7, %s3560_s23, %s29_s17  }
  0x81   : > { %p38_p0 = por %p37_p3, %p36_p1  ;;  %p3794_p4 = por %p4093_p2, %p42_p13 }
  0x82   : > { %p3162_p6 = scmp.lt.s32.totalorder %s3564_s24, 2  ;;  %s260_s14 = sand.u32 1, %s3560_s23  }
  0x83   : > { %s2490_s25 = sshll.u32 %s260_s14, 3  ;;  %s2491_s16 = sshll.u32 %s3564_s24, 7 }
  0x84   : > { %s3804_s29 = scalar_lea.hbm %s4081_s0, %s2491_s16  ;;  %s264_s21 = scalar_lea.vmem [#allocation5], %s2490_s25 }
  0x85   : > { %s271_s8 = sshll.u32 %s264_s21, 4  ;;  %p3808_p5 = pnand %p3162_p6, %p38_p0  ;;  %s3806_s8 = int_to_ptr.vmem [resolvable:$true] %s271_s8 }
  0x86   : > { %s261_s24 = scalar_lea.sflag [#allocation6], %s260_s14  ;;  %s3488_s11 = scalar_lea.hbm %s3804_s29, 128 }
  0x87   : > { %p3489_p8 = scmp.ne.s32.totalorder %s3804_s29, %s3488_s11  ;;  %p3490_p9 = pneg %p3808_p5 }
  0x88   : > { %s3493_s19 = scalar_lea.hbm %s4081_s0, 256  ;;  %p3494_p12 = scmp.lt.u32.totalorder %s3804_s29, %s4081_s0 }
  0x89   : > { %p3491_p10 = pnand %p3490_p9, %p3489_p8  ;;  %p3495_p7 = scmp.lt.u32.totalorder %s3493_s19, %s3488_s11 }
  0x8a   : > { %p3497_p3 = scmp.lt.u32.totalorder %s3488_s11, %s3804_s29 }
  0x8b   : > { %p3492_p11 = pneg %p3491_p10  ;;  %p3496_p1 = por %p3495_p7, %p3494_p12 }
  0x8d   : > { %p3498_p13 = por %p3497_p3, %p3496_p1 }
  0x8f   : > { %p3499_p0 = pnand %p3498_p13, %p3492_p11 }
  0x91   : > { %3502 = shalt.err (!%p3499_p0)
}
  0x92   : > { %s3503_s17 = scalar_lea.vmem %s3806_s8, 128  ;;  %s3573_s14 = smov [#allocation5]  }
  0x93   : > { %p3504_p2 = scmp.ne.s32.totalorder %s3806_s8, %s3503_s17  ;;  %s3508_s25 = sshll.u32 %s3573_s14, 4  ;;  %s3509_s25 = int_to_ptr.vmem [resolvable:$false] %s3508_s25 }
  0x94   : > { %s3510_s16 = scalar_lea.vmem %s3509_s25, 256  ;;  %p3511_p10 = scmp.lt.s32.totalorder %s3806_s8, %s3509_s25 }
  0x95   : > { %p3506_p6 = pnand %p3504_p2, %p3490_p9  ;;  %p3512_p12 = scmp.lt.s32.totalorder %s3510_s16, %s3503_s17 }
  0x97   : > { %p3507_p8 = pneg %p3506_p6  ;;  %p3513_p7 = por %p3512_p12, %p3511_p10 }
  0x99   : > { %p3514_p1 = pnand %p3513_p7, %p3507_p8 }
  0x9b   : > { %3517 = shalt.err (!%p3514_p1)
}
  0x9c   : > { %3156 = dma.hbm_to_vmem [thread:$0]  (!%p3808_p5), %s3804_s29, 128, %s3806_s8, %s261_s24  }
  0x9d   : > { %p4096_p11 = scmp.ne.s32.totalorder %s4090_s28, 0 }
  0x9e   : > { %s282_s26 = sand.u32 (!%p4096_p11), 1, %s3556_s22  }
  0x9f   : > { %280 = sbr.rel (%p4096_p11) target bundleno = 1368 (0x558), region = 44  ;;  %s2493_s18 = sshll.u32 (!%p4096_p11), %s282_s26, 3 }
  0xa0   : > { %s283_s21 = scalar_lea.sflag (!%p4096_p11), [#allocation6], %s282_s26  ;;  %s286_s11 = scalar_lea.vmem (!%p4096_p11), [#allocation5], %s2493_s18 }
  0xa6   : > { %3535 = dma.done.wait (%p3794_p4), %s283_s21, 128  }
  0xa7   : > { %3537 = vsyncadd (%p3794_p4), %s283_s21, 4294967168  ;;  %p4097_p9 = scmp.eq.s32.totalorder %s3632_s27, 0 }
  0xa9   : > { %3539 = dma.done.wait (%p4097_p9), [#allocation8], 5504   ;;  %p4098_p3 = pmov %p4097_p9 }
  0xab   : > { %3541 = vsyncadd (%p4098_p3), [#allocation8], 4294961792  ;;  %p4099_p5 = pmov %p4098_p3 }
  0xac   : > { %p4100_p13 = pmov %p4098_p3 }
  0xad   : > { %3543 = dma.done.wait (%p4099_p5), [#allocation11], 10240  }
  0xae   : > { %3545 = vsyncadd (%p4100_p13), [#allocation11], 4294957056  ;;  %p4101_p0 = pmov %p4098_p3 }
  0xb0   : > { %3547 = dma.done.wait (%p4101_p0), [#allocation14], 64   ;;  %p4102_p2 = pmov %p4101_p0 }
  0xb1   : > { %v3574_v0 = vmov 0.0   ;;  %vm3575_vm0 = vmmov 0   ;;  %vm339_vm1 = vcmask 122880   ;;  %vm340_vm2 = vsmask.f32 256  ;;  %v3209_v2 = vld [vmem:[#allocation7 + $0x8] sm:$0xff]  }
  0xb2   : > { %3549 = vsyncadd (%p4102_p2), [#allocation14], 4294967232  ;;  %2797 = vmatprep.subr.bf16.mxu0 %v3574_v0  ;;  %2799 = vmatprep.mubr.msk.bf16.mxu0 %vm3575_vm0, %v3574_v0  ;;  %vm345_vm3 = vsmask.f32 7938  ;;  %v342_v3 = vld [vmem:[#allocation2] sm:$0x1] }
  0xb3   : > { %2815 = vmatprep.subr.bf16.mxu1 %v3574_v0  ;;  %2831 = vmatprep.mubr.msk.bf16.mxu1 %vm3575_vm0, %v3574_v0  ;;  %vm3862_vm4 = vmand %vm339_vm1, %vm340_vm2  ;;  %v347_v4 = vld [vmem:[#allocation2 + $0x4] sm:$0x1]  ;;  %vm383_vm6 = vcmask 125952   ;;  %vm416_vm8 = vcmask 130048   ;;  %v3211_v25 = vld [vmem:[#allocation7] sm:$0xff]   ;;  %vm350_vm9 = vcmask 1041408  }
  0xb4   : > { %vm346_vm5 = vmand %vm339_vm1, %vm345_vm3  ;;  %v368_v5 = vld [vmem:[%s286_s11] sm:$0xff]  ;;  %2798 = vmatpush3.bf16.msra.mxu0 %v3209_v2  ;;  %v343_v6 = vsel %vm3862_vm4, 0, %v342_v3  ;;  %vm351_vm10 = vsmask.f32 1280  ;;  %v353_v31 = vld [vmem:[#allocation3] sm:$0x3] }
  0xb5   : > { %v348_v7 = vsel %vm346_vm5, 0, %v347_v4  ;;  %v2652_v8 = vpack.c.bf16 %v368_v5, %v368_v5  ;;  %2803 = vmatprep.subr.bf16.mxu0 %v3574_v0  ;;  %344 = vst [vmem:[#allocation2] sm:$0x1] %v343_v6  ;;  %vm384_vm7 = vmand %vm383_vm6, %vm345_vm3  ;;  %v3212_v29 = vld [vmem:[#allocation7 + $0x10] sm:$0xff]   ;;  %v3214_v30 = vld [vmem:[#allocation9 + $0x40] sm:$0xff]   ;;  %vm356_vm12 = vcmask 1042433  }
  0xb6   : > { %349 = vst [vmem:[#allocation2 + $0x4] sm:$0x1] %v348_v7  ;;  %vm3881_vm11 = vmand %vm350_vm9, %vm351_vm10  ;;  %vm357_vm13 = vsmask.f32 7942  ;;  %v359_v33 = vld [vmem:[#allocation3 + $0x4] sm:$0x6]  ;;  %2816 = vmatpush3.bf16.msra.mxu1 %v3214_v30 }
  0xb7   : > { %v374_v9 = vshrl.u32 %v2652_v8, 16  ;;  %v377_v10 = vshll.u32 %v2652_v8, 16  ;;  %v354_v34 = vsel %vm3881_vm11, 0, %v353_v31  ;;  %vm358_vm14 = vmand %vm356_vm12, %vm357_vm13  ;;  %v365_v35 = vld [vmem:[#allocation4 + $0x4] sm:$0x6]  ;;  %2817 = vmatprep.subr.bf16.mxu1 %v3574_v0  ;;  %v3215_v38 = vld [vmem:[#allocation9 + $0x48] sm:$0xff]  }
  0xb8   : > { %355 = vst [vmem:[#allocation3] sm:$0x3] %v354_v34  ;;  %v360_v36 = vsel %vm358_vm14, 0, %v359_v33  ;;  %v366_v37 = vsel %vm358_vm14, 0, %v365_v35  ;;  %v3216_v39 = vld [vmem:[#allocation9] sm:$0xff]   ;;  %v3217_v40 = vld [vmem:[#allocation9 + $0x50] sm:$0xff]  }
  0xb9   : > { %v376_v11 = vrot.slane %v374_v9, 7  ;;  %361 = vst [vmem:[#allocation3 + $0x4] sm:$0x6] %v360_v36  ;;  %367 = vst [vmem:[#allocation4 + $0x4] sm:$0x6] %v366_v37  ;;  %v3218_v41 = vld [vmem:[#allocation9 + $0x8] sm:$0xff]  }
  0xba   : > { %2818 = vmatpush3.bf16.msra.mxu1 %v3215_v38  ;;  %v3219_v42 = vld [vmem:[#allocation9 + $0x58] sm:$0xff]   ;;  %v3220_v43 = vld [vmem:[#allocation9 + $0x10] sm:$0xff]   ;;  %v3221_v44 = vld [vmem:[#allocation9 + $0x60] sm:$0xff]   ;;  %vm587_vm15 = vcmask 1043457   ;;  %p334_p4 = scmp.lt.s32.totalorder %s3632_s27, 1 }
  0xbb   : > { %v379_v12 = vor.u32 %v377_v10, %v376_v11  ;;  %v380_v13 = vrot.slane %v376_v11, 4  ;;  %2819 = vmatprep.subr.bf16.mxu1 %v3574_v0  ;;  %v3222_v45 = vld [vmem:[#allocation9 + $0x18] sm:$0xff]   ;;  %v3223_v46 = vld [vmem:[#allocation9 + $0x68] sm:$0xff]   ;;  %v3224_v47 = vld [vmem:[#allocation9 + $0x20] sm:$0xff]  }
  0xbc   : > { %v385_v14 = vld [vmem:[#allocation2] sm:$0xf]  ;;  %v3225_v48 = vld [vmem:[#allocation9 + $0x70] sm:$0xff]   ;;  %v3226_v49 = vld [vmem:[#allocation9 + $0x28] sm:$0xff]   ;;  %s4114_s27 = smov (!%p334_p4, %s3632_s27), 1 }
  0xbd   : > { %v388_v15 = vld [vmem:[#allocation2 + $0x4] sm:$0x1]  ;;  %v386_v16 = vsel %vm384_vm7, %v379_v12, %v385_v14  ;;  %v3227_v50 = vld [vmem:[#allocation9 + $0x78] sm:$0xff]   ;;  %v3228_v51 = vld [vmem:[#allocation9 + $0x30] sm:$0xff]   ;;  %s2499_s28 = sshll.u32 %s4114_s27, 2 }
  0xbe   : > { %v389_v17 = vsel %vm3862_vm4, %v380_v13, %v388_v15  ;;  %387 = vst [vmem:[#allocation2] sm:$0xf] %v386_v16  ;;  %2820 = vmatpush3.bf16.msra.mxu1 %v3217_v40  ;;  %v3232_v52 = vld [vmem:[#allocation9 + $0x38] sm:$0xff]   ;;  %v2509_v62 = vld [vmem:[#allocation13] ss:$0 sm:$0xff]  ;;  %vm3905_vm1 = vmand %vm587_vm15, %vm357_vm13  ;;  %s337_s8 = scalar_lea.vmem %s4087_s6, %s2499_s28 }
  0xbf   : > { %390 = vst [vmem:[#allocation2 + $0x4] sm:$0x1] %v389_v17  ;;  %2821 = vmatprep.subr.bf16.mxu1 %v3574_v0  ;;  %v589_v13 = vld [vmem:[#allocation3] sm:$0xe]  ;;  %v3235_v30 = vld [vmem:[#allocation9 + $0xc0] sm:$0xff]   ;;  %v3236_v33 = vld [vmem:[#allocation9 + $0x90] sm:$0xff]  }
  0xc0   : > { %v592_v15 = vld [vmem:[#allocation3 + $0x4] sm:$0x3]  ;;  %v3238_v35 = vld [vmem:[#allocation9 + $0x98] sm:$0xff]   ;;  %v3239_v36 = vld [vmem:[#allocation9 + $0xd0] sm:$0xff]  }
  0xc1   : > { %v3237_v34 = vld [vmem:[#allocation9 + $0xc8] sm:$0xff]   ;;  %v3240_v37 = vld [vmem:[#allocation9 + $0xa0] sm:$0xff]   ;;  %v3241_v38 = vld [vmem:[#allocation9 + $0xd8] sm:$0xff]  }
  0xc2   : > { %2822 = vmatpush3.bf16.msra.mxu1 %v3219_v42  ;;  %v3242_v40 = vld [vmem:[#allocation9 + $0xa8] sm:$0xff]   ;;  %v3341_v32 = vld [vmem:[#allocation12 + $0x90] sm:$0xff]  }
  0xc3   : > { %2823 = vmatprep.subr.bf16.mxu1 %v3574_v0 }
  0xc5   : > { %v392_v18 = vld [vmem:[#allocation2] sm:$0xf] }
  0xc6   : > { %v395_v19 = vld [vmem:[#allocation2 + $0x4] sm:$0x1]  ;;  %v509_v20 = vld [vmem:[#allocation2] sm:$0xe]  ;;  %2824 = vmatpush3.bf16.msra.mxu1 %v3221_v44  ;;  %v3245_v44 = vld [vmem:[#allocation9 + $0xe8] sm:$0xff]  }
  0xc7   : > { %v2501_v21 = vcombine.low %v392_v18, %v395_v19  ;;  %v2506_v22 = vcombine.low %v509_v20, %v395_v19  ;;  %2825 = vmatprep.subr.bf16.mxu1 %v3574_v0 }
  0xc9   : > { %v404_v23 = vshrl.u32 %v2501_v21, 16  ;;  %v406_v24 = vshll.u32 %v2501_v21, 16  ;;  %v515_v27 = vrot.slane %v2506_v22, 1 }
  0xca   : > { %2826 = vmatpush3.bf16.msra.mxu1 %v3223_v46 }
  0xcb   : > { %v408_v26 = vrot.slane %v406_v24, 1  ;;  %2827 = vmatprep.subr.bf16.mxu1 %v3574_v0  ;;  %v3233_v24 = vld [vmem:[#allocation9 + $0x80] sm:$0xff]  }
  0xcd   : > { %v409_v28 = vor.u32 %v408_v26, %v404_v23 }
  0xce   : > { %2828 = vmatpush3.bf16.msra.mxu1 %v3225_v48  ;;  %v3247_v48 = vld [vmem:[#allocation9 + $0xf0] sm:$0xff]  }
  0xcf   : > { %2800 = vmatmul.mubr.msk.bf16.vlgmr.msra.gmra.mrb[0].mxu0 %vm416_vm8, %v409_v28  ;;  %2829 = vmatprep.subr.bf16.mxu1 %v3574_v0 }
  0xd0   : > { %2804 = vmatpush3.bf16.msra.mxu0 %v3211_v25  ;;  %2805 = vmatprep.mubr.msk.bf16.mxu0 %vm3575_vm0, %v3574_v0 }
  0xd1   : > { %2809 = vmatprep.subr.bf16.mxu0 %v3574_v0 }
  0xd2   : > { %2830 = vmatpush3.bf16.msra.mxu1 %v3227_v50 }
  0xd3   : > { %2855 = vmatprep.subr.bf16.mxu1 %v3574_v0 }
  0xd7   : > { %2806 = vmatmul.mubr.msk.bf16.vlgmr.msra.gmra.mrb[4].mxu0 %vm416_vm8, %v392_v18 }
  0xd8   : > { %2810 = vmatpush3.bf16.msra.mxu0 %v3212_v29  ;;  %2811 = vmatprep.mubr.msk.bf16.mxu0 %vm3575_vm0, %v3574_v0  ;;  %v3234_v29 = vld [vmem:[#allocation9 + $0x88] sm:$0xff]  }
  0xd9   : > { %2835 = vmatprep.subr.bf16.mxu0 %v3574_v0 }
  0xdf   : > { %2812 = vmatmul.mubr.msk.bf16.vlgmr.msra.gmra.mrb[8].mxu0 %vm416_vm8, %v515_v27 }
  0xe0   : > { %2851 = vmatprep.mubr.msk.bf16.mxu0 %vm3575_vm0, %v3574_v0  ;;  %2836 = vmatpush3.bf16.msra.mxu0 %v3216_v39 }
  0xe1   : > { %2837 = vmatprep.subr.bf16.mxu0 %v3574_v0 }
  0xe4   : > { %2838 = vmatpush3.bf16.msra.mxu0 %v3218_v41  ;;  %v3243_v41 = vld [vmem:[#allocation9 + $0xe0] sm:$0xff]  }
  0xe5   : > { %2839 = vmatprep.subr.bf16.mxu0 %v3574_v0 }
  0xe8   : > { %2840 = vmatpush3.bf16.msra.mxu0 %v3220_v43  ;;  %v3244_v43 = vld [vmem:[#allocation9 + $0xb0] sm:$0xff]  }
  0xe9   : > { %2841 = vmatprep.subr.bf16.mxu0 %v3574_v0 }
  0xec   : > { %2842 = vmatpush3.bf16.msra.mxu0 %v3222_v45 }
  0xed   : > { %2843 = vmatprep.subr.bf16.mxu0 %v3574_v0 }
  0xf0   : > { %2844 = vmatpush3.bf16.msra.mxu0 %v3224_v47  ;;  %v3246_v47 = vld [vmem:[#allocation9 + $0xb8] sm:$0xff]  }
  0xf1   : > { %2845 = vmatprep.subr.bf16.mxu0 %v3574_v0 }
  0xf4   : > { %2846 = vmatpush3.bf16.msra.mxu0 %v3226_v49 }
  0xf5   : > { %2847 = vmatprep.subr.bf16.mxu0 %v3574_v0 }
  0xf8   : > { %2848 = vmatpush3.bf16.msra.mxu0 %v3228_v51  ;;  %v3248_v51 = vld [vmem:[#allocation9 + $0xf8] sm:$0xff]  }
  0xf9   : > { %2849 = vmatprep.subr.bf16.mxu0 %v3574_v0 }
  0xfc   : > { %2850 = vmatpush3.bf16.msra.mxu0 %v3232_v52  ;;  %v3249_v52 = vld [vmem:[#allocation9 + $0x100] sm:$0xff]  }
  0xfd   : > { %2875 = vmatprep.subr.bf16.mxu0 %v3574_v0 }
 0x1a2   : > { %v454_v53 = vpop.f32.mrb[0].mxu0 }
 0x1a3   : > { %v2801_v54 = vpop.f32.mrb[1].mxu0 }
 0x1a4   : > { %v457_v55 = vpop.f32.mrb[2].mxu0 }
 0x1a5   : > { %v2802_v56 = vpop.f32.mrb[3].mxu0 }
 0x1a6   : > { %v3251_v56 = vld [vmem:[#allocation9 + $0x108] sm:$0xff]  }
 0x1aa   : > { %v503_v57 = vpop.f32.mrb[4].mxu0 }
 0x1ab   : > { %v504_v58 = vadd.f32 %v503_v57, %v454_v53  ;;  %v2807_v59 = vpop.f32.mrb[5].mxu0 }
 0x1ac   : > { %v506_v60 = vpop.f32.mrb[6].mxu0  ;;  %v3253_v59 = vld [vmem:[#allocation9 + $0x118] sm:$0xff]  }
 0x1ad   : > { %v2808_v61 = vpop.f32.mrb[7].mxu0  ;;  %v3254_v60 = vld [vmem:[#allocation9 + $0x120] sm:$0xff]  }
 0x1b2   : > { %v559_v63 = vpop.f32.mrb[8].mxu0 }
 0x1b3   : > { %v565_v1 = vadd.f32 %v559_v63, %v504_v58  ;;  %v2813_v2 = vpop.f32.mrb[9].mxu0  ;;  %v3252_v58 = vld [vmem:[#allocation9 + $0x110] sm:$0xff]  }
 0x1b4   : > { %v562_v3 = vpop.f32.mrb[10].mxu0 }
 0x1b5   : > { %v570_v4 = vadd.f32 %v2509_v62, %v565_v1  ;;  %v2814_v5 = vpop.f32.mrb[11].mxu0  ;;  %v3255_v62 = vld [vmem:[#allocation9 + $0x128] sm:$0xff]   ;;  %v3256_v1 = vld [vmem:[#allocation9 + $0x130] sm:$0xff]  }
 0x1b7   : > { %v571_v6 = vmax.f32 %v570_v4, 0.0  ;;  %v3257_v4 = vld [vmem:[#allocation9 + $0x138] sm:$0xff]  }
 0x1b9   : > { %v2653_v7 = vpack.c.bf16 %v571_v6, %v571_v6 }
 0x1bb   : > { %v577_v8 = vshrl.u32 %v2653_v7, 16  ;;  %v580_v9 = vshll.u32 %v2653_v7, 16 }
 0x1bd   : > { %v579_v10 = vrot.slane %v577_v8, 6  ;;  %v582_v11 = vrot.slane %v580_v9, 7  ;;  %v3259_v8 = vld [vmem:[#allocation10] sm:$0xff]   ;;  %v362_v9 = vld [vmem:[#allocation4] sm:$0x3] }
 0x1bf   : > { %v583_v14 = vor.u32 %v582_v11, %v579_v10  ;;  %v363_v10 = vsel %vm3881_vm11, 0, %v362_v9  ;;  %v3260_v11 = vld [vmem:[#allocation10 + $0x8] sm:$0xff]   ;;  %v3280_v9 = vld [vmem:[#allocation10 + $0xd0] sm:$0xff]  }
 0x1c0   : > { %364 = vst [vmem:[#allocation4] sm:$0x3] %v363_v10 }
 0x1c1   : > { %v584_v16 = vrot.slane %v583_v14, 4  ;;  %v590_v17 = vsel %vm3905_vm1, %v583_v14, %v589_v13  ;;  %v3261_v13 = vld [vmem:[#allocation10 + $0x10] sm:$0xff]   ;;  %v3262_v14 = vld [vmem:[#allocation10 + $0x40] sm:$0xff]  }
 0x1c2   : > { %591 = vst [vmem:[#allocation3] sm:$0xe] %v590_v17  ;;  %v3265_v17 = vld [vmem:[#allocation10 + $0x20] sm:$0xff]  }
 0x1c3   : > { %v593_v18 = vsel %vm3881_vm11, %v584_v16, %v592_v15  ;;  %v3263_v15 = vld [vmem:[#allocation10 + $0x18] sm:$0xff]   ;;  %v3264_v16 = vld [vmem:[#allocation10 + $0x48] sm:$0xff]  }
 0x1c4   : > { %594 = vst [vmem:[#allocation3 + $0x4] sm:$0x3] %v593_v18  ;;  %v3266_v18 = vld [vmem:[#allocation10 + $0x50] sm:$0xff]  }
 0x1c9   : > { %v596_v19 = vld [vmem:[#allocation3] sm:$0xf] }
 0x1ca   : > { %v614_v21 = vld [vmem:[#allocation3] sm:$0xe] }
 0x1cb   : > { %v597_v20 = vld [vmem:[#allocation3 + $0x4] sm:$0x1]  ;;  %v943_v53 = vld [vmem:[#allocation3] sm:$0xc] }
 0x1cc   : > { %v2511_v22 = vcombine.low %v614_v21, %v597_v20  ;;  %v2520_v23 = vcombine.low %v596_v19, %v597_v20  ;;  %v825_v39 = vld [vmem:[#allocation3 + $0x4] sm:$0x3]  ;;  %v3268_v20 = vld [vmem:[#allocation10 + $0x58] sm:$0xff]  }
 0x1cd   : > { %v2529_v42 = vcombine.low %v614_v21, %v825_v39  ;;  %v2538_v55 = vcombine.low %v943_v53, %v825_v39  ;;  %v1054_v61 = vld [vmem:[#allocation3 + $0x4] sm:$0x7]  ;;  %v3269_v21 = vld [vmem:[#allocation10 + $0x30] sm:$0xff]  }
 0x1ce   : > { %v636_v25 = vrot.slane %v2511_v22, 1  ;;  %v732_v26 = vshll.u32 %v2520_v23, 16  ;;  %v730_v27 = vshrl.u32 %v2520_v23, 16  ;;  %v2547_v63 = vcombine.low %v943_v53, %v1054_v61  ;;  %v3267_v19 = vld [vmem:[#allocation10 + $0x28] sm:$0xff]   ;;  %v3270_v22 = vld [vmem:[#allocation10 + $0x60] sm:$0xff]   ;;  %v3271_v23 = vld [vmem:[#allocation10 + $0x38] sm:$0xff]  }
 0x1cf   : > { %v846_v45 = vshrl.u32 %v2529_v42, 16  ;;  %v849_v46 = vshll.u32 %v2529_v42, 16  ;;  %v963_v57 = vrot.slane %v2538_v55, 2 }
 0x1d0   : > { %2832 = vmatmul.mubr.bf16.vlgmr.msra.gmra.mrb[0].mxu1 %v636_v25  ;;  %v734_v28 = vrot.slane %v732_v26, 1  ;;  %v1075_v2 = vshrl.u32 %v2547_v63, 16  ;;  %v1078_v3 = vshll.u32 %v2547_v63, 16  ;;  %v3277_v25 = vld [vmem:[#allocation10 + $0x70] sm:$0xff]   ;;  %v3279_v26 = vld [vmem:[#allocation10 + $0x78] sm:$0xff]  }
 0x1d1   : > { %2856 = vmatpush3.bf16.msra.mxu1 %v3233_v24  ;;  %2871 = vmatprep.mubr.msk.bf16.mxu1 %vm3575_vm0, %v3574_v0  ;;  %v848_v49 = vrot.slane %v846_v45, 1  ;;  %v851_v50 = vrot.slane %v849_v46, 2  ;;  %v3272_v24 = vld [vmem:[#allocation10 + $0x68] sm:$0xff]  }
 0x1d2   : > { %2857 = vmatprep.subr.bf16.mxu1 %v3574_v0  ;;  %v735_v31 = vor.u32 %v734_v28, %v730_v27  ;;  %v1077_v5 = vrot.slane %v1075_v2, 2  ;;  %v1080_v6 = vrot.slane %v1078_v3, 3  ;;  %v3276_v3 = vld [vmem:[#allocation10 + $0xc0] sm:$0xff]  }
 0x1d3   : > { %v852_v54 = vor.u32 %v851_v50, %v848_v49 }
 0x1d4   : > { %2852 = vmatmul.mubr.bf16.vlgmr.msra.gmra.mrb[12].mxu0 %v735_v31  ;;  %v1081_v7 = vor.u32 %v1080_v6, %v1077_v5  ;;  %v3278_v6 = vld [vmem:[#allocation10 + $0xc8] sm:$0xff]  }
 0x1d5   : > { %2858 = vmatpush3.bf16.msra.mxu1 %v3234_v29  ;;  %2876 = vmatpush3.bf16.msra.mxu0 %v3235_v30 }
 0x1d6   : > { %2859 = vmatprep.subr.bf16.mxu1 %v3574_v0  ;;  %2877 = vmatprep.subr.bf16.mxu0 %v3574_v0 }
 0x1d7   : > { %2891 = vmatprep.mubr.msk.bf16.mxu0 %vm3575_vm0, %v3574_v0 }
 0x1d9   : > { %2860 = vmatpush3.bf16.msra.mxu1 %v3236_v33  ;;  %2878 = vmatpush3.bf16.msra.mxu0 %v3237_v34 }
 0x1da   : > { %2861 = vmatprep.subr.bf16.mxu1 %v3574_v0  ;;  %2879 = vmatprep.subr.bf16.mxu0 %v3574_v0 }
 0x1dd   : > { %2862 = vmatpush3.bf16.msra.mxu1 %v3238_v35  ;;  %2880 = vmatpush3.bf16.msra.mxu0 %v3239_v36 }
 0x1de   : > { %2863 = vmatprep.subr.bf16.mxu1 %v3574_v0  ;;  %2881 = vmatprep.subr.bf16.mxu0 %v3574_v0 }
 0x1e1   : > { %2864 = vmatpush3.bf16.msra.mxu1 %v3240_v37  ;;  %2882 = vmatpush3.bf16.msra.mxu0 %v3241_v38 }
 0x1e2   : > { %2865 = vmatprep.subr.bf16.mxu1 %v3574_v0  ;;  %2883 = vmatprep.subr.bf16.mxu0 %v3574_v0 }
 0x1e5   : > { %2866 = vmatpush3.bf16.msra.mxu1 %v3242_v40  ;;  %2884 = vmatpush3.bf16.msra.mxu0 %v3243_v41 }
 0x1e6   : > { %2867 = vmatprep.subr.bf16.mxu1 %v3574_v0  ;;  %2885 = vmatprep.subr.bf16.mxu0 %v3574_v0 }
 0x1e9   : > { %2868 = vmatpush3.bf16.msra.mxu1 %v3244_v43  ;;  %2886 = vmatpush3.bf16.msra.mxu0 %v3245_v44 }
 0x1ea   : > { %2869 = vmatprep.subr.bf16.mxu1 %v3574_v0  ;;  %2887 = vmatprep.subr.bf16.mxu0 %v3574_v0 }
 0x1ed   : > { %2870 = vmatpush3.bf16.msra.mxu1 %v3246_v47  ;;  %2888 = vmatpush3.bf16.msra.mxu0 %v3247_v48  ;;  %v2556_v47 = vld [vmem:[#allocation13 + $0x1] ss:$0 sm:$0xff] }
 0x1ee   : > { %2889 = vmatprep.subr.bf16.mxu0 %v3574_v0  ;;  %2895 = vmatprep.subr.bf16.mxu1 %v3574_v0 }
 0x1f0   : > { %2872 = vmatmul.mubr.bf16.vlgmr.msra.gmra.mrb[4].mxu1 %v852_v54 }
 0x1f1   : > { %2890 = vmatpush3.bf16.msra.mxu0 %v3248_v51  ;;  %2896 = vmatpush3.bf16.msra.mxu1 %v3249_v52 }
 0x1f2   : > { %2897 = vmatprep.subr.bf16.mxu1 %v3574_v0  ;;  %2911 = vmatprep.mubr.msk.bf16.mxu1 %vm3575_vm0, %v3574_v0 }
 0x1f3   : > { %2915 = vmatprep.subr.bf16.mxu0 %v3574_v0 }
 0x1f4   : > { %2892 = vmatmul.mubr.bf16.vlgmr.msra.gmra.mrb[16].mxu0 %v963_v57 }
 0x1f5   : > { %2898 = vmatpush3.bf16.msra.mxu1 %v3251_v56  ;;  %2931 = vmatprep.mubr.msk.bf16.mxu0 %vm3575_vm0, %v3574_v0 }
 0x1f6   : > { %2899 = vmatprep.subr.bf16.mxu1 %v3574_v0  ;;  %2916 = vmatpush3.bf16.msra.mxu0 %v3262_v14 }
 0x1f7   : > { %2917 = vmatprep.subr.bf16.mxu0 %v3574_v0 }
 0x1f9   : > { %2900 = vmatpush3.bf16.msra.mxu1 %v3252_v58 }
 0x1fa   : > { %2901 = vmatprep.subr.bf16.mxu1 %v3574_v0  ;;  %2918 = vmatpush3.bf16.msra.mxu0 %v3264_v16  ;;  %v3283_v16 = vld [vmem:[#allocation10 + $0x88] sm:$0xff]  }
 0x1fb   : > { %2919 = vmatprep.subr.bf16.mxu0 %v3574_v0 }
 0x1fd   : > { %2902 = vmatpush3.bf16.msra.mxu1 %v3253_v59 }
 0x1fe   : > { %2903 = vmatprep.subr.bf16.mxu1 %v3574_v0  ;;  %2920 = vmatpush3.bf16.msra.mxu0 %v3266_v18 }
 0x1ff   : > { %2921 = vmatprep.subr.bf16.mxu0 %v3574_v0 }
 0x201   : > { %2904 = vmatpush3.bf16.msra.mxu1 %v3254_v60  ;;  %v1193_v60 = vld [vmem:[#allocation4] sm:$0xe] }
 0x202   : > { %2905 = vmatprep.subr.bf16.mxu1 %v3574_v0  ;;  %2922 = vmatpush3.bf16.msra.mxu0 %v3268_v20 }
 0x203   : > { %2923 = vmatprep.subr.bf16.mxu0 %v3574_v0 }
 0x205   : > { %2906 = vmatpush3.bf16.msra.mxu1 %v3255_v62  ;;  %v1196_v62 = vld [vmem:[#allocation4 + $0x4] sm:$0x3] }
 0x206   : > { %2907 = vmatprep.subr.bf16.mxu1 %v3574_v0  ;;  %2924 = vmatpush3.bf16.msra.mxu0 %v3270_v22 }
 0x207   : > { %2925 = vmatprep.subr.bf16.mxu0 %v3574_v0 }
 0x209   : > { %2908 = vmatpush3.bf16.msra.mxu1 %v3256_v1 }
 0x20a   : > { %2909 = vmatprep.subr.bf16.mxu1 %v3574_v0  ;;  %2926 = vmatpush3.bf16.msra.mxu0 %v3272_v24  ;;  %v3288_v24 = vld [vmem:[#allocation10 + $0xf0] sm:$0xff]  }
 0x20b   : > { %2927 = vmatprep.subr.bf16.mxu0 %v3574_v0 }
 0x20d   : > { %2910 = vmatpush3.bf16.msra.mxu1 %v3257_v4 }
 0x20e   : > { %2935 = vmatprep.subr.bf16.mxu1 %v3574_v0  ;;  %2928 = vmatpush3.bf16.msra.mxu0 %v3277_v25 }
 0x20f   : > { %2929 = vmatprep.subr.bf16.mxu0 %v3574_v0 }
 0x210   : > { %2912 = vmatmul.mubr.bf16.vlgmr.msra.gmra.mrb[8].mxu1 %v1081_v7 }
 0x211   : > { %2951 = vmatprep.mubr.msk.bf16.mxu1 %vm3575_vm0, %v3574_v0  ;;  %2936 = vmatpush3.bf16.msra.mxu1 %v3259_v8 }
 0x212   : > { %2937 = vmatprep.subr.bf16.mxu1 %v3574_v0  ;;  %2930 = vmatpush3.bf16.msra.mxu0 %v3279_v26 }
 0x213   : > { %2955 = vmatprep.subr.bf16.mxu0 %v3574_v0 }
 0x215   : > { %2938 = vmatpush3.bf16.msra.mxu1 %v3260_v11 }
 0x216   : > { %2939 = vmatprep.subr.bf16.mxu1 %v3574_v0 }
 0x219   : > { %2940 = vmatpush3.bf16.msra.mxu1 %v3261_v13  ;;  %v3281_v13 = vld [vmem:[#allocation10 + $0x80] sm:$0xff]  }
 0x21a   : > { %2941 = vmatprep.subr.bf16.mxu1 %v3574_v0 }
 0x21d   : > { %2942 = vmatpush3.bf16.msra.mxu1 %v3263_v15  ;;  %v3282_v15 = vld [vmem:[#allocation10 + $0xd8] sm:$0xff]  }
 0x21e   : > { %2943 = vmatprep.subr.bf16.mxu1 %v3574_v0 }
 0x221   : > { %2944 = vmatpush3.bf16.msra.mxu1 %v3265_v17  ;;  %v3284_v17 = vld [vmem:[#allocation10 + $0xe0] sm:$0xff]  }
 0x222   : > { %2945 = vmatprep.subr.bf16.mxu1 %v3574_v0 }
 0x225   : > { %2946 = vmatpush3.bf16.msra.mxu1 %v3267_v19  ;;  %v3285_v19 = vld [vmem:[#allocation10 + $0x90] sm:$0xff]  }
 0x226   : > { %2947 = vmatprep.subr.bf16.mxu1 %v3574_v0 }
 0x229   : > { %2948 = vmatpush3.bf16.msra.mxu1 %v3269_v21  ;;  %v3286_v21 = vld [vmem:[#allocation10 + $0xe8] sm:$0xff]  }
 0x22a   : > { %2949 = vmatprep.subr.bf16.mxu1 %v3574_v0 }
 0x22d   : > { %2950 = vmatpush3.bf16.msra.mxu1 %v3271_v23  ;;  %v3287_v23 = vld [vmem:[#allocation10 + $0x98] sm:$0xff]  }
 0x22e   : > { %2975 = vmatprep.subr.bf16.mxu1 %v3574_v0 }
 0x2a3   : > { %v720_v27 = vpop.f32.mrb[0].mxu1 }
 0x2a4   : > { %v2833_v28 = vpop.f32.mrb[1].mxu1 }
 0x2a5   : > { %v723_v29 = vpop.f32.mrb[2].mxu1  ;;  %v3290_v28 = vld [vmem:[#allocation10 + $0xf8] sm:$0xff]  }
 0x2a6   : > { %v2834_v30 = vpop.f32.mrb[3].mxu1 }
 0x2a7   : > { %v819_v31 = vpop.f32.mrb[12].mxu0 }
 0x2a8   : > { %v820_v33 = vadd.f32 %v819_v31, %v720_v27  ;;  %v2853_v34 = vpop.f32.mrb[13].mxu0  ;;  %v3289_v27 = vld [vmem:[#allocation10 + $0xa0] sm:$0xff]   ;;  %v3291_v31 = vld [vmem:[#allocation10 + $0xa8] sm:$0xff]  }
 0x2a9   : > { %v822_v35 = vpop.f32.mrb[14].mxu0 }
 0x2aa   : > { %v2854_v36 = vpop.f32.mrb[15].mxu0  ;;  %v3293_v35 = vld [vmem:[#allocation10 + $0xb0] sm:$0xff]  }
 0x2ab   : > { %v3294_v36 = vld [vmem:[#allocation10 + $0x148] sm:$0xff]  }
 0x2c3   : > { %v936_v37 = vpop.f32.mrb[4].mxu1 }
 0x2c4   : > { %v942_v38 = vadd.f32 %v936_v37, %v820_v33  ;;  %v2873_v39 = vpop.f32.mrb[5].mxu1  ;;  %v3292_v33 = vld [vmem:[#allocation10 + $0x140] sm:$0xff]   ;;  %v3295_v37 = vld [vmem:[#allocation10 + $0xb8] sm:$0xff]  }
 0x2c5   : > { %v939_v40 = vpop.f32.mrb[6].mxu1  ;;  %v3296_v39 = vld [vmem:[#allocation10 + $0x150] sm:$0xff]  }
 0x2c6   : > { %v2874_v41 = vpop.f32.mrb[7].mxu1  ;;  %v3297_v40 = vld [vmem:[#allocation10 + $0x100] sm:$0xff]  }
 0x2c7   : > { %v1047_v42 = vpop.f32.mrb[16].mxu0 }
 0x2c8   : > { %v1053_v43 = vadd.f32 %v1047_v42, %v942_v38  ;;  %v2893_v44 = vpop.f32.mrb[17].mxu0  ;;  %v3298_v42 = vld [vmem:[#allocation10 + $0x158] sm:$0xff]  }
 0x2c9   : > { %v1050_v45 = vpop.f32.mrb[18].mxu0  ;;  %v3300_v44 = vld [vmem:[#allocation10 + $0x160] sm:$0xff]  }
 0x2ca   : > { %v2894_v46 = vpop.f32.mrb[19].mxu0  ;;  %v3301_v45 = vld [vmem:[#allocation10 + $0x110] sm:$0xff]  }
 0x2e3   : > { %v1165_v48 = vpop.f32.mrb[8].mxu1 }
 0x2e4   : > { %v1171_v49 = vadd.f32 %v1165_v48, %v1053_v43  ;;  %v2913_v50 = vpop.f32.mrb[9].mxu1  ;;  %v3299_v43 = vld [vmem:[#allocation10 + $0x108] sm:$0xff]  }
 0x2e5   : > { %v1168_v51 = vpop.f32.mrb[10].mxu1  ;;  %v3303_v50 = vld [vmem:[#allocation10 + $0x118] sm:$0xff]  }
 0x2e6   : > { %v1176_v52 = vadd.f32 %v2556_v47, %v1171_v49  ;;  %v2914_v53 = vpop.f32.mrb[11].mxu1  ;;  %v3302_v47 = vld [vmem:[#allocation10 + $0x168] sm:$0xff]   ;;  %v3304_v51 = vld [vmem:[#allocation10 + $0x170] sm:$0xff]  }
 0x2e8   : > { %v1177_v54 = vmax.f32 %v1176_v52, 0.0 }
 0x2ea   : > { %v2654_v55 = vpack.c.bf16 %v1177_v54, %v1177_v54  ;;  %v3305_v54 = vld [vmem:[#allocation10 + $0x120] sm:$0xff]  }
 0x2ec   : > { %v1183_v56 = vshrl.u32 %v2654_v55, 16  ;;  %v1186_v57 = vshll.u32 %v2654_v55, 16  ;;  %v3306_v55 = vld [vmem:[#allocation10 + $0x178] sm:$0xff]  }
 0x2ee   : > { %v1185_v58 = vrot.slane %v1183_v56, 6  ;;  %v1188_v59 = vrot.slane %v1186_v57, 7 }
 0x2f0   : > { %v1189_v61 = vor.u32 %v1188_v59, %v1185_v58  ;;  %v3307_v58 = vld [vmem:[#allocation10 + $0x128] sm:$0xff]  }
 0x2f2   : > { %v1190_v63 = vrot.slane %v1189_v61, 4  ;;  %v1194_v1 = vsel %vm3905_vm1, %v1189_v61, %v1193_v60  ;;  %v3309_v60 = vld [vmem:[#allocation10 + $0x130] sm:$0xff]   ;;  %v3310_v61 = vld [vmem:[#allocation10 + $0x138] sm:$0xff]  }
 0x2f3   : > { %1195 = vst [vmem:[#allocation4] sm:$0xe] %v1194_v1 }
 0x2f4   : > { %v1197_v2 = vsel %vm3881_vm11, %v1190_v63, %v1196_v62  ;;  %v3312_v63 = vld [vmem:[#allocation10 + $0x180] sm:$0xff]  }
 0x2f5   : > { %1198 = vst [vmem:[#allocation4 + $0x4] sm:$0x3] %v1197_v2  ;;  %v3313_v2 = vld [vmem:[#allocation10 + $0x188] sm:$0xff]  }
 0x2fa   : > { %v1200_v4 = vld [vmem:[#allocation4] sm:$0xf] }
 0x2fb   : > { %2952 = vmatmul.mubr.bf16.vlgmr.msra.gmra.mrb[12].mxu1 %v1200_v4  ;;  %v1423_v20 = vld [vmem:[#allocation4] sm:$0xe] }
 0x2fc   : > { %v3969_v5 = vld [vmem:[#allocation4 + $0x4] sm:$0x1]  ;;  %2976 = vmatpush3.bf16.msra.mxu1 %v3276_v3  ;;  %2991 = vmatprep.mubr.msk.bf16.mxu1 %vm3575_vm0, %v3574_v0  ;;  %v1652_v48 = vld [vmem:[#allocation4] sm:$0xc] }
 0x2fd   : > { %v2558_v7 = vcombine.low %v1200_v4, %v3969_v5  ;;  %2977 = vmatprep.subr.bf16.mxu1 %v3574_v0  ;;  %v3981_v18 = vld [vmem:[#allocation4 + $0x4] sm:$0x3]  ;;  %v2575_v38 = vcombine.low %v1423_v20, %v3969_v5  ;;  %v3315_v4 = vld [vmem:[#allocation10 + $0x198] sm:$0xff]   ;;  %v3316_v5 = vld [vmem:[#allocation10 + $0x1a0] sm:$0xff]  }
 0x2fe   : > { %v2584_v22 = vcombine.low %v1423_v20, %v3981_v18  ;;  %v4005_v46 = vld [vmem:[#allocation4 + $0x4] sm:$0x7]  ;;  %v2593_v62 = vcombine.low %v1652_v48, %v3981_v18  ;;  %v3328_v20 = vld [vmem:[#allocation12 + $0x58] sm:$0xff]  }
 0x2ff   : > { %v1242_v8 = vshll.u32 %v2558_v7, 16  ;;  %v1240_v10 = vshrl.u32 %v2558_v7, 16  ;;  %v1443_v41 = vrot.slane %v2575_v38, 1  ;;  %v2602_v49 = vcombine.low %v1652_v48, %v4005_v46  ;;  %v3314_v3 = vld [vmem:[#allocation10 + $0x190] sm:$0xff]  }
 0x300   : > { %2978 = vmatpush3.bf16.msra.mxu1 %v3278_v6  ;;  %v1555_v25 = vshrl.u32 %v2584_v22, 16  ;;  %v1558_v26 = vshll.u32 %v2584_v22, 16  ;;  %v1672_v1 = vrot.slane %v2593_v62, 2  ;;  %v3317_v6 = vld [vmem:[#allocation10 + $0x1a8] sm:$0xff]   ;;  %v3318_v7 = vld [vmem:[#allocation10 + $0x1b0] sm:$0xff]   ;;  %v3330_v22 = vld [vmem:[#allocation12 + $0x60] sm:$0xff]  }
 0x301   : > { %v1244_v11 = vrot.slane %v1242_v8, 1  ;;  %2979 = vmatprep.subr.bf16.mxu1 %v3574_v0  ;;  %v1784_v52 = vshrl.u32 %v2602_v49, 16  ;;  %v1787_v53 = vshll.u32 %v2602_v49, 16  ;;  %v3319_v8 = vld [vmem:[#allocation10 + $0x1b8] sm:$0xff]   ;;  %v3326_v18 = vld [vmem:[#allocation12 + $0x50] sm:$0xff]  }
 0x302   : > { %v1557_v29 = vrot.slane %v1555_v25, 1  ;;  %v1560_v30 = vrot.slane %v1558_v26, 2  ;;  %v3333_v25 = vld [vmem:[#allocation12 + $0x30] sm:$0xff]  }
 0x303   : > { %v1245_v14 = vor.u32 %v1244_v11, %v1240_v10  ;;  %v1786_v56 = vrot.slane %v1784_v52, 2  ;;  %v1789_v57 = vrot.slane %v1787_v53, 3 }
 0x304   : > { %2980 = vmatpush3.bf16.msra.mxu1 %v3280_v9  ;;  %v1561_v34 = vor.u32 %v1560_v30, %v1557_v29  ;;  %v1881_v9 = vld [vmem:[#allocation4] sm:$0x8]  ;;  %v3335_v30 = vld [vmem:[#allocation12 + $0x38] sm:$0xff]  }
 0x305   : > { %2932 = vmatmul.mubr.bf16.vlgmr.msra.gmra.mrb[20].mxu0 %v1245_v14  ;;  %2981 = vmatprep.subr.bf16.mxu1 %v3574_v0  ;;  %v1790_v59 = vor.u32 %v1789_v57, %v1786_v56  ;;  %v2611_v10 = vcombine.low %v1881_v9, %v4005_v46  ;;  %v3322_v14 = vld [vmem:[#allocation12 + $0x40] sm:$0xff]  }
 0x306   : > { %2956 = vmatpush3.bf16.msra.mxu0 %v3281_v13  ;;  %2971 = vmatprep.mubr.msk.bf16.mxu0 %vm3575_vm0, %v3574_v0  ;;  %v3321_v13 = vld [vmem:[#allocation12] sm:$0xff]  }
 0x307   : > { %2957 = vmatprep.subr.bf16.mxu0 %v3574_v0  ;;  %v1901_v11 = vrot.slane %v2611_v10, 3  ;;  %v2013_v10 = vld [vmem:[#allocation3] sm:$0xe] }
 0x308   : > { %2982 = vmatpush3.bf16.msra.mxu1 %v3282_v15  ;;  %v3323_v15 = vld [vmem:[#allocation12 + $0x8] sm:$0xff]  }
 0x309   : > { %2983 = vmatprep.subr.bf16.mxu1 %v3574_v0 }
 0x30a   : > { %2958 = vmatpush3.bf16.msra.mxu0 %v3283_v16  ;;  %v3324_v16 = vld [vmem:[#allocation12 + $0x48] sm:$0xff]  }
 0x30b   : > { %2959 = vmatprep.subr.bf16.mxu0 %v3574_v0 }
 0x30c   : > { %2984 = vmatpush3.bf16.msra.mxu1 %v3284_v17  ;;  %v3325_v17 = vld [vmem:[#allocation12 + $0x10] sm:$0xff]  }
 0x30d   : > { %2985 = vmatprep.subr.bf16.mxu1 %v3574_v0 }
 0x30e   : > { %2960 = vmatpush3.bf16.msra.mxu0 %v3285_v19  ;;  %v3327_v19 = vld [vmem:[#allocation12 + $0x18] sm:$0xff]  }
 0x30f   : > { %2961 = vmatprep.subr.bf16.mxu0 %v3574_v0 }
 0x310   : > { %2986 = vmatpush3.bf16.msra.mxu1 %v3286_v21  ;;  %v3329_v21 = vld [vmem:[#allocation12 + $0x20] sm:$0xff]  }
 0x311   : > { %2987 = vmatprep.subr.bf16.mxu1 %v3574_v0 }
 0x312   : > { %2962 = vmatpush3.bf16.msra.mxu0 %v3287_v23  ;;  %v3331_v23 = vld [vmem:[#allocation12 + $0x28] sm:$0xff]  }
 0x313   : > { %2963 = vmatprep.subr.bf16.mxu0 %v3574_v0 }
 0x314   : > { %2988 = vmatpush3.bf16.msra.mxu1 %v3288_v24  ;;  %v3332_v24 = vld [vmem:[#allocation12 + $0x68] sm:$0xff]  }
 0x315   : > { %2989 = vmatprep.subr.bf16.mxu1 %v3574_v0 }
 0x316   : > { %2964 = vmatpush3.bf16.msra.mxu0 %v3289_v27 }
 0x317   : > { %2965 = vmatprep.subr.bf16.mxu0 %v3574_v0 }
 0x318   : > { %2990 = vmatpush3.bf16.msra.mxu1 %v3290_v28  ;;  %v3334_v28 = vld [vmem:[#allocation12 + $0x70] sm:$0xff]  }
 0x319   : > { %3015 = vmatprep.subr.bf16.mxu1 %v3574_v0 }
 0x31a   : > { %2966 = vmatpush3.bf16.msra.mxu0 %v3291_v31 }
 0x31b   : > { %2992 = vmatmul.mubr.bf16.vlgmr.msra.gmra.mrb[16].mxu1 %v1561_v34  ;;  %2967 = vmatprep.subr.bf16.mxu0 %v3574_v0 }
 0x31c   : > { %3016 = vmatpush3.bf16.msra.mxu1 %v3292_v33  ;;  %3031 = vmatprep.mubr.msk.bf16.mxu1 %vm3575_vm0, %v3574_v0  ;;  %v3336_v33 = vld [vmem:[#allocation12 + $0x78] sm:$0xff]  }
 0x31d   : > { %3017 = vmatprep.subr.bf16.mxu1 %v3574_v0 }
 0x31e   : > { %2968 = vmatpush3.bf16.msra.mxu0 %v3293_v35 }
 0x31f   : > { %2969 = vmatprep.subr.bf16.mxu0 %v3574_v0 }
 0x320   : > { %3018 = vmatpush3.bf16.msra.mxu1 %v3294_v36 }
 0x321   : > { %3019 = vmatprep.subr.bf16.mxu1 %v3574_v0 }
 0x322   : > { %2970 = vmatpush3.bf16.msra.mxu0 %v3295_v37 }
 0x323   : > { %2995 = vmatprep.subr.bf16.mxu0 %v3574_v0 }
 0x324   : > { %3020 = vmatpush3.bf16.msra.mxu1 %v3296_v39 }
 0x325   : > { %2972 = vmatmul.mubr.bf16.vlgmr.msra.gmra.mrb[24].mxu0 %v1443_v41  ;;  %3021 = vmatprep.subr.bf16.mxu1 %v3574_v0 }
 0x326   : > { %2996 = vmatpush3.bf16.msra.mxu0 %v3297_v40  ;;  %3011 = vmatprep.mubr.msk.bf16.mxu0 %vm3575_vm0, %v3574_v0 }
 0x327   : > { %2997 = vmatprep.subr.bf16.mxu0 %v3574_v0 }
 0x328   : > { %3022 = vmatpush3.bf16.msra.mxu1 %v3298_v42 }
 0x329   : > { %3023 = vmatprep.subr.bf16.mxu1 %v3574_v0 }
 0x32a   : > { %2998 = vmatpush3.bf16.msra.mxu0 %v3299_v43 }
 0x32b   : > { %2999 = vmatprep.subr.bf16.mxu0 %v3574_v0 }
 0x32c   : > { %3024 = vmatpush3.bf16.msra.mxu1 %v3300_v44 }
 0x32d   : > { %3025 = vmatprep.subr.bf16.mxu1 %v3574_v0 }
 0x32e   : > { %3000 = vmatpush3.bf16.msra.mxu0 %v3301_v45 }
 0x32f   : > { %3001 = vmatprep.subr.bf16.mxu0 %v3574_v0 }
 0x330   : > { %3026 = vmatpush3.bf16.msra.mxu1 %v3302_v47 }
 0x331   : > { %3027 = vmatprep.subr.bf16.mxu1 %v3574_v0 }
 0x332   : > { %3002 = vmatpush3.bf16.msra.mxu0 %v3303_v50 }
 0x333   : > { %3003 = vmatprep.subr.bf16.mxu0 %v3574_v0 }
 0x334   : > { %3028 = vmatpush3.bf16.msra.mxu1 %v3304_v51 }
 0x335   : > { %3029 = vmatprep.subr.bf16.mxu1 %v3574_v0 }
 0x336   : > { %3004 = vmatpush3.bf16.msra.mxu0 %v3305_v54 }
 0x337   : > { %3005 = vmatprep.subr.bf16.mxu0 %v3574_v0 }
 0x338   : > { %3030 = vmatpush3.bf16.msra.mxu1 %v3306_v55 }
 0x339   : > { %3055 = vmatprep.subr.bf16.mxu1 %v3574_v0 }
 0x33a   : > { %3006 = vmatpush3.bf16.msra.mxu0 %v3307_v58 }
 0x33b   : > { %3032 = vmatmul.mubr.bf16.vlgmr.msra.gmra.mrb[20].mxu1 %v1790_v59  ;;  %3007 = vmatprep.subr.bf16.mxu0 %v3574_v0  ;;  %v2620_v59 = vld [vmem:[#allocation13 + $0x2] ss:$0 sm:$0xff] }
 0x33c   : > { %3071 = vmatprep.mubr.msk.bf16.mxu1 %vm3575_vm0, %v3574_v0  ;;  %3056 = vmatpush3.bf16.msra.mxu1 %v3322_v14  ;;  %v2016_v14 = vld [vmem:[#allocation3 + $0x4] sm:$0x3] }
 0x33d   : > { %3057 = vmatprep.subr.bf16.mxu1 %v3574_v0 }
 0x33e   : > { %3008 = vmatpush3.bf16.msra.mxu0 %v3309_v60 }
 0x33f   : > { %3009 = vmatprep.subr.bf16.mxu0 %v3574_v0 }
 0x340   : > { %3058 = vmatpush3.bf16.msra.mxu1 %v3324_v16 }
 0x341   : > { %3059 = vmatprep.subr.bf16.mxu1 %v3574_v0 }
 0x342   : > { %3010 = vmatpush3.bf16.msra.mxu0 %v3310_v61 }
 0x343   : > { %3035 = vmatprep.subr.bf16.mxu0 %v3574_v0 }
 0x344   : > { %3060 = vmatpush3.bf16.msra.mxu1 %v3326_v18 }
 0x345   : > { %3012 = vmatmul.mubr.bf16.vlgmr.msra.gmra.mrb[28].mxu0 %v1672_v1  ;;  %3061 = vmatprep.subr.bf16.mxu1 %v3574_v0 }
 0x346   : > { %3036 = vmatpush3.bf16.msra.mxu0 %v3312_v63  ;;  %3051 = vmatprep.mubr.msk.bf16.mxu0 %vm3575_vm0, %v3574_v0 }
 0x347   : > { %3037 = vmatprep.subr.bf16.mxu0 %v3574_v0 }
 0x348   : > { %3062 = vmatpush3.bf16.msra.mxu1 %v3328_v20 }
 0x349   : > { %3063 = vmatprep.subr.bf16.mxu1 %v3574_v0 }
 0x34a   : > { %3038 = vmatpush3.bf16.msra.mxu0 %v3313_v2 }
 0x34b   : > { %3039 = vmatprep.subr.bf16.mxu0 %v3574_v0 }
 0x34c   : > { %3064 = vmatpush3.bf16.msra.mxu1 %v3330_v22 }
 0x34d   : > { %3065 = vmatprep.subr.bf16.mxu1 %v3574_v0 }
 0x34e   : > { %3040 = vmatpush3.bf16.msra.mxu0 %v3314_v3 }
 0x34f   : > { %3041 = vmatprep.subr.bf16.mxu0 %v3574_v0 }
 0x350   : > { %3066 = vmatpush3.bf16.msra.mxu1 %v3332_v24 }
 0x351   : > { %3067 = vmatprep.subr.bf16.mxu1 %v3574_v0 }
 0x352   : > { %3042 = vmatpush3.bf16.msra.mxu0 %v3315_v4 }
 0x353   : > { %3043 = vmatprep.subr.bf16.mxu0 %v3574_v0 }
 0x354   : > { %3068 = vmatpush3.bf16.msra.mxu1 %v3334_v28  ;;  %v3342_v28 = vld [vmem:[#allocation12 + $0x98] sm:$0xff]  }
 0x355   : > { %3069 = vmatprep.subr.bf16.mxu1 %v3574_v0 }
 0x356   : > { %3044 = vmatpush3.bf16.msra.mxu0 %v3316_v5 }
 0x357   : > { %3045 = vmatprep.subr.bf16.mxu0 %v3574_v0 }
 0x358   : > { %3070 = vmatpush3.bf16.msra.mxu1 %v3336_v33  ;;  %v3346_v33 = vld [vmem:[#allocation12 + $0xb8] sm:$0xff]  }
 0x359   : > { %3095 = vmatprep.subr.bf16.mxu1 %v3574_v0 }
 0x35a   : > { %3046 = vmatpush3.bf16.msra.mxu0 %v3317_v6 }
 0x35b   : > { %3047 = vmatprep.subr.bf16.mxu0 %v3574_v0 }
 0x35e   : > { %3048 = vmatpush3.bf16.msra.mxu0 %v3318_v7 }
 0x35f   : > { %3049 = vmatprep.subr.bf16.mxu0 %v3574_v0 }
 0x362   : > { %3050 = vmatpush3.bf16.msra.mxu0 %v3319_v8 }
 0x363   : > { %3075 = vmatprep.subr.bf16.mxu0 %v3574_v0 }
 0x365   : > { %3052 = vmatmul.mubr.bf16.vlgmr.msra.gmra.mrb[32].mxu0 %v1901_v11 }
 0x366   : > { %3091 = vmatprep.mubr.msk.bf16.mxu0 %vm3575_vm0, %v3574_v0  ;;  %3076 = vmatpush3.bf16.msra.mxu0 %v3321_v13 }
 0x367   : > { %3077 = vmatprep.subr.bf16.mxu0 %v3574_v0 }
 0x36a   : > { %3078 = vmatpush3.bf16.msra.mxu0 %v3323_v15 }
 0x36b   : > { %3079 = vmatprep.subr.bf16.mxu0 %v3574_v0 }
 0x36e   : > { %3080 = vmatpush3.bf16.msra.mxu0 %v3325_v17 }
 0x36f   : > { %3081 = vmatprep.subr.bf16.mxu0 %v3574_v0 }
 0x372   : > { %3082 = vmatpush3.bf16.msra.mxu0 %v3327_v19 }
 0x373   : > { %3083 = vmatprep.subr.bf16.mxu0 %v3574_v0 }
 0x376   : > { %3084 = vmatpush3.bf16.msra.mxu0 %v3329_v21 }
 0x377   : > { %3085 = vmatprep.subr.bf16.mxu0 %v3574_v0 }
 0x37a   : > { %3086 = vmatpush3.bf16.msra.mxu0 %v3331_v23 }
 0x37b   : > { %3087 = vmatprep.subr.bf16.mxu0 %v3574_v0 }
 0x37e   : > { %3088 = vmatpush3.bf16.msra.mxu0 %v3333_v25 }
 0x37f   : > { %3089 = vmatprep.subr.bf16.mxu0 %v3574_v0 }
 0x382   : > { %3090 = vmatpush3.bf16.msra.mxu0 %v3335_v30  ;;  %v3344_v30 = vld [vmem:[#allocation12 + $0xa8] sm:$0xff]  }
 0x3ce   : > { %v1417_v26 = vpop.f32.mrb[12].mxu1 }
 0x3cf   : > { %v2953_v27 = vpop.f32.mrb[13].mxu1 }
 0x3d0   : > { %v1420_v29 = vpop.f32.mrb[14].mxu1  ;;  %v3340_v27 = vld [vmem:[#allocation12 + $0x88] sm:$0xff]  }
 0x3d1   : > { %v2954_v31 = vpop.f32.mrb[15].mxu1  ;;  %v3343_v29 = vld [vmem:[#allocation12 + $0xa0] sm:$0xff]  }
 0x3d2   : > { %v3345_v31 = vld [vmem:[#allocation12 + $0xb0] sm:$0xff]  }
 0x3d8   : > { %v1329_v34 = vpop.f32.mrb[20].mxu0 }
 0x3d9   : > { %v1418_v35 = vadd.f32 %v1417_v26, %v1329_v34  ;;  %v2933_v36 = vpop.f32.mrb[21].mxu0  ;;  %v3339_v26 = vld [vmem:[#allocation12 + $0x80] sm:$0xff]  }
 0x3da   : > { %v1332_v37 = vpop.f32.mrb[22].mxu0 }
 0x3db   : > { %v2934_v38 = vpop.f32.mrb[23].mxu0 }
 0x3ee   : > { %v1645_v39 = vpop.f32.mrb[16].mxu1 }
 0x3ef   : > { %v2993_v40 = vpop.f32.mrb[17].mxu1 }
 0x3f0   : > { %v1648_v41 = vpop.f32.mrb[18].mxu1 }
 0x3f1   : > { %v2994_v42 = vpop.f32.mrb[19].mxu1 }
 0x3f8   : > { %v1527_v43 = vpop.f32.mrb[24].mxu0 }
 0x3f9   : > { %v1533_v44 = vadd.f32 %v1527_v43, %v1418_v35  ;;  %v2973_v45 = vpop.f32.mrb[25].mxu0 }
 0x3fa   : > { %v1530_v46 = vpop.f32.mrb[26].mxu0 }
 0x3fb   : > { %v2974_v47 = vpop.f32.mrb[27].mxu0  ;;  %v1651_v48 = vadd.f32 %v1645_v39, %v1533_v44  ;;  %v2649_v46 = vld [vmem:[#allocation13 + $0x3] ss:$0 sm:$0xff] }
 0x40e   : > { %v1874_v49 = vpop.f32.mrb[20].mxu1 }
 0x40f   : > { %v3033_v50 = vpop.f32.mrb[21].mxu1 }
 0x410   : > { %v1877_v51 = vpop.f32.mrb[22].mxu1 }
 0x411   : > { %v3034_v52 = vpop.f32.mrb[23].mxu1 }
 0x418   : > { %v1756_v53 = vpop.f32.mrb[28].mxu0 }
 0x419   : > { %v1762_v54 = vadd.f32 %v1756_v53, %v1651_v48  ;;  %v3013_v55 = vpop.f32.mrb[29].mxu0 }
 0x41a   : > { %v1759_v56 = vpop.f32.mrb[30].mxu0 }
 0x41b   : > { %v3014_v57 = vpop.f32.mrb[31].mxu0  ;;  %v1880_v58 = vadd.f32 %v1874_v49, %v1762_v54 }
 0x438   : > { %v1985_v60 = vpop.f32.mrb[32].mxu0 }
 0x439   : > { %v1991_v61 = vadd.f32 %v1985_v60, %v1880_v58  ;;  %v3053_v62 = vpop.f32.mrb[33].mxu0 }
 0x43a   : > { %v1988_v63 = vpop.f32.mrb[34].mxu0 }
 0x43b   : > { %v1996_v1 = vadd.f32 %v2620_v59, %v1991_v61  ;;  %v3054_v2 = vpop.f32.mrb[35].mxu0 }
 0x43d   : > { %v1997_v3 = vmax.f32 %v1996_v1, 0.0 }
 0x43f   : > { %v2655_v4 = vpack.c.bf16 %v1997_v3, %v1997_v3 }
 0x441   : > { %v2003_v5 = vshrl.u32 %v2655_v4, 16  ;;  %v2006_v6 = vshll.u32 %v2655_v4, 16 }
 0x443   : > { %v2005_v7 = vrot.slane %v2003_v5, 6  ;;  %v2008_v8 = vrot.slane %v2006_v6, 7 }
 0x445   : > { %v2009_v9 = vor.u32 %v2008_v8, %v2005_v7 }
 0x447   : > { %v2010_v11 = vrot.slane %v2009_v9, 4  ;;  %v2014_v13 = vsel %vm3905_vm1, %v2009_v9, %v2013_v10 }
 0x448   : > { %2015 = vst [vmem:[#allocation3] sm:$0xe] %v2014_v13 }
 0x449   : > { %v2017_v15 = vsel %vm3881_vm11, %v2010_v11, %v2016_v14 }
 0x44a   : > { %2018 = vst [vmem:[#allocation3 + $0x4] sm:$0x3] %v2017_v15 }
 0x44f   : > { %v2020_v16 = vld [vmem:[#allocation3] sm:$0xe] }
 0x450   : > { %v2250_v34 = vld [vmem:[#allocation3] sm:$0xc] }
 0x451   : > { %v2021_v17 = vld [vmem:[#allocation3 + $0x4] sm:$0x1] }
 0x452   : > { %v2038_v18 = vld [vmem:[#allocation3 + $0x4] sm:$0x3]  ;;  %v2631_v20 = vcombine.low %v2020_v16, %v2021_v17 }
 0x453   : > { %v2622_v19 = vcombine.low %v2020_v16, %v2038_v18  ;;  %v2640_v35 = vcombine.low %v2250_v34, %v2038_v18 }
 0x454   : > { %v2160_v21 = vrot.slane %v2631_v20, 1 }
 0x455   : > { %v2061_v22 = vshrl.u32 %v2622_v19, 16  ;;  %v2064_v23 = vshll.u32 %v2622_v19, 16  ;;  %v2270_v36 = vrot.slane %v2640_v35, 2 }
 0x456   : > { %3092 = vmatmul.mubr.bf16.vlgmr.msra.gmra.mrb[36].mxu0 %v2160_v21 }
 0x457   : > { %v2063_v24 = vrot.slane %v2061_v22, 1  ;;  %v2066_v25 = vrot.slane %v2064_v23, 2 }
 0x459   : > { %v2067_v12 = vor.u32 %v2066_v25, %v2063_v24 }
 0x45b   : > { %3072 = vmatmul.mubr.bf16.vlgmr.msra.gmra.mrb[24].mxu1 %v2067_v12 }
 0x45c   : > { %3096 = vmatpush3.bf16.msra.mxu1 %v3339_v26  ;;  %3111 = vmatprep.mubr.msk.bf16.mxu1 %vm3575_vm0, %v3574_v0 }
 0x45d   : > { %3097 = vmatprep.subr.bf16.mxu1 %v3574_v0 }
 0x460   : > { %3098 = vmatpush3.bf16.msra.mxu1 %v3340_v27 }
 0x461   : > { %3099 = vmatprep.subr.bf16.mxu1 %v3574_v0 }
 0x464   : > { %3100 = vmatpush3.bf16.msra.mxu1 %v3341_v32 }
 0x465   : > { %3101 = vmatprep.subr.bf16.mxu1 %v3574_v0 }
 0x468   : > { %3102 = vmatpush3.bf16.msra.mxu1 %v3342_v28 }
 0x469   : > { %3103 = vmatprep.subr.bf16.mxu1 %v3574_v0 }
 0x46c   : > { %3104 = vmatpush3.bf16.msra.mxu1 %v3343_v29 }
 0x46d   : > { %3105 = vmatprep.subr.bf16.mxu1 %v3574_v0 }
 0x470   : > { %3106 = vmatpush3.bf16.msra.mxu1 %v3344_v30 }
 0x471   : > { %3107 = vmatprep.subr.bf16.mxu1 %v3574_v0 }
 0x474   : > { %3108 = vmatpush3.bf16.msra.mxu1 %v3345_v31 }
 0x475   : > { %3109 = vmatprep.subr.bf16.mxu1 %v3574_v0 }
 0x478   : > { %3110 = vmatpush3.bf16.msra.mxu1 %v3346_v33 }
 0x47b   : > { %3112 = vmatmul.mubr.bf16.vlgmr.msra.gmra.mrb[28].mxu1 %v2270_v36 }
 0x529   : > { %v2244_v37 = vpop.f32.mrb[36].mxu0 }
 0x52a   : > { %v3093_v38 = vpop.f32.mrb[37].mxu0 }
 0x52b   : > { %v2247_v39 = vpop.f32.mrb[38].mxu0 }
 0x52c   : > { %v3094_v40 = vpop.f32.mrb[39].mxu0 }
 0x52e   : > { %v2151_v41 = vpop.f32.mrb[24].mxu1 }
 0x52f   : > { %v2245_v42 = vadd.f32 %v2244_v37, %v2151_v41  ;;  %v3073_v43 = vpop.f32.mrb[25].mxu1 }
 0x530   : > { %v2154_v44 = vpop.f32.mrb[26].mxu1 }
 0x531   : > { %v3074_v45 = vpop.f32.mrb[27].mxu1 }
 0x54e   : > { %v2354_v47 = vpop.f32.mrb[28].mxu1 }
 0x54f   : > { %v2360_v48 = vadd.f32 %v2354_v47, %v2245_v42  ;;  %v3113_v49 = vpop.f32.mrb[29].mxu1 }
 0x550   : > { %v2357_v0 = vpop.f32.mrb[30].mxu1 }
 0x551   : > { %v2365_v50 = vadd.f32 %v2649_v46, %v2360_v48  ;;  %v3114_v51 = vpop.f32.mrb[31].mxu1 }
 0x553   : > { %v2366_v52 = vmax.f32 %v2365_v50, 0.0 }
 0x555   : > { %v2367_v53 = vpack.c.bf16 %v2366_v52, %v2366_v52 }
 0x557   : > { %2368 = vst [vmem:[%s337_s8] sm:$0xf] %v2367_v53 }
 0x558 PF: > { %p19_p6 = scmp.ge.s32.totalorder %s3779_s15, 4   ;;  %s4109_s21 = smov %s3556_s22 }
 0x559   : > { %s4110_s22 = smov %s3560_s23  ;;  %s4111_s23 = smov %s3790_s30 }
 0x55a   : > { %s4112_s24 = smov %s3779_s15  ;;  %21 = sbr.rel (!%p19_p6) target bundleno = 6 (0x6), region = 104 }
 0x561   :  { %2388 = vsyncpa [#allocation6], 1 }
 0x562   :  { %2390 = vsyncpa [#allocation6 + $0x1], 1 }
 0x563   :  { %2391 = vsyncpa [#allocation8], 1 }
 0x564   :  { %2392 = vsyncpa [#allocation11], 1 }
 0x565   :  { %2393 = vsyncpa [#allocation14], 1 }

</bundles_post_ra>
